<compile_context>
chip_gen: v7x
topology: tpu7x:2x2x1
jax: 0.10.0
libtpu: 0.0.40
codegen_flags: <defaults>
</compile_context>

<pallas_src>
import functools

import jax
import jax.numpy as jnp
from jax.experimental import pallas as pl
from jax.experimental.pallas import tpu as pltpu


def _cdiv(a, b):
    return -(-a // b)


def _round_up(x, m):
    return _cdiv(x, m) * m


def _num_tensorcores():
    """Best-effort TensorCore-per-chip query (v7x has 2); safe fallback of 1."""
    try:
        info = pltpu.get_tpu_info()
        for name in ("num_cores", "core_count", "num_tensorcores", "tensorcore_count"):
            val = getattr(info, name, None)
            if val:
                return max(1, int(val))
    except Exception:
        pass
    try:
        dev = jax.local_devices()[0]
        for name in ("num_cores", "core_count"):
            val = getattr(dev, name, None)
            if val:
                return max(1, int(val))
    except Exception:
        pass
    return 1


def _resident_spec(shape):
    """BlockSpec for a grid-invariant (weight) operand: constant index map and,
    when supported, a single VMEM buffer (no point double-buffering constants)."""
    idx = lambda i: (0,) * len(shape)
    try:
        return pl.BlockSpec(shape, idx, pipeline_mode=pl.Buffered(1))
    except Exception:  # older API without pipeline_mode -> default double buffer
        return pl.BlockSpec(shape, idx)


# --------------------------------------------------------------------------- kernel


def _painn_update_kernel(s_ref, v_ref, wuv_ref, w1_ref, b1_ref, w2_ref, b2_ref,
                         out_s_ref, out_v_ref):
    f32 = jnp.float32
    Fp = s_ref.shape[-1]            # padded (lane-dense) feature width
    mm_dt = wuv_ref.dtype           # matmul operand dtype (bf16 or f32); f32 accumulate

    scalar = s_ref[...].astype(f32)                       # (tn, Fp)

    # Fused linearU|linearV: one MXU pass per spatial component.  Each component is a
    # 128-lane-aligned slab of the (tn, 3*Fp) vector block -> no relayout, no concat.
    Uv, Vv = [], []
    for c in range(3):
        vc = v_ref[:, c * Fp:(c + 1) * Fp].astype(mm_dt)                  # (tn, Fp)
        uv = jnp.dot(vc, wuv_ref[...], preferred_element_type=f32)        # (tn, 2Fp)
        Uv.append(uv[:, :Fp])
        Vv.append(uv[:, Fp:])

    # ||Vv||_2 over the spatial axis and <Uv, Vv>: pure VPU adds/muls.
    Vv_norm = jnp.sqrt(Vv[0] * Vv[0] + Vv[1] * Vv[1] + Vv[2] * Vv[2])     # (tn, Fp)
    inner = Uv[0] * Vv[0] + Uv[1] * Vv[1] + Uv[2] * Vv[2]                 # (tn, Fp)

    # combined_mlp: Linear(2F -> F) as a single K=2Fp matmul (full MXU depth on
    # v6e/v7x), SiLU, Linear(F -> 3F).
    mlp_in = jnp.concatenate([scalar, Vv_norm], axis=-1).astype(mm_dt)    # (tn, 2Fp)
    h = jnp.dot(mlp_in, w1_ref[...], preferred_element_type=f32) + b1_ref[...]
    h = h * jax.nn.sigmoid(h)                                             # SiLU (EUP)
    mlp_out = jnp.dot(h.astype(mm_dt), w2_ref[...],
                      preferred_element_type=f32) + b2_ref[...]           # (tn, 3Fp)

    a_ss = mlp_out[:, 0 * Fp:1 * Fp]
    a_sv = mlp_out[:, 1 * Fp:2 * Fp]
    a_vv = mlp_out[:, 2 * Fp:3 * Fp]

    out_s_ref[...] = (scalar + a_ss + a_sv * inner).astype(out_s_ref.dtype)
    for c in range(3):
        sl = slice(c * Fp, (c + 1) * Fp)
        out_v_ref[:, sl] = (v_ref[:, sl].astype(f32) + a_vv * Uv[c]).astype(out_v_ref.dtype)


# ------------------------------------------------------------------- param packing


def pack_painn_params(params, *, use_bf16=False):
    """One-time packing of PaiNNUpdate weights (hoisted out of the per-call path).

    params: dict with wu, wv (F,F), w1 (2F,F), b1 (F,), w2 (F,3F), b2 (3F,);
    weights stored as (in, out) so the kernel computes x @ W (== torch x @ W^T).
    Returns padded / fused / (optionally) bf16-cast weights plus static F, Fp.
    """
    F = int(params["b1"].shape[0])
    Fp = 128 * _cdiv(F, 128)
    f32 = jnp.float32
    w_dt = jnp.bfloat16 if use_bf16 else f32

    def pad2(x, r, c):
        x = jnp.asarray(x, f32)
        return jnp.pad(x, ((0, r - x.shape[0]), (0, c - x.shape[1])))

    wu, wv = params["wu"], params["wv"]
    w1, w2 = params["w1"], params["w2"]

    wuv = jnp.concatenate([pad2(wu, Fp, Fp), pad2(wv, Fp, Fp)], axis=1).astype(w_dt)
    w1p = jnp.concatenate([pad2(w1[:F], Fp, Fp), pad2(w1[F:], Fp, Fp)], axis=0).astype(w_dt)
    b1p = jnp.pad(jnp.asarray(params["b1"], f32).reshape(1, F), ((0, 0), (0, Fp - F)))
    w2p = jnp.concatenate([pad2(w2[:, k * F:(k + 1) * F], Fp, Fp) for k in range(3)],
                          axis=1).astype(w_dt)
    b2 = jnp.asarray(params["b2"], f32).reshape(1, 3 * F)
    b2p = jnp.concatenate([jnp.pad(b2[:, k * F:(k + 1) * F], ((0, 0), (0, Fp - F)))
                           for k in range(3)], axis=1)

    return {"wuv": wuv, "w1": w1p, "b1": b1p, "w2": w2p, "b2": b2p, "F": F, "Fp": Fp}


# ------------------------------------------------------------------------ wrapper


@functools.partial(jax.jit, static_argnames=("F", "Fp", "tn"))
def _painn_update_impl(s, v, wuv, w1, b1, w2, b2, *, F, Fp, tn):
    N = s.shape[0]
    Np = _round_up(N, tn)
    s_dt, v_dt = s.dtype, v.dtype

    s_in, v_in = s, v
    if Fp != F:
        # TODO(synk): for genuinely narrow F (<128) workloads, pack several feature
        # groups per 128-lane slab instead of zero-padding (padding wastes MXU/DMA).
        s_in = jnp.pad(s_in, ((0, 0), (0, Fp - F)))
        v_in = jnp.pad(v_in, ((0, 0), (0, 0), (0, Fp - F)))
    v_flat = v_in.reshape(N, 3 * Fp)          # free row-major bitcast when Fp == F
    if Np != N:
        s_in = jnp.pad(s_in, ((0, Np - N), (0, 0)))
        v_flat = jnp.pad(v_flat, ((0, Np - N), (0, 0)))

    grid = (Np // tn,)

    act_isz = max(jnp.dtype(s_dt).itemsize, jnp.dtype(v_dt).itemsize)
    w_isz = jnp.dtype(wuv.dtype).itemsize
    weight_bytes = (7 * Fp * Fp) * w_isz + (4 * Fp) * 4
    cost = pl.CostEstimate(
        flops=int(2 * 11 * Fp * Fp * Np),                 # U,V (6F^2) + MLP (5F^2) MACs
        transcendentals=int(2 * Np * Fp),                 # sigmoid + sqrt
        bytes_accessed=int(2 * Np * 4 * Fp * act_isz + weight_bytes),
    )
    vmem_est = 2 * 2 * tn * 4 * Fp * act_isz + 2 * weight_bytes
    vmem_limit = int(min(64 * 2**20, max(32 * 2**20, 2 * vmem_est)))

    out_shapes = (
        jax.ShapeDtypeStruct((Np, Fp), s_dt),
        jax.ShapeDtypeStruct((Np, 3 * Fp), v_dt),
    )

    out_s, out_vf = pl.pallas_call(
        _painn_update_kernel,
        out_shape=out_shapes,
        grid_spec=pltpu.PrefetchScalarGridSpec(
            num_scalar_prefetch=0,
            grid=grid,
            in_specs=[
                pl.BlockSpec((tn, Fp), lambda i: (i, 0)),        # scalar state
                pl.BlockSpec((tn, 3 * Fp), lambda i: (i, 0)),    # vector state (flat)
                _resident_spec((Fp, 2 * Fp)),                    # [Wu | Wv]
                _resident_spec((2 * Fp, Fp)),                    # W1 (scalar; norm)
                _resident_spec((1, Fp)),                         # b1
                _resident_spec((Fp, 3 * Fp)),                    # W2
                _resident_spec((1, 3 * Fp)),                     # b2
            ],
            out_specs=[
                pl.BlockSpec((tn, Fp), lambda i: (i, 0)),
                pl.BlockSpec((tn, 3 * Fp), lambda i: (i, 0)),
            ],
        ),
        compiler_params=pltpu.CompilerParams(
            dimension_semantics=("parallel",),
            vmem_limit_bytes=vmem_limit),
        cost_estimate=cost,
    )(s_in, v_flat, wuv, w1, b1, w2, b2)

    if Np != N:
        out_s = out_s[:N]
        out_vf = out_vf[:N]
    out_v = out_vf.reshape(N, 3, Fp)          # free bitcast when Fp == F
    if Fp != F:
        out_s = out_s[:, :F]
        out_v = out_v[:, :, :F]
    return out_s, out_v


def painn_update(node_state_scalar, node_state_vector, packed, *, tile_n=512,
                 min_grid_steps=None):
    """PaiNNUpdate forward. `packed` comes from pack_painn_params (one-time)."""
    N, F_in = node_state_scalar.shape
    assert node_state_vector.shape == (N, 3, F_in)
    F, Fp = packed["F"], packed["Fp"]
    assert F == F_in, "packed params were built for a different node_size"

    if min_grid_steps is None:
        # >= 2 grid steps per TensorCore so prefetch/writeback overlap compute on
        # every core (v7x megacore); on 1-core chips this only asks for 2 steps.
        min_grid_steps = 2 * _num_tensorcores()

    tile_n = max(8, 8 * (tile_n // 8))
    cap = 8 * _cdiv(_cdiv(N, max(1, min_grid_steps)), 8)
    tn = min(tile_n, max(64, cap))            # big tiles amortize ~0.35us/step
    tn = max(8, min(tn, 8 * _cdiv(N, 8)))     # never larger than (rounded) N

    return _painn_update_impl(node_state_scalar, node_state_vector,
                              packed["wuv"], packed["w1"], packed["b1"],
                              packed["w2"], packed["b2"], F=F, Fp=Fp, tn=tn)


# ---------------------------------------------------------------------- reference


def painn_update_reference(node_state_scalar, node_state_vector, params):
    """Pure-JAX reference mirroring the PyTorch forward (rms_norm=False)."""
    s = node_state_scalar.astype(jnp.float32)
    v = node_state_vector.astype(jnp.float32)
    Uv = jnp.einsum("ncf,fg->ncg", v, params["wu"])
    Vv = jnp.einsum("ncf,fg->ncg", v, params["wv"])
    Vv_norm = jnp.linalg.norm(Vv, axis=1)
    mlp_in = jnp.concatenate([s, Vv_norm], axis=1)
    h = mlp_in @ params["w1"] + params["b1"]
    h = h * jax.nn.sigmoid(h)
    mlp_out = h @ params["w2"] + params["b2"]
    F = s.shape[1]
    a_ss, a_sv, a_vv = mlp_out[:, :F], mlp_out[:, F:2 * F], mlp_out[:, 2 * F:]
    inner = jnp.sum(Uv * Vv, axis=1)
    return s + a_ss + a_sv * inner, v + a_vv[:, None, :] * Uv


def make_params(key, node_size):
    """Deterministic synthetic parameters; weights stored as (in, out)."""
    F = node_size
    ks = jax.random.split(key, 6)
    scale = 1.0 / jnp.sqrt(F)
    return {
        "wu": jax.random.normal(ks[0], (F, F), jnp.float32) * scale,
        "wv": jax.random.normal(ks[1], (F, F), jnp.float32) * scale,
        "w1": jax.random.normal(ks[2], (2 * F, F), jnp.float32) * (1.0 / jnp.sqrt(2 * F)),
        "b1": jax.random.normal(ks[3], (F,), jnp.float32) * 0.01,
        "w2": jax.random.normal(ks[4], (F, 3 * F), jnp.float32) * scale,
        "b2": jax.random.normal(ks[5], (3 * F,), jnp.float32) * 0.01,
    }


if __name__ == "__main__":
    # TODO(synk): rms_norm=True branch (RMSNorm on scalar/vector) not implemented;
    # the default PaiNNUpdate construction (rms_norm=False) is what this reproduces.
    key = jax.random.PRNGKey(0)
    ks = jax.random.split(key, 6)

    # Case 1: typical PaiNN width (F=128): lane-dense fast path, zero host-side copies.
    F1, N1 = 128, 512
    s1 = jax.random.normal(ks[0], (N1, F1), jnp.float32)
    v1 = jax.random.normal(ks[1], (N1, 3, F1), jnp.float32)
    p1 = make_params(ks[2], F1)
    packed1 = pack_painn_params(p1)                     # one-time weight packing
    out_s, out_v = painn_update(s1, v1, packed1)
    jax.block_until_ready((out_s, out_v))
    ref_s, ref_v = painn_update_reference(s1, v1, p1)
    assert jnp.allclose(out_s, ref_s, atol=1e-4, rtol=1e-4), "scalar mismatch (f32)"
    assert jnp.allclose(out_v, ref_v, atol=1e-4, rtol=1e-4), "vector mismatch (f32)"

    # Case 2: ragged node count (N=500) on the lane-dense path (exercises node padding).
    s2, v2 = s1[:500], v1[:500]
    out_s2, out_v2 = painn_update(s2, v2, packed1)
    jax.block_until_ready((out_s2, out_v2))
    ref_s2, ref_v2 = painn_update_reference(s2, v2, p1)
    assert jnp.allclose(out_s2, ref_s2, atol=1e-4, rtol=1e-4), "scalar mismatch (ragged N)"
    assert jnp.allclose(out_v2, ref_v2, atol=1e-4, rtol=1e-4), "vector mismatch (ragged N)"

    # Case 3: narrow / ragged (F=32, N=50): exercises the feature-pad fallback path.
    F3, N3 = 32, 50
    s3 = jax.random.normal(ks[3], (N3, F3), jnp.float32)
    v3 = jax.random.normal(ks[4], (N3, 3, F3), jnp.float32)
    p3 = make_params(ks[5], F3)
    packed3 = pack_painn_params(p3)
    out_s3, out_v3 = painn_update(s3, v3, packed3)
    jax.block_until_ready((out_s3, out_v3))
    ref_s3, ref_v3 = painn_update_reference(s3, v3, p3)
    assert jnp.allclose(out_s3, ref_s3, atol=1e-4, rtol=1e-4), "scalar mismatch (padded F)"
    assert jnp.allclose(out_v3, ref_v3, atol=1e-4, rtol=1e-4), "vector mismatch (padded F)"

    # Case 4: bf16 weights AND bf16 activations (halves activation DMA on the
    # mem-bound path).  Reference uses the same bf16-rounded inputs with f32 weights.
    packed_bf16 = pack_painn_params(p1, use_bf16=True)
    s_bf = s1.astype(jnp.bfloat16)
    v_bf = v1.astype(jnp.bfloat16)
    out_s4, out_v4 = painn_update(s_bf, v_bf, packed_bf16)
    jax.block_until_ready((out_s4, out_v4))
    assert out_s4.dtype == jnp.bfloat16 and out_v4.dtype == jnp.bfloat16
    ref_s4, ref_v4 = painn_update_reference(s_bf, v_bf, p1)
    rel_s = jnp.max(jnp.abs(out_s4.astype(jnp.float32) - ref_s4)) / (jnp.max(jnp.abs(ref_s4)) + 1e-6)
    rel_v = jnp.max(jnp.abs(out_v4.astype(jnp.float32) - ref_v4)) / (jnp.max(jnp.abs(ref_v4)) + 1e-6)
    assert rel_s < 3e-2 and rel_v < 3e-2, f"bf16 path mismatch (rel_s={rel_s}, rel_v={rel_v})"

    print("KERNEL_OK")
</pallas_src>

<mosaic_0001>
module attributes {stable_mosaic.version = 11 : i64} {
  func.func @_painn_update_kernel(%arg0: i32, %arg1: memref<256x128xf32, #tpu.memory_space<vmem>>, %arg2: memref<256x384xf32, #tpu.memory_space<vmem>>, %arg3: memref<128x256xf32, #tpu.memory_space<vmem>>, %arg4: memref<256x128xf32, #tpu.memory_space<vmem>>, %arg5: memref<1x128xf32, #tpu.memory_space<vmem>>, %arg6: memref<128x384xf32, #tpu.memory_space<vmem>>, %arg7: memref<1x384xf32, #tpu.memory_space<vmem>>, %arg8: memref<256x128xf32, #tpu.memory_space<vmem>>, %arg9: memref<256x384xf32, #tpu.memory_space<vmem>>) attributes {dimension_semantics = [#tpu.dimension_semantics<parallel>], iteration_bounds = array<i64: 2>, scalar_prefetch = 0 : i64, scratch_operands = 0 : i64, tpu.core_type = #tpu.core_type<tc>, window_params = [{transform_indices = @transform_0, window_bounds = array<i64: 256, 128>}, {transform_indices = @transform_1, window_bounds = array<i64: 256, 384>}, {pipeline_mode = #tpu.pipeline_mode<synchronous>, transform_indices = @transform_2, window_bounds = array<i64: 128, 256>}, {pipeline_mode = #tpu.pipeline_mode<synchronous>, transform_indices = @transform_3, window_bounds = array<i64: 256, 128>}, {pipeline_mode = #tpu.pipeline_mode<synchronous>, transform_indices = @transform_4, window_bounds = array<i64: 1, 128>}, {pipeline_mode = #tpu.pipeline_mode<synchronous>, transform_indices = @transform_5, window_bounds = array<i64: 128, 384>}, {pipeline_mode = #tpu.pipeline_mode<synchronous>, transform_indices = @transform_6, window_bounds = array<i64: 1, 384>}, {transform_indices = @transform_7, window_bounds = array<i64: 256, 128>}, {transform_indices = @transform_8, window_bounds = array<i64: 256, 384>}]} {
    %c0 = arith.constant 0 : index
    %c0_0 = arith.constant 0 : index
    %0 = vector.load %arg1[%c0, %c0_0] : memref<256x128xf32, #tpu.memory_space<vmem>>, vector<256x128xf32>
    %c0_1 = arith.constant 0 : index
    %c0_2 = arith.constant 0 : index
    %1 = vector.load %arg2[%c0_1, %c0_2] : memref<256x384xf32, #tpu.memory_space<vmem>>, vector<256x128xf32>
    %c0_3 = arith.constant 0 : index
    %c0_4 = arith.constant 0 : index
    %2 = vector.load %arg3[%c0_3, %c0_4] : memref<128x256xf32, #tpu.memory_space<vmem>>, vector<128x256xf32>
    %cst = arith.constant dense<0.000000e+00> : vector<256x256xf32>
    %3 = tpu.matmul %1, %2, %cst {dimension_numbers = #tpu.dot_dimension_numbers<[1], [0], [0], [1], [0, 0, 1, 1], [], []>} : vector<256x128xf32>, vector<128x256xf32>, vector<256x256xf32> -> vector<256x256xf32>
    %4 = vector.extract_strided_slice %3 {offsets = [0, 0], sizes = [256, 128], strides = [1, 1]} : vector<256x256xf32> to vector<256x128xf32>
    %5 = vector.extract_strided_slice %3 {offsets = [0, 128], sizes = [256, 128], strides = [1, 1]} : vector<256x256xf32> to vector<256x128xf32>
    %c0_5 = arith.constant 0 : index
    %c128 = arith.constant 128 : index
    %6 = vector.load %arg2[%c0_5, %c128] : memref<256x384xf32, #tpu.memory_space<vmem>>, vector<256x128xf32>
    %c0_6 = arith.constant 0 : index
    %c0_7 = arith.constant 0 : index
    %7 = vector.load %arg3[%c0_6, %c0_7] : memref<128x256xf32, #tpu.memory_space<vmem>>, vector<128x256xf32>
    %cst_8 = arith.constant dense<0.000000e+00> : vector<256x256xf32>
    %8 = tpu.matmul %6, %7, %cst_8 {dimension_numbers = #tpu.dot_dimension_numbers<[1], [0], [0], [1], [0, 0, 1, 1], [], []>} : vector<256x128xf32>, vector<128x256xf32>, vector<256x256xf32> -> vector<256x256xf32>
    %9 = vector.extract_strided_slice %8 {offsets = [0, 0], sizes = [256, 128], strides = [1, 1]} : vector<256x256xf32> to vector<256x128xf32>
    %10 = vector.extract_strided_slice %8 {offsets = [0, 128], sizes = [256, 128], strides = [1, 1]} : vector<256x256xf32> to vector<256x128xf32>
    %c0_9 = arith.constant 0 : index
    %c256 = arith.constant 256 : index
    %11 = vector.load %arg2[%c0_9, %c256] : memref<256x384xf32, #tpu.memory_space<vmem>>, vector<256x128xf32>
    %c0_10 = arith.constant 0 : index
    %c0_11 = arith.constant 0 : index
    %12 = vector.load %arg3[%c0_10, %c0_11] : memref<128x256xf32, #tpu.memory_space<vmem>>, vector<128x256xf32>
    %cst_12 = arith.constant dense<0.000000e+00> : vector<256x256xf32>
    %13 = tpu.matmul %11, %12, %cst_12 {dimension_numbers = #tpu.dot_dimension_numbers<[1], [0], [0], [1], [0, 0, 1, 1], [], []>} : vector<256x128xf32>, vector<128x256xf32>, vector<256x256xf32> -> vector<256x256xf32>
    %14 = vector.extract_strided_slice %13 {offsets = [0, 0], sizes = [256, 128], strides = [1, 1]} : vector<256x256xf32> to vector<256x128xf32>
    %15 = vector.extract_strided_slice %13 {offsets = [0, 128], sizes = [256, 128], strides = [1, 1]} : vector<256x256xf32> to vector<256x128xf32>
    %16 = arith.mulf %5, %5 : vector<256x128xf32>
    %17 = arith.mulf %10, %10 : vector<256x128xf32>
    %18 = arith.addf %16, %17 : vector<256x128xf32>
    %19 = arith.mulf %15, %15 : vector<256x128xf32>
    %20 = arith.addf %18, %19 : vector<256x128xf32>
    %21 = math.sqrt %20 : vector<256x128xf32>
    %22 = arith.mulf %4, %5 : vector<256x128xf32>
    %23 = arith.mulf %9, %10 : vector<256x128xf32>
    %24 = arith.addf %22, %23 : vector<256x128xf32>
    %25 = arith.mulf %14, %15 : vector<256x128xf32>
    %26 = arith.addf %24, %25 : vector<256x128xf32>
    %27 = tpu.concatenate %0, %21 in 1 : vector<256x128xf32>, vector<256x128xf32> -> vector<256x256xf32>
    %c0_13 = arith.constant 0 : index
    %c0_14 = arith.constant 0 : index
    %28 = vector.load %arg4[%c0_13, %c0_14] : memref<256x128xf32, #tpu.memory_space<vmem>>, vector<256x128xf32>
    %cst_15 = arith.constant dense<0.000000e+00> : vector<256x128xf32>
    %29 = tpu.matmul %27, %28, %cst_15 {dimension_numbers = #tpu.dot_dimension_numbers<[1], [0], [0], [1], [0, 0, 1, 1], [], []>} : vector<256x256xf32>, vector<256x128xf32>, vector<256x128xf32> -> vector<256x128xf32>
    %c0_16 = arith.constant 0 : index
    %c0_17 = arith.constant 0 : index
    %30 = vector.load %arg5[%c0_16, %c0_17] : memref<1x128xf32, #tpu.memory_space<vmem>>, vector<1x128xf32>
    %31 = vector.broadcast %30 : vector<1x128xf32> to vector<256x128xf32>
    %32 = arith.addf %29, %31 : vector<256x128xf32>
    %33 = arith.negf %32 : vector<256x128xf32>
    %34 = math.exp %33 : vector<256x128xf32>
    %cst_18 = arith.constant 1.000000e+00 : f32
    %35 = vector.broadcast %cst_18 : f32 to vector<256x128xf32>
    %36 = arith.addf %35, %34 : vector<256x128xf32>
    %37 = arith.divf %35, %36 : vector<256x128xf32>
    %38 = arith.mulf %32, %37 : vector<256x128xf32>
    %c0_19 = arith.constant 0 : index
    %c0_20 = arith.constant 0 : index
    %39 = vector.load %arg6[%c0_19, %c0_20] : memref<128x384xf32, #tpu.memory_space<vmem>>, vector<128x384xf32>
    %cst_21 = arith.constant dense<0.000000e+00> : vector<256x384xf32>
    %40 = tpu.matmul %38, %39, %cst_21 {dimension_numbers = #tpu.dot_dimension_numbers<[1], [0], [0], [1], [0, 0, 1, 1], [], []>} : vector<256x128xf32>, vector<128x384xf32>, vector<256x384xf32> -> vector<256x384xf32>
    %c0_22 = arith.constant 0 : index
    %c0_23 = arith.constant 0 : index
    %41 = vector.load %arg7[%c0_22, %c0_23] : memref<1x384xf32, #tpu.memory_space<vmem>>, vector<1x384xf32>
    %42 = vector.broadcast %41 : vector<1x384xf32> to vector<256x384xf32>
    %43 = arith.addf %40, %42 : vector<256x384xf32>
    %44 = vector.extract_strided_slice %43 {offsets = [0, 0], sizes = [256, 128], strides = [1, 1]} : vector<256x384xf32> to vector<256x128xf32>
    %45 = vector.extract_strided_slice %43 {offsets = [0, 128], sizes = [256, 128], strides = [1, 1]} : vector<256x384xf32> to vector<256x128xf32>
    %46 = vector.extract_strided_slice %43 {offsets = [0, 256], sizes = [256, 128], strides = [1, 1]} : vector<256x384xf32> to vector<256x128xf32>
    %47 = arith.addf %0, %44 : vector<256x128xf32>
    %48 = arith.mulf %45, %26 : vector<256x128xf32>
    %49 = arith.addf %47, %48 : vector<256x128xf32>
    %c0_24 = arith.constant 0 : index
    %c0_25 = arith.constant 0 : index
    %50 = vector.load %arg8[%c0_24, %c0_25] : memref<256x128xf32, #tpu.memory_space<vmem>>, vector<256x128xf32>
    tpu.vector_store %arg8[%c0_24, %c0_25], %49 {strides = array<i32>} : memref<256x128xf32, #tpu.memory_space<vmem>>, vector<256x128xf32>,
    %c0_26 = arith.constant 0 : index
    %c0_27 = arith.constant 0 : index
    %51 = vector.load %arg2[%c0_26, %c0_27] : memref<256x384xf32, #tpu.memory_space<vmem>>, vector<256x128xf32>
    %52 = arith.mulf %46, %4 : vector<256x128xf32>
    %53 = arith.addf %51, %52 : vector<256x128xf32>
    %c0_28 = arith.constant 0 : index
    %c0_29 = arith.constant 0 : index
    %54 = vector.load %arg9[%c0_28, %c0_29] : memref<256x384xf32, #tpu.memory_space<vmem>>, vector<256x128xf32>
    tpu.vector_store %arg9[%c0_28, %c0_29], %53 {strides = array<i32>} : memref<256x384xf32, #tpu.memory_space<vmem>>, vector<256x128xf32>,
    %c0_30 = arith.constant 0 : index
    %c128_31 = arith.constant 128 : index
    %55 = vector.load %arg2[%c0_30, %c128_31] : memref<256x384xf32, #tpu.memory_space<vmem>>, vector<256x128xf32>
    %56 = arith.mulf %46, %9 : vector<256x128xf32>
    %57 = arith.addf %55, %56 : vector<256x128xf32>
    %c0_32 = arith.constant 0 : index
    %c128_33 = arith.constant 128 : index
    %58 = vector.load %arg9[%c0_32, %c128_33] : memref<256x384xf32, #tpu.memory_space<vmem>>, vector<256x128xf32>
    tpu.vector_store %arg9[%c0_32, %c128_33], %57 {strides = array<i32>} : memref<256x384xf32, #tpu.memory_space<vmem>>, vector<256x128xf32>,
    %c0_34 = arith.constant 0 : index
    %c256_35 = arith.constant 256 : index
    %59 = vector.load %arg2[%c0_34, %c256_35] : memref<256x384xf32, #tpu.memory_space<vmem>>, vector<256x128xf32>
    %60 = arith.mulf %46, %14 : vector<256x128xf32>
    %61 = arith.addf %59, %60 : vector<256x128xf32>
    %c0_36 = arith.constant 0 : index
    %c256_37 = arith.constant 256 : index
    %62 = vector.load %arg9[%c0_36, %c256_37] : memref<256x384xf32, #tpu.memory_space<vmem>>, vector<256x128xf32>
    tpu.vector_store %arg9[%c0_36, %c256_37], %61 {strides = array<i32>} : memref<256x384xf32, #tpu.memory_space<vmem>>, vector<256x128xf32>,
    return
  }
  func.func @transform_0(%arg0: i32) -> (i32, i32) {
    %c0_i32 = arith.constant 0 : i32
    %c0_i32_0 = arith.constant 0 : i32
    return %arg0, %c0_i32 : i32, i32
  }
  func.func @transform_1(%arg0: i32) -> (i32, i32) {
    %c0_i32 = arith.constant 0 : i32
    %c0_i32_0 = arith.constant 0 : i32
    return %arg0, %c0_i32 : i32, i32
  }
  func.func @transform_2(%arg0: i32) -> (i32, i32) {
    %c0_i32 = arith.constant 0 : i32
    %c0_i32_0 = arith.constant 0 : i32
    %c0_i32_1 = arith.constant 0 : i32
    return %c0_i32, %c0_i32_0 : i32, i32
  }
  func.func @transform_3(%arg0: i32) -> (i32, i32) {
    %c0_i32 = arith.constant 0 : i32
    %c0_i32_0 = arith.constant 0 : i32
    %c0_i32_1 = arith.constant 0 : i32
    return %c0_i32, %c0_i32_0 : i32, i32
  }
  func.func @transform_4(%arg0: i32) -> (i32, i32) {
    %c0_i32 = arith.constant 0 : i32
    %c0_i32_0 = arith.constant 0 : i32
    %c0_i32_1 = arith.constant 0 : i32
    return %c0_i32, %c0_i32_0 : i32, i32
  }
  func.func @transform_5(%arg0: i32) -> (i32, i32) {
    %c0_i32 = arith.constant 0 : i32
    %c0_i32_0 = arith.constant 0 : i32
    %c0_i32_1 = arith.constant 0 : i32
    return %c0_i32, %c0_i32_0 : i32, i32
  }
  func.func @transform_6(%arg0: i32) -> (i32, i32) {
    %c0_i32 = arith.constant 0 : i32
    %c0_i32_0 = arith.constant 0 : i32
    %c0_i32_1 = arith.constant 0 : i32
    return %c0_i32, %c0_i32_0 : i32, i32
  }
  func.func @transform_7(%arg0: i32) -> (i32, i32) {
    %c0_i32 = arith.constant 0 : i32
    %c0_i32_0 = arith.constant 0 : i32
    return %arg0, %c0_i32 : i32, i32
  }
  func.func @transform_8(%arg0: i32) -> (i32, i32) {
    %c0_i32 = arith.constant 0 : i32
    %c0_i32_0 = arith.constant 0 : i32
    return %arg0, %c0_i32 : i32, i32
  }
}

</mosaic_0001>

<bundles_post_ra>
// kernel: _painn_update_impl.1
= control target key start
LH: loop header
LB: loop body
LE: loop exit
PB: predicated region body
PF: predicated region fallthrough
CT: control target
= control target key end

     0   :  { %14 = vsyncpa [#allocation3], 0  ;;  %s6844_s0 = inlined_call_operand.vmem [shape: f32[512,128], index: 0, kind: input, shape index: {}]   ;;  %s6845_s1 = inlined_call_operand.vmem [shape: f32[512,384], index: 1, kind: input, shape index: {}]   ;;  %s6846_s2 = inlined_call_operand.vmem [shape: f32[128,256], index: 2, kind: input, shape index: {}]   ;;  %s6847_s3 = inlined_call_operand.vmem [shape: f32[256,128], index: 3, kind: input, shape index: {}]   ;;  %s6848_s4 = inlined_call_operand.vmem [shape: f32[1,128], index: 4, kind: input, shape index: {}]   ;;  %s6849_s5 = inlined_call_operand.vmem [shape: f32[128,384], index: 5, kind: input, shape index: {}]   ;;  %s6850_s6 = inlined_call_operand.vmem [shape: f32[1,384], index: 6, kind: input, shape index: {}]   ;;  %s6851_s7 = inlined_call_operand.hbm [shape: f32[512,128], index: 7, kind: output, shape index: {0}]   ;;  %s6852_s8 = inlined_call_operand.vmem [shape: f32[512,384], index: 8, kind: output, shape index: {1}]  }
   0x1   :  { %16 = vsyncpa [#allocation3 + $0x1], 0  ;;  %s4278_s27 = smov 0   ;;  %s4280_s28 = smov 0  }
   0x2   :  { %s4282_s29 = smov 0   ;;  %s4284_s30 = smov 0  }
   0x3 LB: > { %s4299_s9 = sadd.s32 4294967295, %s4226_s30   ;;  %s3494_s10 = sadd.s32 4294967294, %s4226_s30   ;;  %s4226_s30 = sphi %s4284_s30, %s7157_s30   ;;  %s4222_s29 = sphi %s4282_s29, %s7156_s29   ;;  %s4218_s28 = sphi %s4280_s28, %s7155_s28   ;;  %s4214_s27 = sphi %s4278_s27, %s7154_s27  }
   0x4   : > { %s4303_s11 = sadd.s32 1, %s4226_s30   ;;  %s186_s12 = sadd.s32 1, %s4222_s29 }
   0x5   : > { %s183_s13 = ssub.s32 %s4226_s30, %s4303_s11  ;;  %p196_p0 = scmp.ne.s32.totalorder %s4222_s29, %s4218_s28 }
   0x6   : > { %p184_p1 = scmp.eq.s32.totalorder %s183_s13, 0  ;;  %p197_p2 = scmp.eq.s32.totalorder %s4299_s9, 1 }
   0x7   : > { %p202_p3 = scmp.ne.s32.totalorder %s4218_s28, %s4214_s27  ;;  %p203_p4 = scmp.eq.s32.totalorder %s3494_s10, 1 }
   0x8   : > { %s4314_s14 = scalar_select %p184_p1, %s4222_s29, %s186_s12  }
   0x9   : > { %p4316_p5 = por %p197_p2, %p196_p0  ;;  %p4320_p6 = por %p203_p4, %p202_p3 }
   0xa   : > { %p3497_p7 = scmp.ge.s32.totalorder %s4226_s30, 1  ;;  %p281_p8 = scmp.lt.s32.totalorder %s4226_s30, 3 }
   0xc   : > { %p282_p9 = pnand %p3497_p7, %p281_p8 }
   0xe   : > { %285 = sbr.rel (%p282_p9) target bundleno = 990 (0x3de), region = 48 }
  0x15   : > { %v413_v0 = vld [vmem:[%s6846_s2 + $0x8] sm:$0xff]  ;;  %v415_v1 = vld [vmem:[%s6846_s2 + $0x18] sm:$0xff]  ;;  %v412_v2 = vld [vmem:[%s6846_s2] sm:$0xff]  ;;  %v6853_v7 = vmov 0.0   ;;  %s3499_s22 = sshll.u32 %s4299_s9, 5  ;;  %s316_s19 = sand.u32 1, %s4218_s28  }
  0x16   : > { %v4335_v3 = vpack.c.bf16 %v415_v1, %v413_v0  ;;  %v414_v4 = vld [vmem:[%s6846_s2 + $0x10] sm:$0xff]  ;;  %v417_v5 = vld [vmem:[%s6846_s2 + $0x28] sm:$0xff]  ;;  %v419_v6 = vld [vmem:[%s6846_s2 + $0x38] sm:$0xff]  ;;  %508 = vmatprep.mubr.f32.mxu0 %v6853_v7  ;;  %652 = vmatprep.mubr.f32.mxu1 %v6853_v7  ;;  %p328_p10 = scmp.lt.s32.totalorder %s3499_s22, 63  ;;  %s3498_s20 = sshll.u32 %s316_s19, 8 }
  0x17   : > { %v4348_v8 = vpack.c.bf16 %v414_v4, %v412_v2  ;;  %v4350_v9 = vpack.c.bf16 %v419_v6, %v417_v5  ;;  %v416_v10 = vld [vmem:[%s6846_s2 + $0x20] sm:$0xff]  ;;  %v418_v11 = vld [vmem:[%s6846_s2 + $0x30] sm:$0xff]  ;;  %v421_v12 = vld [vmem:[%s6846_s2 + $0x48] sm:$0xff]  ;;  %s6321_s23 = scalar_lea.vmem [#allocation2], %s3498_s20  ;;  %s4230_s17 = smov [#allocation2]  }
  0x18   : > { %3673 = vmatprep.subr.bf16.mxu0 %v4335_v3  ;;  %3880 = vmatprep.subr.bf16.mxu1 %v4335_v3  ;;  %v423_v13 = vld [vmem:[%s6846_s2 + $0x58] sm:$0xff]  ;;  %v4368_v14 = vpack.c.bf16 %v418_v11, %v416_v10  ;;  %v420_v16 = vld [vmem:[%s6846_s2 + $0x40] sm:$0xff]  ;;  %v422_v17 = vld [vmem:[%s6846_s2 + $0x50] sm:$0xff]  ;;  %s7159_s22 = smov (!%p328_p10, %s3499_s22), 63  ;;  %s4168_s20 = sshll.u32 %s4230_s17, 4  ;;  %s4169_s20 = int_to_ptr.vmem [resolvable:$false] %s4168_s20 }
  0x19   : > { %3675 = vmatpush1.bf16.msra.mxu0 %v4348_v8  ;;  %3888 = vmatpush1.bf16.msra.mxu1 %v4348_v8  ;;  %v4372_v15 = vpack.c.bf16 %v423_v13, %v421_v12  ;;  %v425_v18 = vld [vmem:[%s6846_s2 + $0x68] sm:$0xff]  ;;  %v427_v19 = vld [vmem:[%s6846_s2 + $0x78] sm:$0xff]  ;;  %v4388_v20 = vpack.c.bf16 %v422_v17, %v420_v16  ;;  %v424_v22 = vld [vmem:[%s6846_s2 + $0x60] sm:$0xff]  ;;  %s3896_s18 = smul.u32 24, %s7159_s22  ;;  %s3500_s25 = sshll.u32 %s7159_s22, 3 }
  0x1a   : > { %3677 = vmatprep.subr.bf16.mxu0 %v4350_v9  ;;  %3881 = vmatprep.subr.bf16.mxu1 %v4350_v9  ;;  %v4392_v21 = vpack.c.bf16 %v427_v19, %v425_v18  ;;  %v426_v23 = vld [vmem:[%s6846_s2 + $0x70] sm:$0xff]  ;;  %v429_v24 = vld [vmem:[%s6846_s2 + $0x88] sm:$0xff]  ;;  %v431_v25 = vld [vmem:[%s6846_s2 + $0x98] sm:$0xff]  ;;  %s5368_s12 = scalar_lea.vmem %s6844_s0, %s3500_s25  ;;  %s3543_s22 = sshll.u32 %s4299_s9, 12 }
  0x1b   : > { %v4408_v26 = vpack.c.bf16 %v426_v23, %v424_v22  ;;  %v4412_v27 = vpack.c.bf16 %v431_v25, %v429_v24  ;;  %v428_v28 = vld [vmem:[%s6846_s2 + $0x80] sm:$0xff]  ;;  %v430_v29 = vld [vmem:[%s6846_s2 + $0x90] sm:$0xff]  ;;  %v433_v30 = vld [vmem:[%s6846_s2 + $0xa8] sm:$0xff]  ;;  %s4495_s21 = scalar_lea.vmem %s6845_s1, %s3896_s18  ;;  %s6329_s26 = scalar_lea.vmem %s6852_s8, %s3896_s18 }
  0x1c   : > { %v435_v31 = vld [vmem:[%s6846_s2 + $0xb8] sm:$0xff]  ;;  %v4429_v32 = vpack.c.bf16 %v430_v29, %v428_v28  ;;  %v432_v34 = vld [vmem:[%s6846_s2 + $0xa0] sm:$0xff]  ;;  %v434_v35 = vld [vmem:[%s6846_s2 + $0xb0] sm:$0xff]  ;;  %v4229_v29 = vmov 0.0|0.0   ;;  %s3390_s18 = sshll.u32 %s6321_s23, 4  ;;  %s6790_s10 = scalar_lea.hbm %s6851_s7, %s3543_s22  ;;  %s6792_s18 = int_to_ptr.vmem [resolvable:$true] %s3390_s18 }
  0x1d   : > { %3679 = vmatpush1.bf16.msra.mxu0 %v4368_v14  ;;  %3889 = vmatpush1.bf16.msra.mxu1 %v4368_v14  ;;  %v4433_v33 = vpack.c.bf16 %v435_v31, %v433_v30  ;;  %v437_v36 = vld [vmem:[%s6846_s2 + $0xc8] sm:$0xff]  ;;  %v439_v37 = vld [vmem:[%s6846_s2 + $0xd8] sm:$0xff]  ;;  %v4449_v38 = vpack.c.bf16 %v434_v35, %v432_v34  ;;  %v436_v40 = vld [vmem:[%s6846_s2 + $0xc0] sm:$0xff]  ;;  %s4164_s13 = scalar_lea.vmem %s6792_s18, 4096  ;;  %s4170_s24 = scalar_lea.vmem %s4169_s20, 8192 }
  0x1e   : > { %3681 = vmatprep.subr.bf16.mxu0 %v4372_v15  ;;  %3882 = vmatprep.subr.bf16.mxu1 %v4372_v15  ;;  %v4453_v39 = vpack.c.bf16 %v439_v37, %v437_v36  ;;  %v438_v41 = vld [vmem:[%s6846_s2 + $0xd0] sm:$0xff]  ;;  %v441_v42 = vld [vmem:[%s6846_s2 + $0xe8] sm:$0xff]  ;;  %v443_v43 = vld [vmem:[%s6846_s2 + $0xf8] sm:$0xff]  ;;  %p4165_p11 = scmp.ne.s32.totalorder %s6792_s18, %s4164_s13  ;;  %p4171_p0 = scmp.lt.s32.totalorder %s6792_s18, %s4169_s20 }
  0x1f   : > { %v4471_v44 = vpack.c.bf16 %v438_v41, %v436_v40  ;;  %v4475_v45 = vpack.c.bf16 %v443_v43, %v441_v42  ;;  %v440_v46 = vld [vmem:[%s6846_s2 + $0xe0] sm:$0xff]  ;;  %v442_v47 = vld [vmem:[%s6846_s2 + $0xf0] sm:$0xff]  ;;  %v381_v51 = vld [vmem:[%s4495_s21 + $0x18] sm:$0xff]  ;;  %p4172_p1 = scmp.lt.s32.totalorder %s4170_s24, %s4164_s13 }
  0x20   : > { %v4486_v48 = vpack.c.bf16 %v442_v47, %v440_v46  ;;  %v380_v49 = vld [vmem:[%s4495_s21] sm:$0xff]  ;;  %v405_v52 = vld [vmem:[%s4495_s21 + $0x258] sm:$0xff]  ;;  %v382_v53 = vld [vmem:[%s4495_s21 + $0x30] sm:$0xff]  ;;  %p4166_p12 = pnand %p4165_p11, %p4316_p5 }
  0x21   : > { %3683 = vmatpush1.bf16.msra.mxu0 %v4388_v20  ;;  %3890 = vmatpush1.bf16.msra.mxu1 %v4388_v20  ;;  %v404_v50 = vld [vmem:[%s4495_s21 + $0x240] sm:$0xff]  ;;  %v406_v54 = vld [vmem:[%s4495_s21 + $0x270] sm:$0xff]  ;;  %v383_v55 = vld [vmem:[%s4495_s21 + $0x48] sm:$0xff]  ;;  %p4173_p2 = por %p4172_p1, %p4171_p0 }
  0x22   : > { %3685 = vmatprep.subr.bf16.mxu0 %v4392_v21  ;;  %3883 = vmatprep.subr.bf16.mxu1 %v4392_v21  ;;  %v407_v56 = vld [vmem:[%s4495_s21 + $0x288] sm:$0xff]  ;;  %v384_v57 = vld [vmem:[%s4495_s21 + $0x60] sm:$0xff]  ;;  %v385_v59 = vld [vmem:[%s4495_s21 + $0x78] sm:$0xff]  ;;  %p4167_p13 = pneg %p4166_p12 }
  0x23   : > { %v408_v58 = vld [vmem:[%s4495_s21 + $0x2a0] sm:$0xff]  ;;  %v409_v60 = vld [vmem:[%s4495_s21 + $0x2b8] sm:$0xff]  ;;  %v386_v61 = vld [vmem:[%s4495_s21 + $0x90] sm:$0xff] }
  0x24   : > { %v410_v62 = vld [vmem:[%s4495_s21 + $0x2d0] sm:$0xff]  ;;  %v387_v63 = vld [vmem:[%s4495_s21 + $0xa8] sm:$0xff]  ;;  %v388_v1 = vld [vmem:[%s4495_s21 + $0xc0] sm:$0xff]  ;;  %p4174_p3 = pnand %p4173_p2, %p4167_p13 }
  0x25   : > { %3687 = vmatpush1.bf16.msra.mxu0 %v4408_v26  ;;  %3891 = vmatpush1.bf16.msra.mxu1 %v4408_v26  ;;  %v411_v0 = vld [vmem:[%s4495_s21 + $0x2e8] sm:$0xff]  ;;  %v702_v4 = vld [vmem:[%s4495_s21 + $0x20] sm:$0xff]  ;;  %v390_v5 = vld [vmem:[%s4495_s21 + $0xf0] sm:$0xff] }
  0x26   : > { %3689 = vmatprep.subr.bf16.mxu0 %v4412_v27  ;;  %3884 = vmatprep.subr.bf16.mxu1 %v4412_v27  ;;  %v701_v2 = vld [vmem:[%s4495_s21 + $0x8] sm:$0xff]  ;;  %v703_v6 = vld [vmem:[%s4495_s21 + $0x38] sm:$0xff]  ;;  %v392_v10 = vld [vmem:[%s4495_s21 + $0x120] sm:$0xff] }
  0x27   : > { %v705_v11 = vld [vmem:[%s4495_s21 + $0x68] sm:$0xff]  ;;  %v393_v12 = vld [vmem:[%s4495_s21 + $0x138] sm:$0xff]  ;;  %v706_v13 = vld [vmem:[%s4495_s21 + $0x80] sm:$0xff] }
  0x28   : > { %v395_v16 = vld [vmem:[%s4495_s21 + $0x168] sm:$0xff]  ;;  %v708_v17 = vld [vmem:[%s4495_s21 + $0xb0] sm:$0xff]  ;;  %v396_v18 = vld [vmem:[%s4495_s21 + $0x180] sm:$0xff] }
  0x29   : > { %3691 = vmatpush1.bf16.msra.mxu0 %v4429_v32  ;;  %3892 = vmatpush1.bf16.msra.mxu1 %v4429_v32  ;;  %v709_v19 = vld [vmem:[%s4495_s21 + $0xc8] sm:$0xff]  ;;  %v398_v22 = vld [vmem:[%s4495_s21 + $0x1b0] sm:$0xff]  ;;  %v711_v23 = vld [vmem:[%s4495_s21 + $0xf8] sm:$0xff] }
  0x2a   : > { %3693 = vmatprep.subr.bf16.mxu0 %v4433_v33  ;;  %3885 = vmatprep.subr.bf16.mxu1 %v4433_v33  ;;  %v1823_v24 = vld [vmem:[%s6847_s3] sm:$0xff]  ;;  %v1824_v25 = vld [vmem:[%s6847_s3 + $0x8] sm:$0xff]  ;;  %v401_v34 = vld [vmem:[%s4495_s21 + $0x1f8] sm:$0xff] }
  0x2b   : > { %v3769_v28 = vpack.c.bf16 %v1824_v25, %v1823_v24  ;;  %v400_v30 = vld [vmem:[%s4495_s21 + $0x1e0] sm:$0xff]  ;;  %v713_v31 = vld [vmem:[%s4495_s21 + $0x128] sm:$0xff]  ;;  %v402_v37 = vld [vmem:[%s4495_s21 + $0x210] sm:$0xff] }
  0x2c   : > { %v714_v35 = vld [vmem:[%s4495_s21 + $0x140] sm:$0xff]  ;;  %v716_v40 = vld [vmem:[%s4495_s21 + $0x170] sm:$0xff]  ;;  %v1828_v42 = vld [vmem:[%s6847_s3 + $0x28] sm:$0xff] }
  0x2d   : > { %3695 = vmatpush1.bf16.msra.mxu0 %v4449_v38  ;;  %3893 = vmatpush1.bf16.msra.mxu1 %v4449_v38  ;;  %v1827_v41 = vld [vmem:[%s6847_s3 + $0x20] sm:$0xff]  ;;  %v991_v47 = vld [vmem:[%s4495_s21 + $0x28] sm:$0xff]  ;;  %v1002_v24 = vld [vmem:[%s4495_s21 + $0x130] sm:$0xff] }
  0x2e   : > { %3697 = vmatprep.subr.bf16.mxu0 %v4453_v39  ;;  %3886 = vmatprep.subr.bf16.mxu1 %v4453_v39  ;;  %v3775_v43 = vpack.c.bf16 %v1828_v42, %v1827_v41  ;;  %v718_v46 = vld [vmem:[%s4495_s21 + $0x1a0] sm:$0xff]  ;;  %v1846_v41 = vld [vmem:[%s6847_s3 + $0xb8] sm:$0xff] }
  0x2f   : > { %v730_v25 = vld [vmem:[%s4495_s21 + $0x2c0] sm:$0xff] }
  0x31   : > { %3699 = vmatpush1.bf16.msra.mxu0 %v4471_v44  ;;  %3894 = vmatpush1.bf16.msra.mxu1 %v4471_v44 }
  0x32   : > { %3701 = vmatprep.subr.bf16.mxu0 %v4475_v45  ;;  %3887 = vmatprep.subr.bf16.mxu1 %v4475_v45 }
  0x35   : > { %3703 = vmatpush1.bf16.msra.mxu0 %v4486_v48  ;;  %3895 = vmatpush1.bf16.msra.mxu1 %v4486_v48 }
  0x36   : > { %3705 = vmatprep.subr.bf16.mxu1 %v4335_v3  ;;  %3737 = vmatprep.subr.bf16.mxu0 %v4335_v3  ;;  %v389_v3 = vld [vmem:[%s4495_s21 + $0xd8] sm:$0xff] }
  0x38   : > { %509 = vmatmul.mubr.f32.vlgmr.msra.gmra.mrb[0].mxu0 %v380_v49  ;;  %653 = vmatmul.mubr.f32.vlgmr.msra.gmra.mrb[0].mxu1 %v404_v50  ;;  %v1830_v49 = vld [vmem:[%s6847_s3 + $0x38] sm:$0xff] }
  0x39   : > { %3707 = vmatpush1.bf16.msra.mxu1 %v4348_v8  ;;  %3739 = vmatpush1.bf16.msra.mxu0 %v4348_v8  ;;  %v391_v8 = vld [vmem:[%s4495_s21 + $0x108] sm:$0xff] }
  0x3a   : > { %514 = vmatprep.mubr.f32.mxu0 %v6853_v7  ;;  %658 = vmatprep.mubr.f32.mxu1 %v6853_v7 }
  0x3b   : > { %3709 = vmatprep.subr.bf16.mxu1 %v4350_v9  ;;  %3741 = vmatprep.subr.bf16.mxu0 %v4350_v9  ;;  %v704_v9 = vld [vmem:[%s4495_s21 + $0x50] sm:$0xff] }
  0x3c   : > { %515 = vmatmul.mubr.f32.gmra.mrb[2].mxu0 %v381_v51  ;;  %659 = vmatmul.mubr.f32.gmra.mrb[2].mxu1 %v405_v52  ;;  %v719_v51 = vld [vmem:[%s4495_s21 + $0x1b8] sm:$0xff]  ;;  %v992_v52 = vld [vmem:[%s4495_s21 + $0x40] sm:$0xff] }
  0x3d   : > { %3711 = vmatpush1.bf16.msra.mxu1 %v4368_v14  ;;  %520 = vmatprep.mubr.f32.mxu0 %v6853_v7 }
  0x3e   : > { %664 = vmatprep.mubr.f32.mxu1 %v6853_v7  ;;  %3713 = vmatprep.subr.bf16.mxu1 %v4372_v15 }
  0x3f   : > { %3743 = vmatpush1.bf16.msra.mxu0 %v4368_v14  ;;  %v394_v14 = vld [vmem:[%s4495_s21 + $0x150] sm:$0xff] }
  0x40   : > { %521 = vmatmul.mubr.f32.gmra.mrb[4].mxu0 %v382_v53  ;;  %665 = vmatmul.mubr.f32.gmra.mrb[4].mxu1 %v406_v54  ;;  %v720_v53 = vld [vmem:[%s4495_s21 + $0x1d0] sm:$0xff]  ;;  %v993_v54 = vld [vmem:[%s4495_s21 + $0x58] sm:$0xff] }
  0x41   : > { %3715 = vmatpush1.bf16.msra.mxu1 %v4388_v20  ;;  %526 = vmatprep.mubr.f32.mxu0 %v6853_v7 }
  0x42   : > { %670 = vmatprep.mubr.f32.mxu1 %v6853_v7  ;;  %3717 = vmatprep.subr.bf16.mxu1 %v4392_v21 }
  0x43   : > { %3745 = vmatprep.subr.bf16.mxu0 %v4372_v15  ;;  %v707_v15 = vld [vmem:[%s4495_s21 + $0x98] sm:$0xff] }
  0x44   : > { %527 = vmatmul.mubr.f32.gmra.mrb[6].mxu0 %v383_v55  ;;  %671 = vmatmul.mubr.f32.gmra.mrb[6].mxu1 %v407_v56  ;;  %v1831_v55 = vld [vmem:[%s6847_s3 + $0x40] sm:$0xff]  ;;  %v1832_v56 = vld [vmem:[%s6847_s3 + $0x48] sm:$0xff] }
  0x45   : > { %3719 = vmatpush1.bf16.msra.mxu1 %v4408_v26  ;;  %532 = vmatprep.mubr.f32.mxu0 %v6853_v7 }
  0x46   : > { %676 = vmatprep.mubr.f32.mxu1 %v6853_v7  ;;  %3721 = vmatprep.subr.bf16.mxu1 %v4412_v27 }
  0x47   : > { %3747 = vmatpush1.bf16.msra.mxu0 %v4388_v20  ;;  %v397_v20 = vld [vmem:[%s4495_s21 + $0x198] sm:$0xff] }
  0x48   : > { %533 = vmatmul.mubr.f32.gmra.mrb[8].mxu0 %v384_v57  ;;  %677 = vmatmul.mubr.f32.gmra.mrb[8].mxu1 %v408_v58  ;;  %v3781_v57 = vpack.c.bf16 %v1832_v56, %v1831_v55  ;;  %v721_v58 = vld [vmem:[%s4495_s21 + $0x1e8] sm:$0xff]  ;;  %v1851_v55 = vld [vmem:[%s6847_s3 + $0xe0] sm:$0xff] }
  0x49   : > { %3723 = vmatpush1.bf16.msra.mxu1 %v4429_v32  ;;  %538 = vmatprep.mubr.f32.mxu0 %v6853_v7  ;;  %v1852_v56 = vld [vmem:[%s6847_s3 + $0xe8] sm:$0xff] }
  0x4a   : > { %682 = vmatprep.mubr.f32.mxu1 %v6853_v7  ;;  %3725 = vmatprep.subr.bf16.mxu1 %v4433_v33 }
  0x4b   : > { %3749 = vmatprep.subr.bf16.mxu0 %v4392_v21  ;;  %v710_v21 = vld [vmem:[%s4495_s21 + $0xe0] sm:$0xff] }
  0x4c   : > { %539 = vmatmul.mubr.f32.gmra.mrb[10].mxu0 %v385_v59  ;;  %683 = vmatmul.mubr.f32.gmra.mrb[10].mxu1 %v409_v60  ;;  %v994_v59 = vld [vmem:[%s4495_s21 + $0x70] sm:$0xff]  ;;  %v722_v60 = vld [vmem:[%s4495_s21 + $0x200] sm:$0xff] }
  0x4d   : > { %3727 = vmatpush1.bf16.msra.mxu1 %v4449_v38  ;;  %544 = vmatprep.mubr.f32.mxu0 %v6853_v7 }
  0x4e   : > { %688 = vmatprep.mubr.f32.mxu1 %v6853_v7  ;;  %3729 = vmatprep.subr.bf16.mxu1 %v4453_v39 }
  0x4f   : > { %3751 = vmatpush1.bf16.msra.mxu0 %v4408_v26  ;;  %v399_v26 = vld [vmem:[%s4495_s21 + $0x1c8] sm:$0xff] }
  0x50   : > { %545 = vmatmul.mubr.f32.gmra.mrb[12].mxu0 %v386_v61  ;;  %689 = vmatmul.mubr.f32.gmra.mrb[12].mxu1 %v410_v62  ;;  %v995_v61 = vld [vmem:[%s4495_s21 + $0x88] sm:$0xff]  ;;  %v1833_v62 = vld [vmem:[%s6847_s3 + $0x50] sm:$0xff] }
  0x51   : > { %3731 = vmatpush1.bf16.msra.mxu1 %v4471_v44  ;;  %550 = vmatprep.mubr.f32.mxu0 %v6853_v7 }
  0x52   : > { %694 = vmatprep.mubr.f32.mxu1 %v6853_v7  ;;  %3733 = vmatprep.subr.bf16.mxu1 %v4475_v45 }
  0x53   : > { %3753 = vmatprep.subr.bf16.mxu0 %v4412_v27  ;;  %v712_v27 = vld [vmem:[%s4495_s21 + $0x110] sm:$0xff] }
  0x54   : > { %551 = vmatmul.mubr.f32.gmra.mrb[14].mxu0 %v387_v63  ;;  %695 = vmatmul.mubr.f32.gmra.mrb[14].mxu1 %v411_v0  ;;  %v1834_v63 = vld [vmem:[%s6847_s3 + $0x58] sm:$0xff] }
  0x55   : > { %3735 = vmatpush1.bf16.msra.mxu1 %v4486_v48  ;;  %556 = vmatprep.mubr.f32.mxu0 %v6853_v7  ;;  %v3784_v0 = vpack.c.bf16 %v1834_v63, %v1833_v62  ;;  %v1016_v63 = vld [vmem:[%s4495_s21 + $0x280] sm:$0xff] }
  0x56   : > { %797 = vmatprep.mubr.f32.mxu1 %v6853_v7  ;;  %3755 = vmatpush1.bf16.msra.mxu0 %v4429_v32  ;;  %v1825_v32 = vld [vmem:[%s6847_s3 + $0x10] sm:$0xff] }
  0x57   : > { %3757 = vmatprep.subr.bf16.mxu0 %v4433_v33  ;;  %3768 = vmatprep.subr.bf16.mxu1 %v4229_v29  ;;  %v1826_v33 = vld [vmem:[%s6847_s3 + $0x18] sm:$0xff] }
  0x58   : > { %557 = vmatmul.mubr.f32.gmra.mrb[16].mxu0 %v388_v1  ;;  %798 = vmatmul.mubr.f32.vlgmr.msra.gmra.mrb[16].mxu1 %v701_v2  ;;  %v3772_v36 = vpack.c.bf16 %v1826_v33, %v1825_v32  ;;  %v723_v1 = vld [vmem:[%s4495_s21 + $0x218] sm:$0xff]  ;;  %v996_v2 = vld [vmem:[%s4495_s21 + $0xa0] sm:$0xff]  ;;  %v732_v33 = vld [vmem:[%s4495_s21 + $0x2f0] sm:$0xff] }
  0x59   : > { %562 = vmatprep.mubr.f32.mxu0 %v6853_v7  ;;  %803 = vmatprep.mubr.f32.mxu1 %v6853_v7  ;;  %v1004_v32 = vld [vmem:[%s4495_s21 + $0x160] sm:$0xff] }
  0x5a   : > { %3759 = vmatpush1.bf16.msra.mxu0 %v4449_v38  ;;  %3770 = vmatpush1.bf16.msra.mxu1 %v3769_v28  ;;  %v715_v38 = vld [vmem:[%s4495_s21 + $0x158] sm:$0xff] }
  0x5b   : > { %3761 = vmatprep.subr.bf16.mxu0 %v4453_v39  ;;  %3771 = vmatprep.subr.bf16.mxu1 %v4229_v29  ;;  %v403_v39 = vld [vmem:[%s4495_s21 + $0x228] sm:$0xff]  ;;  %v1842_v28 = vld [vmem:[%s6847_s3 + $0x98] sm:$0xff] }
  0x5c   : > { %563 = vmatmul.mubr.f32.gmra.mrb[18].mxu0 %v389_v3  ;;  %804 = vmatmul.mubr.f32.gmra.mrb[18].mxu1 %v702_v4  ;;  %v724_v3 = vld [vmem:[%s4495_s21 + $0x230] sm:$0xff]  ;;  %v997_v4 = vld [vmem:[%s4495_s21 + $0xb8] sm:$0xff] }
  0x5d   : > { %568 = vmatprep.mubr.f32.mxu0 %v6853_v7  ;;  %809 = vmatprep.mubr.f32.mxu1 %v6853_v7 }
  0x5e   : > { %3763 = vmatpush1.bf16.msra.mxu0 %v4471_v44  ;;  %3773 = vmatpush1.bf16.msra.mxu1 %v3772_v36  ;;  %v717_v44 = vld [vmem:[%s4495_s21 + $0x188] sm:$0xff] }
  0x5f   : > { %3765 = vmatprep.subr.bf16.mxu0 %v4475_v45  ;;  %3774 = vmatprep.subr.bf16.mxu1 %v4229_v29  ;;  %v990_v45 = vld [vmem:[%s4495_s21 + $0x10] sm:$0xff]  ;;  %v1844_v36 = vld [vmem:[%s6847_s3 + $0xa8] sm:$0xff] }
  0x60   : > { %569 = vmatmul.mubr.f32.gmra.mrb[20].mxu0 %v390_v5  ;;  %810 = vmatmul.mubr.f32.gmra.mrb[20].mxu1 %v703_v6  ;;  %v1835_v5 = vld [vmem:[%s6847_s3 + $0x60] sm:$0xff]  ;;  %v1836_v6 = vld [vmem:[%s6847_s3 + $0x68] sm:$0xff] }
  0x61   : > { %574 = vmatprep.mubr.f32.mxu0 %v6853_v7  ;;  %815 = vmatprep.mubr.f32.mxu1 %v6853_v7 }
  0x62   : > { %3767 = vmatpush1.bf16.msra.mxu0 %v4486_v48  ;;  %3776 = vmatpush1.bf16.msra.mxu1 %v3775_v43  ;;  %v1829_v48 = vld [vmem:[%s6847_s3 + $0x30] sm:$0xff]  ;;  %v1008_v43 = vld [vmem:[%s4495_s21 + $0x1c0] sm:$0xff] }
  0x63   : > { %3777 = vmatprep.subr.bf16.mxu1 %v4229_v29  ;;  %v3778_v50 = vpack.c.bf16 %v1830_v49, %v1829_v48  ;;  %v1010_v48 = vld [vmem:[%s4495_s21 + $0x1f0] sm:$0xff]  ;;  %v1011_v49 = vld [vmem:[%s4495_s21 + $0x208] sm:$0xff] }
  0x64   : > { %575 = vmatmul.mubr.f32.gmra.mrb[22].mxu0 %v391_v8  ;;  %816 = vmatmul.mubr.f32.gmra.mrb[22].mxu1 %v704_v9  ;;  %v3787_v8 = vpack.c.bf16 %v1836_v6, %v1835_v5  ;;  %v725_v9 = vld [vmem:[%s4495_s21 + $0x248] sm:$0xff] }
  0x65   : > { %580 = vmatprep.mubr.f32.mxu0 %v6853_v7  ;;  %821 = vmatprep.mubr.f32.mxu1 %v6853_v7 }
  0x66   : > { %3779 = vmatpush1.bf16.msra.mxu1 %v3778_v50  ;;  %v1849_v50 = vld [vmem:[%s6847_s3 + $0xd0] sm:$0xff] }
  0x67   : > { %3780 = vmatprep.subr.bf16.mxu1 %v4229_v29 }
  0x68   : > { %581 = vmatmul.mubr.f32.gmra.mrb[24].mxu0 %v392_v10  ;;  %822 = vmatmul.mubr.f32.gmra.mrb[24].mxu1 %v705_v11  ;;  %v998_v10 = vld [vmem:[%s4495_s21 + $0xd0] sm:$0xff]  ;;  %v726_v11 = vld [vmem:[%s4495_s21 + $0x260] sm:$0xff] }
  0x69   : > { %586 = vmatprep.mubr.f32.mxu0 %v6853_v7  ;;  %827 = vmatprep.mubr.f32.mxu1 %v6853_v7 }
  0x6a   : > { %3782 = vmatpush1.bf16.msra.mxu1 %v3781_v57  ;;  %v3811_v57 = vpack.c.bf16 %v1852_v56, %v1851_v55 }
  0x6b   : > { %3783 = vmatprep.subr.bf16.mxu1 %v4229_v29 }
  0x6c   : > { %587 = vmatmul.mubr.f32.gmra.mrb[26].mxu0 %v393_v12  ;;  %828 = vmatmul.mubr.f32.gmra.mrb[26].mxu1 %v706_v13  ;;  %v999_v12 = vld [vmem:[%s4495_s21 + $0xe8] sm:$0xff]  ;;  %v1837_v13 = vld [vmem:[%s6847_s3 + $0x70] sm:$0xff] }
  0x6d   : > { %592 = vmatprep.mubr.f32.mxu0 %v6853_v7  ;;  %833 = vmatprep.mubr.f32.mxu1 %v6853_v7 }
  0x6e   : > { %3785 = vmatpush1.bf16.msra.mxu1 %v3784_v0  ;;  %v1018_v0 = vld [vmem:[%s4495_s21 + $0x2b0] sm:$0xff] }
  0x6f   : > { %3786 = vmatprep.subr.bf16.mxu1 %v4229_v29 }
  0x70   : > { %593 = vmatmul.mubr.f32.gmra.mrb[28].mxu0 %v394_v14  ;;  %834 = vmatmul.mubr.f32.gmra.mrb[28].mxu1 %v707_v15  ;;  %v1838_v14 = vld [vmem:[%s6847_s3 + $0x78] sm:$0xff] }
  0x71   : > { %598 = vmatprep.mubr.f32.mxu0 %v6853_v7  ;;  %839 = vmatprep.mubr.f32.mxu1 %v6853_v7  ;;  %v3790_v15 = vpack.c.bf16 %v1838_v14, %v1837_v13 }
  0x72   : > { %3788 = vmatpush1.bf16.msra.mxu1 %v3787_v8  ;;  %v1020_v8 = vld [vmem:[%s4495_s21 + $0x2e0] sm:$0xff] }
  0x73   : > { %3789 = vmatprep.subr.bf16.mxu1 %v4229_v29 }
  0x74   : > { %599 = vmatmul.mubr.f32.gmra.mrb[30].mxu0 %v395_v16  ;;  %840 = vmatmul.mubr.f32.gmra.mrb[30].mxu1 %v708_v17  ;;  %v727_v16 = vld [vmem:[%s4495_s21 + $0x278] sm:$0xff]  ;;  %v1000_v17 = vld [vmem:[%s4495_s21 + $0x100] sm:$0xff] }
  0x75   : > { %604 = vmatprep.mubr.f32.mxu0 %v6853_v7  ;;  %845 = vmatprep.mubr.f32.mxu1 %v6853_v7 }
  0x76   : > { %3791 = vmatpush1.bf16.msra.mxu1 %v3790_v15  ;;  %v1021_v15 = vld [vmem:[%s4495_s21 + $0x2f8] sm:$0xff] }
  0x77   : > { %3792 = vmatprep.subr.bf16.mxu1 %v4229_v29 }
  0x78   : > { %605 = vmatmul.mubr.f32.gmra.mrb[32].mxu0 %v396_v18  ;;  %846 = vmatmul.mubr.f32.gmra.mrb[32].mxu1 %v709_v19  ;;  %v728_v18 = vld [vmem:[%s4495_s21 + $0x290] sm:$0xff]  ;;  %v1001_v19 = vld [vmem:[%s4495_s21 + $0x118] sm:$0xff] }
  0x79   : > { %610 = vmatprep.mubr.f32.mxu0 %v6853_v7  ;;  %851 = vmatprep.mubr.f32.mxu1 %v6853_v7 }
  0x7c   : > { %611 = vmatmul.mubr.f32.gmra.mrb[34].mxu0 %v397_v20  ;;  %852 = vmatmul.mubr.f32.gmra.mrb[34].mxu1 %v710_v21  ;;  %v1839_v20 = vld [vmem:[%s6847_s3 + $0x80] sm:$0xff]  ;;  %v1840_v21 = vld [vmem:[%s6847_s3 + $0x88] sm:$0xff] }
  0x7d   : > { %616 = vmatprep.mubr.f32.mxu0 %v6853_v7  ;;  %857 = vmatprep.mubr.f32.mxu1 %v6853_v7 }
  0x80   : > { %617 = vmatmul.mubr.f32.gmra.mrb[36].mxu0 %v398_v22  ;;  %858 = vmatmul.mubr.f32.gmra.mrb[36].mxu1 %v711_v23  ;;  %v3793_v22 = vpack.c.bf16 %v1840_v21, %v1839_v20  ;;  %v729_v23 = vld [vmem:[%s4495_s21 + $0x2a8] sm:$0xff] }
  0x81   : > { %622 = vmatprep.mubr.f32.mxu0 %v6853_v7  ;;  %863 = vmatprep.mubr.f32.mxu1 %v6853_v7 }
  0x82   : > { %3794 = vmatpush1.bf16.msra.mxu1 %v3793_v22 }
  0x83   : > { %3795 = vmatprep.subr.bf16.mxu1 %v4229_v29 }
  0x84   : > { %623 = vmatmul.mubr.f32.gmra.mrb[38].mxu0 %v399_v26  ;;  %864 = vmatmul.mubr.f32.gmra.mrb[38].mxu1 %v712_v27  ;;  %v1003_v26 = vld [vmem:[%s4495_s21 + $0x148] sm:$0xff]  ;;  %v1841_v27 = vld [vmem:[%s6847_s3 + $0x90] sm:$0xff] }
  0x85   : > { %628 = vmatprep.mubr.f32.mxu0 %v6853_v7  ;;  %869 = vmatprep.mubr.f32.mxu1 %v6853_v7 }
  0x88   : > { %629 = vmatmul.mubr.f32.gmra.mrb[40].mxu0 %v400_v30  ;;  %870 = vmatmul.mubr.f32.gmra.mrb[40].mxu1 %v713_v31  ;;  %v3796_v30 = vpack.c.bf16 %v1842_v28, %v1841_v27  ;;  %v731_v31 = vld [vmem:[%s4495_s21 + $0x2d8] sm:$0xff] }
  0x89   : > { %634 = vmatprep.mubr.f32.mxu0 %v6853_v7  ;;  %875 = vmatprep.mubr.f32.mxu1 %v6853_v7 }
  0x8a   : > { %3797 = vmatpush1.bf16.msra.mxu1 %v3796_v30 }
  0x8b   : > { %3798 = vmatprep.subr.bf16.mxu1 %v4229_v29 }
  0x8c   : > { %635 = vmatmul.mubr.f32.gmra.mrb[42].mxu0 %v401_v34  ;;  %876 = vmatmul.mubr.f32.gmra.mrb[42].mxu1 %v714_v35  ;;  %v1005_v34 = vld [vmem:[%s4495_s21 + $0x178] sm:$0xff]  ;;  %v1843_v35 = vld [vmem:[%s6847_s3 + $0xa0] sm:$0xff] }
  0x8d   : > { %640 = vmatprep.mubr.f32.mxu0 %v6853_v7  ;;  %881 = vmatprep.mubr.f32.mxu1 %v6853_v7 }
  0x90   : > { %641 = vmatmul.mubr.f32.gmra.mrb[44].mxu0 %v402_v37  ;;  %882 = vmatmul.mubr.f32.gmra.mrb[44].mxu1 %v715_v38  ;;  %v3799_v37 = vpack.c.bf16 %v1844_v36, %v1843_v35  ;;  %v1006_v38 = vld [vmem:[%s4495_s21 + $0x190] sm:$0xff] }
  0x91   : > { %646 = vmatprep.mubr.f32.mxu0 %v6853_v7  ;;  %887 = vmatprep.mubr.f32.mxu1 %v6853_v7 }
  0x92   : > { %3800 = vmatpush1.bf16.msra.mxu1 %v3799_v37 }
  0x93   : > { %3801 = vmatprep.subr.bf16.mxu1 %v4229_v29 }
  0x94   : > { %647 = vmatmul.mubr.f32.gmra.mrb[46].mxu0 %v403_v39  ;;  %888 = vmatmul.mubr.f32.gmra.mrb[46].mxu1 %v716_v40  ;;  %v1007_v39 = vld [vmem:[%s4495_s21 + $0x1a8] sm:$0xff]  ;;  %v1845_v40 = vld [vmem:[%s6847_s3 + $0xb0] sm:$0xff] }
  0x95   : > { %893 = vmatprep.mubr.f32.mxu1 %v6853_v7  ;;  %1086 = vmatprep.mubr.f32.mxu0 %v6853_v7  ;;  %v3802_v42 = vpack.c.bf16 %v1846_v41, %v1845_v40 }
  0x97   : > { %3803 = vmatpush1.bf16.msra.mxu1 %v3802_v42 }
  0x98   : > { %894 = vmatmul.mubr.f32.gmra.mrb[48].mxu1 %v717_v44  ;;  %1087 = vmatmul.mubr.f32.vlgmr.msra.gmra.mrb[48].mxu0 %v990_v45  ;;  %v1009_v44 = vld [vmem:[%s4495_s21 + $0x1d8] sm:$0xff]  ;;  %v1847_v45 = vld [vmem:[%s6847_s3 + $0xc0] sm:$0xff] }
  0x99   : > { %899 = vmatprep.mubr.f32.mxu1 %v6853_v7  ;;  %1092 = vmatprep.mubr.f32.mxu0 %v6853_v7 }
  0x9a   : > { %3804 = vmatprep.subr.bf16.mxu1 %v4229_v29 }
  0x9c   : > { %900 = vmatmul.mubr.f32.gmra.mrb[50].mxu1 %v718_v46  ;;  %1093 = vmatmul.mubr.f32.gmra.mrb[50].mxu0 %v991_v47  ;;  %v1848_v46 = vld [vmem:[%s6847_s3 + $0xc8] sm:$0xff] }
  0x9d   : > { %905 = vmatprep.mubr.f32.mxu1 %v6853_v7  ;;  %1098 = vmatprep.mubr.f32.mxu0 %v6853_v7  ;;  %v3805_v47 = vpack.c.bf16 %v1848_v46, %v1847_v45 }
  0x9f   : > { %3806 = vmatpush1.bf16.msra.mxu1 %v3805_v47 }
  0xa0   : > { %906 = vmatmul.mubr.f32.gmra.mrb[52].mxu1 %v719_v51  ;;  %1099 = vmatmul.mubr.f32.gmra.mrb[52].mxu0 %v992_v52  ;;  %v1850_v51 = vld [vmem:[%s6847_s3 + $0xd8] sm:$0xff] }
  0xa1   : > { %911 = vmatprep.mubr.f32.mxu1 %v6853_v7  ;;  %1104 = vmatprep.mubr.f32.mxu0 %v6853_v7  ;;  %v3808_v52 = vpack.c.bf16 %v1850_v51, %v1849_v50 }
  0xa2   : > { %3807 = vmatprep.subr.bf16.mxu1 %v4229_v29 }
  0xa3   : > { %3809 = vmatpush1.bf16.msra.mxu1 %v3808_v52 }
  0xa4   : > { %912 = vmatmul.mubr.f32.gmra.mrb[54].mxu1 %v720_v53  ;;  %1105 = vmatmul.mubr.f32.gmra.mrb[54].mxu0 %v993_v54  ;;  %v1012_v53 = vld [vmem:[%s4495_s21 + $0x220] sm:$0xff]  ;;  %v1013_v54 = vld [vmem:[%s4495_s21 + $0x238] sm:$0xff] }
  0xa5   : > { %917 = vmatprep.mubr.f32.mxu1 %v6853_v7  ;;  %1110 = vmatprep.mubr.f32.mxu0 %v6853_v7 }
  0xa6   : > { %3810 = vmatprep.subr.bf16.mxu1 %v4229_v29 }
  0xa7   : > { %3812 = vmatpush1.bf16.msra.mxu1 %v3811_v57 }
  0xa8   : > { %918 = vmatmul.mubr.f32.gmra.mrb[56].mxu1 %v721_v58  ;;  %1111 = vmatmul.mubr.f32.gmra.mrb[56].mxu0 %v994_v59  ;;  %v1014_v58 = vld [vmem:[%s4495_s21 + $0x250] sm:$0xff]  ;;  %v1015_v59 = vld [vmem:[%s4495_s21 + $0x268] sm:$0xff] }
  0xa9   : > { %923 = vmatprep.mubr.f32.mxu1 %v6853_v7  ;;  %1116 = vmatprep.mubr.f32.mxu0 %v6853_v7 }
  0xaa   : > { %3813 = vmatprep.subr.bf16.mxu1 %v4229_v29  ;;  %v1017_v29 = vld [vmem:[%s4495_s21 + $0x298] sm:$0xff] }
  0xac   : > { %924 = vmatmul.mubr.f32.gmra.mrb[58].mxu1 %v722_v60  ;;  %1117 = vmatmul.mubr.f32.gmra.mrb[58].mxu0 %v995_v61  ;;  %v1853_v60 = vld [vmem:[%s6847_s3 + $0xf0] sm:$0xff]  ;;  %v1854_v61 = vld [vmem:[%s6847_s3 + $0xf8] sm:$0xff] }
  0xad   : > { %929 = vmatprep.mubr.f32.mxu1 %v6853_v7  ;;  %1122 = vmatprep.mubr.f32.mxu0 %v6853_v7  ;;  %v3814_v62 = vpack.c.bf16 %v1854_v61, %v1853_v60 }
  0xaf   : > { %3815 = vmatpush1.bf16.msra.mxu1 %v3814_v62 }
  0xb0   : > { %930 = vmatmul.mubr.f32.gmra.mrb[60].mxu1 %v723_v1  ;;  %1123 = vmatmul.mubr.f32.gmra.mrb[60].mxu0 %v996_v2  ;;  %v1019_v1 = vld [vmem:[%s4495_s21 + $0x2c8] sm:$0xff] }
  0xb1   : > { %935 = vmatprep.mubr.f32.mxu1 %v6853_v7  ;;  %1128 = vmatprep.mubr.f32.mxu0 %v6853_v7 }
  0xb4   : > { %936 = vmatmul.mubr.f32.gmra.mrb[62].mxu1 %v724_v3  ;;  %1129 = vmatmul.mubr.f32.gmra.mrb[62].mxu0 %v997_v4 }
  0xb5   : > { %941 = vmatprep.mubr.f32.mxu1 %v6853_v7  ;;  %1134 = vmatprep.mubr.f32.mxu0 %v6853_v7 }
  0xb8   : > { %942 = vmatmul.mubr.f32.gmra.mrb[64].mxu1 %v725_v9  ;;  %1135 = vmatmul.mubr.f32.gmra.mrb[64].mxu0 %v998_v10 }
  0xb9   : > { %947 = vmatprep.mubr.f32.mxu1 %v6853_v7  ;;  %1140 = vmatprep.mubr.f32.mxu0 %v6853_v7 }
  0xbc   : > { %948 = vmatmul.mubr.f32.gmra.mrb[66].mxu1 %v726_v11  ;;  %1141 = vmatmul.mubr.f32.gmra.mrb[66].mxu0 %v999_v12 }
  0xbd   : > { %953 = vmatprep.mubr.f32.mxu1 %v6853_v7  ;;  %1146 = vmatprep.mubr.f32.mxu0 %v6853_v7 }
  0xc0   : > { %954 = vmatmul.mubr.f32.gmra.mrb[68].mxu1 %v727_v16  ;;  %1147 = vmatmul.mubr.f32.gmra.mrb[68].mxu0 %v1000_v17 }
  0xc1   : > { %959 = vmatprep.mubr.f32.mxu1 %v6853_v7  ;;  %1152 = vmatprep.mubr.f32.mxu0 %v6853_v7 }
  0xc4   : > { %960 = vmatmul.mubr.f32.gmra.mrb[70].mxu1 %v728_v18  ;;  %1153 = vmatmul.mubr.f32.gmra.mrb[70].mxu0 %v1001_v19 }
  0xc5   : > { %965 = vmatprep.mubr.f32.mxu1 %v6853_v7  ;;  %1158 = vmatprep.mubr.f32.mxu0 %v6853_v7 }
  0xc8   : > { %966 = vmatmul.mubr.f32.gmra.mrb[72].mxu1 %v729_v23  ;;  %1159 = vmatmul.mubr.f32.gmra.mrb[72].mxu0 %v1002_v24 }
  0xc9   : > { %971 = vmatprep.mubr.f32.mxu1 %v6853_v7  ;;  %1164 = vmatprep.mubr.f32.mxu0 %v6853_v7 }
  0xcc   : > { %972 = vmatmul.mubr.f32.gmra.mrb[74].mxu1 %v730_v25  ;;  %1165 = vmatmul.mubr.f32.gmra.mrb[74].mxu0 %v1003_v26 }
  0xcd   : > { %977 = vmatprep.mubr.f32.mxu1 %v6853_v7  ;;  %1170 = vmatprep.mubr.f32.mxu0 %v6853_v7 }
  0xd0   : > { %978 = vmatmul.mubr.f32.gmra.mrb[76].mxu1 %v731_v31  ;;  %1171 = vmatmul.mubr.f32.gmra.mrb[76].mxu0 %v1004_v32 }
  0xd1   : > { %983 = vmatprep.mubr.f32.mxu1 %v6853_v7  ;;  %1176 = vmatprep.mubr.f32.mxu0 %v6853_v7 }
  0xd4   : > { %984 = vmatmul.mubr.f32.gmra.mrb[78].mxu1 %v732_v33  ;;  %1177 = vmatmul.mubr.f32.gmra.mrb[78].mxu0 %v1005_v34 }
  0xd5   : > { %1182 = vmatprep.mubr.f32.mxu0 %v6853_v7 }
  0xd8   : > { %1183 = vmatmul.mubr.f32.gmra.mrb[80].mxu0 %v1006_v38 }
  0xd9   : > { %1188 = vmatprep.mubr.f32.mxu0 %v6853_v7 }
  0xdc   : > { %1189 = vmatmul.mubr.f32.gmra.mrb[82].mxu0 %v1007_v39 }
  0xdd   : > { %1194 = vmatprep.mubr.f32.mxu0 %v6853_v7 }
  0xe0   : > { %1195 = vmatmul.mubr.f32.gmra.mrb[84].mxu0 %v1008_v43 }
  0xe1   : > { %1200 = vmatprep.mubr.f32.mxu0 %v6853_v7 }
  0xe4   : > { %1201 = vmatmul.mubr.f32.gmra.mrb[86].mxu0 %v1009_v44 }
  0xe5   : > { %1206 = vmatprep.mubr.f32.mxu0 %v6853_v7 }
  0xe8   : > { %1207 = vmatmul.mubr.f32.gmra.mrb[88].mxu0 %v1010_v48 }
  0xe9   : > { %1212 = vmatprep.mubr.f32.mxu0 %v6853_v7 }
  0xec   : > { %1213 = vmatmul.mubr.f32.gmra.mrb[90].mxu0 %v1011_v49 }
  0xed   : > { %1218 = vmatprep.mubr.f32.mxu0 %v6853_v7 }
  0xf0   : > { %1219 = vmatmul.mubr.f32.gmra.mrb[92].mxu0 %v1012_v53 }
  0xf1   : > { %1224 = vmatprep.mubr.f32.mxu0 %v6853_v7 }
  0xf4   : > { %1225 = vmatmul.mubr.f32.gmra.mrb[94].mxu0 %v1013_v54 }
  0xf5   : > { %1230 = vmatprep.mubr.f32.mxu0 %v6853_v7 }
  0xf8   : > { %1231 = vmatmul.mubr.f32.gmra.mrb[96].mxu0 %v1014_v58 }
  0xf9   : > { %1236 = vmatprep.mubr.f32.mxu0 %v6853_v7 }
  0xfc   : > { %1237 = vmatmul.mubr.f32.gmra.mrb[98].mxu0 %v1015_v59 }
  0xfd   : > { %1242 = vmatprep.mubr.f32.mxu0 %v6853_v7 }
 0x100   : > { %1243 = vmatmul.mubr.f32.gmra.mrb[100].mxu0 %v1016_v63 }
 0x101   : > { %1248 = vmatprep.mubr.f32.mxu0 %v6853_v7 }
 0x104   : > { %1249 = vmatmul.mubr.f32.gmra.mrb[102].mxu0 %v1017_v29 }
 0x105   : > { %1254 = vmatprep.mubr.f32.mxu0 %v6853_v7 }
 0x108   : > { %1255 = vmatmul.mubr.f32.gmra.mrb[104].mxu0 %v1018_v0 }
 0x109   : > { %1260 = vmatprep.mubr.f32.mxu0 %v6853_v7 }
 0x10b   : > { %v4829_v2 = vpop.f32.mrb[0].mxu0  ;;  %v4831_v3 = vpop.f32.mrb[0].mxu1 }
 0x10c   : > { %6937 = vst [vmem:[#allocation5_spill] sm:$0xff] %v4829_v2  ;;  %6938 = vst [vmem:[#allocation6_spill] sm:$0xff] %v4831_v3  ;;  %v512_v4 = vpop.f32.mrb[1].mxu0  ;;  %1261 = vmatmul.mubr.f32.gmra.mrb[106].mxu0 %v1019_v1  ;;  %v4833_v5 = vpop.f32.mrb[1].mxu1 }
 0x10d   : > { %v1663_v6 = vmul.f32 %v512_v4, %v4829_v2  ;;  %1266 = vmatprep.mubr.f32.mxu0 %v6853_v7  ;;  %v4840_v9 = vmul.f32 %v4833_v5, %v4831_v3  ;;  %v1279_v58 = vmul.f32 %v512_v4, %v512_v4 }
 0x10f   : > { %v4842_v10 = vpop.f32.mrb[2].mxu0  ;;  %v4844_v11 = vpop.f32.mrb[2].mxu1 }
 0x110   : > { %6939 = vst [vmem:[#allocation7_spill] sm:$0xff] %v4842_v10  ;;  %6940 = vst [vmem:[#allocation8_spill] sm:$0xff] %v4844_v11  ;;  %v518_v12 = vpop.f32.mrb[3].mxu0  ;;  %1267 = vmatmul.mubr.f32.gmra.mrb[108].mxu0 %v1020_v8  ;;  %v4846_v13 = vpop.f32.mrb[3].mxu1 }
 0x111   : > { %v1664_v14 = vmul.f32 %v518_v12, %v4842_v10  ;;  %1272 = vmatprep.mubr.f32.mxu0 %v6853_v7  ;;  %v4853_v16 = vmul.f32 %v4846_v13, %v4844_v11 }
 0x113   : > { %v4855_v17 = vpop.f32.mrb[4].mxu0  ;;  %v4857_v18 = vpop.f32.mrb[4].mxu1 }
 0x114   : > { %6941 = vst [vmem:[#allocation9_spill] sm:$0xff] %v4855_v17  ;;  %6942 = vst [vmem:[#allocation10_spill] sm:$0xff] %v4857_v18  ;;  %v524_v19 = vpop.f32.mrb[5].mxu0  ;;  %1273 = vmatmul.mubr.f32.gmra.mrb[110].mxu0 %v1021_v15  ;;  %v4859_v20 = vpop.f32.mrb[5].mxu1  ;;  %v1280_v15 = vmul.f32 %v518_v12, %v518_v12 }
 0x115   : > { %v1665_v21 = vmul.f32 %v524_v19, %v4855_v17  ;;  %v4864_v22 = vmul.f32 %v4859_v20, %v4857_v18  ;;  %2440 = vmatprep.mubr.f32.mxu0 %v6853_v7 }
 0x117   : > { %v4867_v23 = vpop.f32.mrb[6].mxu0  ;;  %v4869_v24 = vpop.f32.mrb[6].mxu1 }
 0x118   : > { %6943 = vst [vmem:[#allocation11_spill] sm:$0xff] %v4867_v23  ;;  %6944 = vst [vmem:[#allocation12_spill] sm:$0xff] %v4869_v24  ;;  %v530_v25 = vpop.f32.mrb[7].mxu0  ;;  %v4871_v26 = vpop.f32.mrb[7].mxu1 }
 0x119   : > { %v4874_v27 = vmul.f32 %v530_v25, %v4867_v23  ;;  %v4878_v28 = vmul.f32 %v4871_v26, %v4869_v24  ;;  %v1282_v3 = vmul.f32 %v530_v25, %v530_v25 }
 0x11b   : > { %6945 = vst [vmem:[#allocation13_spill] sm:$0xff] %v4878_v28  ;;  %v4880_v30 = vpop.f32.mrb[8].mxu0  ;;  %v4882_v31 = vpop.f32.mrb[8].mxu1 }
 0x11c   : > { %6946 = vst [vmem:[#allocation14_spill] sm:$0xff] %v4880_v30  ;;  %6947 = vst [vmem:[#allocation15_spill] sm:$0xff] %v4882_v31  ;;  %v4884_v32 = vpop.f32.mrb[9].mxu0  ;;  %v4886_v33 = vpop.f32.mrb[9].mxu1 }
 0x11d   : > { %v4890_v34 = vmul.f32 %v4884_v32, %v4880_v30  ;;  %v4894_v35 = vmul.f32 %v4886_v33, %v4882_v31  ;;  %v1281_v31 = vmul.f32 %v524_v19, %v524_v19  ;;  %v1283_v25 = vmul.f32 %v4884_v32, %v4884_v32 }
 0x11f   : > { %6948 = vst [vmem:[#allocation16_spill] sm:$0xff] %v4894_v35  ;;  %v4896_v36 = vpop.f32.mrb[10].mxu0  ;;  %v4898_v37 = vpop.f32.mrb[10].mxu1 }
 0x120   : > { %6949 = vst [vmem:[#allocation17_spill] sm:$0xff] %v4896_v36  ;;  %6950 = vst [vmem:[#allocation18_spill] sm:$0xff] %v4898_v37  ;;  %v4900_v38 = vpop.f32.mrb[11].mxu0  ;;  %v4902_v39 = vpop.f32.mrb[11].mxu1 }
 0x121   : > { %v4906_v40 = vmul.f32 %v4900_v38, %v4896_v36  ;;  %v4910_v41 = vmul.f32 %v4902_v39, %v4898_v37  ;;  %v1284_v32 = vmul.f32 %v4900_v38, %v4900_v38 }
 0x123   : > { %6951 = vst [vmem:[#allocation19_spill] sm:$0xff] %v4910_v41  ;;  %v4912_v42 = vpop.f32.mrb[12].mxu0  ;;  %v4914_v43 = vpop.f32.mrb[12].mxu1 }
 0x124   : > { %6952 = vst [vmem:[#allocation20_spill] sm:$0xff] %v4912_v42  ;;  %6953 = vst [vmem:[#allocation21_spill] sm:$0xff] %v4914_v43  ;;  %v4916_v44 = vpop.f32.mrb[13].mxu0  ;;  %v4918_v45 = vpop.f32.mrb[13].mxu1 }
 0x125   : > { %v4922_v46 = vmul.f32 %v4916_v44, %v4912_v42  ;;  %v4926_v47 = vmul.f32 %v4918_v45, %v4914_v43  ;;  %v1285_v38 = vmul.f32 %v4916_v44, %v4916_v44 }
 0x127   : > { %6954 = vst [vmem:[#allocation22_spill] sm:$0xff] %v4926_v47  ;;  %v4928_v48 = vpop.f32.mrb[14].mxu0  ;;  %v4930_v49 = vpop.f32.mrb[14].mxu1 }
 0x128   : > { %6955 = vst [vmem:[#allocation23_spill] sm:$0xff] %v4928_v48  ;;  %6956 = vst [vmem:[#allocation24_spill] sm:$0xff] %v4930_v49  ;;  %v4932_v50 = vpop.f32.mrb[15].mxu0  ;;  %v4934_v51 = vpop.f32.mrb[15].mxu1 }
 0x129   : > { %v4938_v52 = vmul.f32 %v4932_v50, %v4928_v48  ;;  %v4942_v53 = vmul.f32 %v4934_v51, %v4930_v49  ;;  %v1286_v44 = vmul.f32 %v4932_v50, %v4932_v50 }
 0x12b   : > { %6957 = vst [vmem:[#allocation25_spill] sm:$0xff] %v4942_v53  ;;  %v4944_v54 = vpop.f32.mrb[16].mxu0  ;;  %v4946_v55 = vpop.f32.mrb[16].mxu1 }
 0x12c   : > { %6958 = vst [vmem:[#allocation26_spill] sm:$0xff] %v4944_v54  ;;  %6959 = vst [vmem:[#allocation27_spill] sm:$0xff] %v4946_v55  ;;  %v4948_v56 = vpop.f32.mrb[17].mxu0  ;;  %v801_v57 = vpop.f32.mrb[17].mxu1 }
 0x12d   : > { %v4952_v59 = vmul.f32 %v4948_v56, %v4944_v54  ;;  %v1311_v60 = vmul.f32 %v801_v57, %v801_v57  ;;  %v1695_v61 = vmul.f32 %v801_v57, %v4946_v55  ;;  %v1287_v50 = vmul.f32 %v4948_v56, %v4948_v56 }
 0x12f   : > { %v4955_v62 = vadd.f32 %v1311_v60, %v1279_v58  ;;  %v4957_v63 = vadd.f32 %v1695_v61, %v1663_v6  ;;  %v4959_v29 = vpop.f32.mrb[18].mxu0  ;;  %v4961_v0 = vpop.f32.mrb[18].mxu1 }
 0x130   : > { %6960 = vst [vmem:[#allocation28_spill] sm:$0xff] %v4959_v29  ;;  %6961 = vst [vmem:[#allocation29_spill] sm:$0xff] %v4961_v0  ;;  %v4963_v1 = vpop.f32.mrb[19].mxu0  ;;  %v807_v8 = vpop.f32.mrb[19].mxu1 }
 0x131   : > { %v4967_v4 = vmul.f32 %v4963_v1, %v4959_v29  ;;  %v1312_v7 = vmul.f32 %v807_v8, %v807_v8  ;;  %v1696_v43 = vmul.f32 %v807_v8, %v4961_v0  ;;  %v1288_v56 = vmul.f32 %v4963_v1, %v4963_v1 }
 0x133   : > { %v4970_v57 = vadd.f32 %v1312_v7, %v1280_v15  ;;  %v4972_v58 = vadd.f32 %v1696_v43, %v1664_v14  ;;  %v4974_v6 = vpop.f32.mrb[20].mxu0  ;;  %v4976_v60 = vpop.f32.mrb[20].mxu1 }
 0x134   : > { %6962 = vst [vmem:[#allocation30_spill] sm:$0xff] %v4974_v6  ;;  %6963 = vst [vmem:[#allocation31_spill] sm:$0xff] %v4976_v60  ;;  %v4978_v61 = vpop.f32.mrb[21].mxu0  ;;  %v813_v49 = vpop.f32.mrb[21].mxu1 }
 0x135   : > { %v4982_v12 = vmul.f32 %v4978_v61, %v4974_v6  ;;  %v1313_v37 = vmul.f32 %v813_v49, %v813_v49  ;;  %v1697_v18 = vmul.f32 %v813_v49, %v4976_v60  ;;  %v1289_v1 = vmul.f32 %v4978_v61, %v4978_v61 }
 0x137   : > { %v4985_v8 = vadd.f32 %v1313_v37, %v1281_v31  ;;  %v4987_v7 = vadd.f32 %v1697_v18, %v1665_v21  ;;  %v4989_v14 = vpop.f32.mrb[22].mxu0  ;;  %v4991_v43 = vpop.f32.mrb[22].mxu1 }
 0x138   : > { %6964 = vst [vmem:[#allocation32_spill] sm:$0xff] %v4989_v14  ;;  %6965 = vst [vmem:[#allocation33_spill] sm:$0xff] %v4991_v43  ;;  %v4993_v15 = vpop.f32.mrb[23].mxu0  ;;  %v819_v24 = vpop.f32.mrb[23].mxu1 }
 0x139   : > { %v4997_v19 = vmul.f32 %v4993_v15, %v4989_v14  ;;  %v1314_v11 = vmul.f32 %v819_v24, %v819_v24  ;;  %v1698_v6 = vmul.f32 %v819_v24, %v4991_v43  ;;  %v1290_v61 = vmul.f32 %v4993_v15, %v4993_v15 }
 0x13b   : > { %v5000_v49 = vadd.f32 %v1314_v11, %v1282_v3  ;;  %v5003_v18 = vadd.f32 %v1698_v6, %v4874_v27  ;;  %v5005_v21 = vpop.f32.mrb[24].mxu0  ;;  %v5007_v31 = vpop.f32.mrb[24].mxu1 }
 0x13c   : > { %6966 = vst [vmem:[#allocation34_spill] sm:$0xff] %v5005_v21  ;;  %6967 = vst [vmem:[#allocation35_spill] sm:$0xff] %v5007_v31  ;;  %v5009_v37 = vpop.f32.mrb[25].mxu0  ;;  %v825_v54 = vpop.f32.mrb[25].mxu1 }
 0x13d   : > { %v5015_v14 = vmul.f32 %v5009_v37, %v5005_v21  ;;  %v1315_v24 = vmul.f32 %v825_v54, %v825_v54  ;;  %v1699_v3 = vmul.f32 %v825_v54, %v5007_v31  ;;  %v1291_v15 = vmul.f32 %v5009_v37, %v5009_v37 }
 0x13f   : > { %v5018_v11 = vadd.f32 %v1315_v24, %v1283_v25  ;;  %v5021_v27 = vadd.f32 %v1699_v3, %v4890_v34  ;;  %v5023_v6 = vpop.f32.mrb[26].mxu0  ;;  %v5025_v29 = vpop.f32.mrb[26].mxu1 }
 0x140   : > { %6968 = vst [vmem:[#allocation36_spill] sm:$0xff] %v5023_v6  ;;  %6969 = vst [vmem:[#allocation37_spill] sm:$0xff] %v5025_v29  ;;  %v5027_v42 = vpop.f32.mrb[27].mxu0  ;;  %v831_v48 = vpop.f32.mrb[27].mxu1 }
 0x141   : > { %v5033_v21 = vmul.f32 %v5027_v42, %v5023_v6  ;;  %v1316_v54 = vmul.f32 %v831_v48, %v831_v48  ;;  %v1700_v25 = vmul.f32 %v831_v48, %v5025_v29  ;;  %v1292_v37 = vmul.f32 %v5027_v42, %v5027_v42 }
 0x143   : > { %v5036_v24 = vadd.f32 %v1316_v54, %v1284_v32  ;;  %v5039_v34 = vadd.f32 %v1700_v25, %v4906_v40  ;;  %v5041_v3 = vpop.f32.mrb[28].mxu0  ;;  %v5043_v31 = vpop.f32.mrb[28].mxu1 }
 0x144   : > { %6970 = vst [vmem:[#allocation38_spill] sm:$0xff] %v5041_v3  ;;  %6971 = vst [vmem:[#allocation39_spill] sm:$0xff] %v5043_v31  ;;  %v5045_v30 = vpop.f32.mrb[29].mxu0  ;;  %v837_v36 = vpop.f32.mrb[29].mxu1 }
 0x145   : > { %v5051_v6 = vmul.f32 %v5045_v30, %v5041_v3  ;;  %v1317_v48 = vmul.f32 %v837_v36, %v837_v36  ;;  %v1701_v32 = vmul.f32 %v837_v36, %v5043_v31  ;;  %v1293_v42 = vmul.f32 %v5045_v30, %v5045_v30 }
 0x147   : > { %v5054_v54 = vadd.f32 %v1317_v48, %v1285_v38  ;;  %v5057_v40 = vadd.f32 %v1701_v32, %v4922_v46  ;;  %v5059_v25 = vpop.f32.mrb[30].mxu0  ;;  %v5061_v29 = vpop.f32.mrb[30].mxu1 }
 0x148   : > { %6972 = vst [vmem:[#allocation40_spill] sm:$0xff] %v5059_v25  ;;  %6973 = vst [vmem:[#allocation41_spill] sm:$0xff] %v5061_v29  ;;  %v5063_v60 = vpop.f32.mrb[31].mxu0  ;;  %v843_v17 = vpop.f32.mrb[31].mxu1 }
 0x149   : > { %v5069_v3 = vmul.f32 %v5063_v60, %v5059_v25  ;;  %v1318_v36 = vmul.f32 %v843_v17, %v843_v17  ;;  %v1702_v38 = vmul.f32 %v843_v17, %v5061_v29  ;;  %v1294_v30 = vmul.f32 %v5063_v60, %v5063_v60 }
 0x14b   : > { %v5072_v48 = vadd.f32 %v1318_v36, %v1286_v44  ;;  %v5075_v46 = vadd.f32 %v1702_v38, %v4938_v52  ;;  %v5077_v32 = vpop.f32.mrb[32].mxu0  ;;  %v5079_v31 = vpop.f32.mrb[32].mxu1 }
 0x14c   : > { %6974 = vst [vmem:[#allocation42_spill] sm:$0xff] %v5077_v32  ;;  %6975 = vst [vmem:[#allocation43_spill] sm:$0xff] %v5079_v31  ;;  %v5081_v43 = vpop.f32.mrb[33].mxu0  ;;  %v849_v23 = vpop.f32.mrb[33].mxu1 }
 0x14d   : > { %v5087_v25 = vmul.f32 %v5081_v43, %v5077_v32  ;;  %v1319_v17 = vmul.f32 %v849_v23, %v849_v23  ;;  %v1703_v44 = vmul.f32 %v849_v23, %v5079_v31 }
 0x14f   : > { %v5090_v36 = vadd.f32 %v1319_v17, %v1287_v50  ;;  %v5093_v52 = vadd.f32 %v1703_v44, %v4952_v59  ;;  %v5095_v38 = vpop.f32.mrb[34].mxu0  ;;  %v5097_v29 = vpop.f32.mrb[34].mxu1 }
 0x150   : > { %6976 = vst [vmem:[#allocation44_spill] sm:$0xff] %v5095_v38  ;;  %6977 = vst [vmem:[#allocation45_spill] sm:$0xff] %v5097_v29  ;;  %v5099_v55 = vpop.f32.mrb[35].mxu0  ;;  %v855_v2 = vpop.f32.mrb[35].mxu1 }
 0x151   : > { %v5105_v32 = vmul.f32 %v5099_v55, %v5095_v38  ;;  %v1320_v23 = vmul.f32 %v855_v2, %v855_v2  ;;  %v1704_v50 = vmul.f32 %v855_v2, %v5097_v29 }
 0x153   : > { %v5108_v17 = vadd.f32 %v1320_v23, %v1288_v56  ;;  %v5111_v59 = vadd.f32 %v1704_v50, %v4967_v4  ;;  %v5113_v44 = vpop.f32.mrb[36].mxu0  ;;  %v5115_v31 = vpop.f32.mrb[36].mxu1 }
 0x154   : > { %6978 = vst [vmem:[#allocation46_spill] sm:$0xff] %v5113_v44  ;;  %6979 = vst [vmem:[#allocation47_spill] sm:$0xff] %v5115_v31  ;;  %v5117_v0 = vpop.f32.mrb[37].mxu0  ;;  %v861_v10 = vpop.f32.mrb[37].mxu1 }
 0x155   : > { %v5123_v38 = vmul.f32 %v5117_v0, %v5113_v44  ;;  %v1321_v2 = vmul.f32 %v861_v10, %v861_v10  ;;  %v1705_v56 = vmul.f32 %v861_v10, %v5115_v31 }
 0x157   : > { %v5126_v23 = vadd.f32 %v1321_v2, %v1289_v1  ;;  %v5129_v4 = vadd.f32 %v1705_v56, %v4982_v12  ;;  %v5131_v50 = vpop.f32.mrb[38].mxu0  ;;  %v5133_v29 = vpop.f32.mrb[38].mxu1 }
 0x158   : > { %6981 = vst [vmem:[#allocation49_spill] sm:$0xff] %v5131_v50  ;;  %6982 = vst [vmem:[#allocation50_spill] sm:$0xff] %v5133_v29  ;;  %v5135_v53 = vpop.f32.mrb[39].mxu0  ;;  %v867_v47 = vpop.f32.mrb[39].mxu1 }
 0x159   : > { %6980 = vst [vmem:[#allocation48_spill] sm:$0xff] %v5129_v4  ;;  %v5141_v44 = vmul.f32 %v5135_v53, %v5131_v50  ;;  %v1322_v10 = vmul.f32 %v867_v47, %v867_v47  ;;  %v1706_v1 = vmul.f32 %v867_v47, %v5133_v29 }
 0x15b   : > { %v5144_v2 = vadd.f32 %v1322_v10, %v1290_v61  ;;  %v5147_v12 = vadd.f32 %v1706_v1, %v4997_v19  ;;  %v5149_v56 = vpop.f32.mrb[40].mxu0  ;;  %v5151_v31 = vpop.f32.mrb[40].mxu1 }
 0x15c   : > { %6985 = vst [vmem:[#allocation53_spill] sm:$0xff] %v5149_v56  ;;  %6986 = vst [vmem:[#allocation54_spill] sm:$0xff] %v5151_v31  ;;  %v5153_v41 = vpop.f32.mrb[41].mxu0  ;;  %v873_v35 = vpop.f32.mrb[41].mxu1 }
 0x15d   : > { %6983 = vst [vmem:[#allocation51_spill] sm:$0xff] %v5144_v2  ;;  %6984 = vst [vmem:[#allocation52_spill] sm:$0xff] %v5147_v12  ;;  %v5159_v50 = vmul.f32 %v5153_v41, %v5149_v56  ;;  %v1323_v47 = vmul.f32 %v873_v35, %v873_v35  ;;  %v1707_v61 = vmul.f32 %v873_v35, %v5151_v31 }
 0x15f   : > { %v5162_v10 = vadd.f32 %v1323_v47, %v1291_v15  ;;  %v5165_v19 = vadd.f32 %v1707_v61, %v5015_v14  ;;  %v5167_v1 = vpop.f32.mrb[42].mxu0  ;;  %v5169_v29 = vpop.f32.mrb[42].mxu1 }
 0x160   : > { %6989 = vst [vmem:[#allocation57_spill] sm:$0xff] %v5167_v1  ;;  %6990 = vst [vmem:[#allocation58_spill] sm:$0xff] %v5169_v29  ;;  %v5171_v12 = vpop.f32.mrb[43].mxu0  ;;  %v879_v2 = vpop.f32.mrb[43].mxu1 }
 0x161   : > { %6987 = vst [vmem:[#allocation55_spill] sm:$0xff] %v5162_v10  ;;  %6988 = vst [vmem:[#allocation56_spill] sm:$0xff] %v5165_v19  ;;  %v5177_v56 = vmul.f32 %v5171_v12, %v5167_v1  ;;  %v1324_v35 = vmul.f32 %v879_v2, %v879_v2  ;;  %v1708_v15 = vmul.f32 %v879_v2, %v5169_v29 }
 0x163   : > { %v5180_v47 = vadd.f32 %v1324_v35, %v1292_v37  ;;  %v5183_v14 = vadd.f32 %v1708_v15, %v5033_v21  ;;  %v5185_v61 = vpop.f32.mrb[44].mxu0  ;;  %v5187_v31 = vpop.f32.mrb[44].mxu1 }
 0x164   : > { %6993 = vst [vmem:[#allocation61_spill] sm:$0xff] %v5185_v61  ;;  %6994 = vst [vmem:[#allocation62_spill] sm:$0xff] %v5187_v31  ;;  %v5189_v19 = vpop.f32.mrb[45].mxu0  ;;  %v885_v10 = vpop.f32.mrb[45].mxu1 }
 0x165   : > { %6991 = vst [vmem:[#allocation59_spill] sm:$0xff] %v5180_v47  ;;  %6992 = vst [vmem:[#allocation60_spill] sm:$0xff] %v5183_v14  ;;  %v5195_v1 = vmul.f32 %v5189_v19, %v5185_v61  ;;  %v1325_v2 = vmul.f32 %v885_v10, %v885_v10  ;;  %v1709_v37 = vmul.f32 %v885_v10, %v5187_v31 }
 0x167   : > { %v5198_v35 = vadd.f32 %v1325_v2, %v1293_v42  ;;  %v5201_v21 = vadd.f32 %v1709_v37, %v5051_v6  ;;  %v5203_v15 = vpop.f32.mrb[46].mxu0  ;;  %v5205_v29 = vpop.f32.mrb[46].mxu1 }
 0x168   : > { %6997 = vst [vmem:[#allocation65_spill] sm:$0xff] %v5203_v15  ;;  %6998 = vst [vmem:[#allocation66_spill] sm:$0xff] %v5205_v29  ;;  %v5207_v14 = vpop.f32.mrb[47].mxu0  ;;  %v891_v47 = vpop.f32.mrb[47].mxu1 }
 0x169   : > { %6995 = vst [vmem:[#allocation63_spill] sm:$0xff] %v5198_v35  ;;  %6996 = vst [vmem:[#allocation64_spill] sm:$0xff] %v5201_v21  ;;  %v5213_v61 = vmul.f32 %v5207_v14, %v5203_v15  ;;  %v1326_v10 = vmul.f32 %v891_v47, %v891_v47  ;;  %v1710_v42 = vmul.f32 %v891_v47, %v5205_v29 }
 0x16a   : > { %v1295_v21 = vmul.f32 %v5081_v43, %v5081_v43 }
 0x16b   : > { %v5216_v2 = vadd.f32 %v1326_v10, %v1294_v30  ;;  %v5219_v6 = vadd.f32 %v1710_v42, %v5069_v3  ;;  %v5221_v37 = vpop.f32.mrb[48].mxu1  ;;  %v5223_v31 = vpop.f32.mrb[48].mxu0 }
 0x16c   : > { %6999 = vst [vmem:[#allocation67_spill] sm:$0xff] %v5221_v37  ;;  %7000 = vst [vmem:[#allocation68_spill] sm:$0xff] %v5223_v31  ;;  %v897_v60 = vpop.f32.mrb[49].mxu1  ;;  %v1090_v35 = vpop.f32.mrb[49].mxu0 }
 0x16d   : > { %v1327_v28 = vmul.f32 %v897_v60, %v897_v60  ;;  %v1711_v15 = vmul.f32 %v897_v60, %v5221_v37  ;;  %v1375_v4 = vmul.f32 %v1090_v35, %v1090_v35  ;;  %v1759_v47 = vmul.f32 %v1090_v35, %v5223_v31 }
 0x16e   : > { %v1296_v60 = vmul.f32 %v5099_v55, %v5099_v55 }
 0x16f   : > { %v5229_v30 = vadd.f32 %v1327_v28, %v1295_v21  ;;  %v5232_v3 = vadd.f32 %v1711_v15, %v5087_v25  ;;  %v5235_v10 = vadd.f32 %v1375_v4, %v4955_v62  ;;  %v5238_v42 = vadd.f32 %v1759_v47, %v4957_v63  ;;  %v5240_v43 = vpop.f32.mrb[50].mxu1  ;;  %v5242_v29 = vpop.f32.mrb[50].mxu0 }
 0x170   : > { %7002 = vst [vmem:[#allocation70_spill] sm:$0xff] %v5240_v43  ;;  %7003 = vst [vmem:[#allocation71_spill] sm:$0xff] %v5242_v29  ;;  %v903_v37 = vpop.f32.mrb[51].mxu1  ;;  %v1096_v35 = vpop.f32.mrb[51].mxu0 }
 0x171   : > { %7001 = vst [vmem:[#allocation69_spill] sm:$0xff] %v5238_v42  ;;  %v1328_v28 = vmul.f32 %v903_v37, %v903_v37  ;;  %v1712_v21 = vmul.f32 %v903_v37, %v5240_v43  ;;  %v1376_v25 = vmul.f32 %v1096_v35, %v1096_v35  ;;  %v1760_v15 = vmul.f32 %v1096_v35, %v5242_v29 }
 0x172   : > { %3940 = vrsqrt.f32 %v5235_v10  ;;  %v1297_v37 = vmul.f32 %v5117_v0, %v5117_v0  ;;  %v2311_v0 = vld [vmem:[%s6849_s5] sm:$0xff]  ;;  %vm1441_vm0 = vcmp.eq.f32.partialorder %v5235_v10, inf  ;;  %vm1443_vm1 = vcmp.eq.f32.partialorder %v5235_v10, 0.0 }
 0x173   : > { %v5249_v62 = vadd.f32 %v1328_v28, %v1296_v60  ;;  %v5252_v63 = vadd.f32 %v1712_v21, %v5105_v32  ;;  %v5255_v4 = vadd.f32 %v1376_v25, %v4970_v57  ;;  %v5258_v55 = vadd.f32 %v1760_v15, %v4972_v58  ;;  %v5260_v47 = vpop.f32.mrb[52].mxu1  ;;  %v5262_v31 = vpop.f32.mrb[52].mxu0  ;;  %v2312_v32 = vld [vmem:[%s6849_s5 + $0x8] sm:$0xff]  ;;  %v2315_v21 = vld [vmem:[%s6849_s5 + $0x20] sm:$0xff]  ;;  %v2314_v25 = vld [vmem:[%s6849_s5 + $0x18] sm:$0xff] }
 0x174   : > { %7005 = vst [vmem:[#allocation73_spill] sm:$0xff] %v5260_v47  ;;  %7006 = vst [vmem:[#allocation74_spill] sm:$0xff] %v5262_v31  ;;  %v909_v35 = vpop.f32.mrb[53].mxu1  ;;  %v1102_v43 = vpop.f32.mrb[53].mxu0  ;;  %v5282_v15 = vmul.f32 %v4833_v5, %v4833_v5  ;;  %v3818_v42 = vpack.c.bf16 %v2314_v25, %v2311_v0 }
 0x175   : > { %7004 = vst [vmem:[#allocation72_spill] sm:$0xff] %v5258_v55  ;;  %v1329_v60 = vmul.f32 %v909_v35, %v909_v35  ;;  %v1713_v57 = vmul.f32 %v909_v35, %v5260_v47  ;;  %v1377_v28 = vmul.f32 %v1102_v43, %v1102_v43  ;;  %v1761_v58 = vmul.f32 %v1102_v43, %v5262_v31 }
 0x176   : > { %v5286_v35 = vmul.f32 %v4846_v13, %v4846_v13  ;;  %v5290_v43 = vmul.f32 %v4859_v20, %v4859_v20  ;;  %3942 = vrsqrt.f32 %v5255_v4  ;;  %v5310_v20 = vmul.f32 %v4871_v26, %v4871_v26 }
 0x177   : > { %v5293_v47 = vadd.f32 %v1329_v60, %v1297_v37  ;;  %v5296_v31 = vadd.f32 %v1713_v57, %v5123_v38  ;;  %v5299_v55 = vadd.f32 %v1377_v28, %v4985_v8  ;;  %v5302_v5 = vadd.f32 %v1761_v58, %v4987_v7  ;;  %v5304_v29 = vpop.f32.mrb[54].mxu1  ;;  %v5306_v13 = vpop.f32.mrb[54].mxu0 }
 0x178   : > { %7008 = vst [vmem:[#allocation76_spill] sm:$0xff] %v5304_v29  ;;  %v1298_v37 = vmul.f32 %v5135_v53, %v5135_v53  ;;  %v915_v60 = vpop.f32.mrb[55].mxu1  ;;  %v1108_v38 = vpop.f32.mrb[55].mxu0  ;;  %v3816_v57 = vpack.c.bf16 %v2315_v21, %v2312_v32  ;;  %v5322_v26 = vmul.f32 %v4902_v39, %v4902_v39  ;;  %v5326_v53 = vmul.f32 %v4918_v45, %v4918_v45 }
 0x179   : > { %7007 = vst [vmem:[#allocation75_spill] sm:$0xff] %v5302_v5  ;;  %v1330_v8 = vmul.f32 %v915_v60, %v915_v60  ;;  %v1714_v7 = vmul.f32 %v915_v60, %v5304_v29  ;;  %v1378_v28 = vmul.f32 %v1108_v38, %v1108_v38  ;;  %v1762_v58 = vmul.f32 %v1108_v38, %v5306_v13 }
 0x17a   : > { %v5318_v5 = vmul.f32 %v4886_v33, %v4886_v33  ;;  %3944 = vrsqrt.f32 %v5299_v55  ;;  %3817 = vmatprep.subr.bf16.mxu0 %v3816_v57  ;;  %vm1448_vm2 = vcmp.eq.f32.partialorder %v5255_v4, inf  ;;  %vm1450_vm3 = vcmp.eq.f32.partialorder %v5255_v4, 0.0 }
 0x17b   : > { %v5329_v32 = vadd.f32 %v1330_v8, %v1298_v37  ;;  %v5332_v21 = vadd.f32 %v1714_v7, %v5141_v44  ;;  %v5335_v0 = vadd.f32 %v1378_v28, %v5000_v49  ;;  %v5338_v33 = vadd.f32 %v1762_v58, %v5003_v18  ;;  %v5340_v39 = vpop.f32.mrb[56].mxu1  ;;  %v5342_v25 = vpop.f32.mrb[56].mxu0  ;;  %3819 = vmatpush1.bf16.msra.mxu0 %v3818_v42 }
 0x17c   : > { %7009 = vst [vmem:[#allocation77_spill] sm:$0xff] %v5340_v39  ;;  %7010 = vst [vmem:[#allocation78_spill] sm:$0xff] %v5342_v25  ;;  %v3941_v45 = vpop.eup %3940  ;;  %v5347_v37 = vmul.f32 %v4934_v51, %v4934_v51  ;;  %v1299_v44 = vmul.f32 %v5153_v41, %v5153_v41  ;;  %v1300_v49 = vmul.f32 %v5171_v12, %v5171_v12  ;;  %v921_v60 = vpop.f32.mrb[57].mxu1  ;;  %vm1455_vm4 = vcmp.eq.f32.partialorder %v5299_v55, inf }
 0x17d   : > { %v5355_v18 = vmul.f32 %v5189_v19, %v5189_v19  ;;  %v1114_v38 = vpop.f32.mrb[57].mxu0  ;;  %v1331_v57 = vmul.f32 %v921_v60, %v921_v60  ;;  %v1715_v42 = vmul.f32 %v921_v60, %v5340_v39  ;;  %v5361_v51 = vmul.f32 %v5207_v14, %v5207_v14 }
 0x17e   : > { %v1379_v8 = vmul.f32 %v1114_v38, %v1114_v38  ;;  %v1763_v7 = vmul.f32 %v1114_v38, %v5342_v25  ;;  %v1440_v41 = vmul.f32 %v3941_v45, %v5235_v10  ;;  %3946 = vrsqrt.f32 %v5335_v0 }
 0x17f   : > { %v5371_v12 = vadd.f32 %v1331_v57, %v1299_v44  ;;  %v5374_v19 = vadd.f32 %v1715_v42, %v5159_v50  ;;  %v5382_v58 = vpop.f32.mrb[58].mxu1  ;;  %v5384_v45 = vpop.f32.mrb[58].mxu0  ;;  %v1444_v50 = vand.u32 2147483648, %v5235_v10  ;;  %vm1457_vm5 = vcmp.eq.f32.partialorder %v5299_v55, 0.0 }
 0x180   : > { %v5377_v14 = vadd.f32 %v1379_v8, %v5018_v11  ;;  %v5380_v28 = vadd.f32 %v1763_v7, %v5021_v27  ;;  %7011 = vst [vmem:[#allocation79_spill] sm:$0xff] %v5382_v58  ;;  %7012 = vst [vmem:[#allocation80_spill] sm:$0xff] %v5384_v45  ;;  %v3943_v60 = vpop.eup %3942  ;;  %v927_v38 = vpop.f32.mrb[59].mxu1  ;;  %v1442_v44 = vsel %vm1441_vm0, %v5235_v10, %v1440_v41  ;;  %v348_v8 = vld [vmem:[%s5368_s12] sm:$0xff]  ;;  %v2318_v7 = vld [vmem:[%s6849_s5 + $0x38] sm:$0xff]  ;;  %vm1462_vm6 = vcmp.eq.f32.partialorder %v5335_v0, inf }
 0x181   : > { %v1120_v39 = vpop.f32.mrb[59].mxu0  ;;  %v1332_v11 = vmul.f32 %v927_v38, %v927_v38  ;;  %v1716_v57 = vmul.f32 %v927_v38, %v5382_v58  ;;  %v2321_v41 = vld [vmem:[%s6849_s5 + $0x50] sm:$0xff]  ;;  %v1445_v29 = vsel %vm1443_vm1, %v1444_v50, %v1442_v44  ;;  %v1447_v10 = vmul.f32 %v3943_v60, %v5255_v4 }
 0x182   : > { %v1380_v27 = vmul.f32 %v1120_v39, %v1120_v39  ;;  %v1764_v42 = vmul.f32 %v1120_v39, %v5384_v45  ;;  %3948 = vrsqrt.f32 %v5377_v14  ;;  %1926 = vmatprep.mubr.f32.mxu1 %v1445_v29  ;;  %vm1464_vm7 = vcmp.eq.f32.partialorder %v5335_v0, 0.0 }
 0x183   : > { %v5402_v38 = vadd.f32 %v1332_v11, %v1300_v49  ;;  %v5405_v39 = vadd.f32 %v1716_v57, %v5177_v56  ;;  %v5413_v44 = vpop.f32.mrb[60].mxu1  ;;  %v5415_v60 = vpop.f32.mrb[60].mxu0  ;;  %1927 = vmatmul.mubr.f32.vlgmr.msra.gmra.mrb[80].mxu1 %v348_v8  ;;  %v1449_v56 = vsel %vm1448_vm2, %v5255_v4, %v1447_v10  ;;  %v2317_v8 = vld [vmem:[%s6849_s5 + $0x30] sm:$0xff]  ;;  %v2320_v10 = vld [vmem:[%s6849_s5 + $0x48] sm:$0xff]  ;;  %vm1469_vm8 = vcmp.eq.f32.partialorder %v5377_v14, inf }
 0x184   : > { %v5408_v58 = vadd.f32 %v1380_v27, %v5036_v24  ;;  %v5411_v25 = vadd.f32 %v1764_v42, %v5039_v34  ;;  %7014 = vst [vmem:[#allocation82_spill] sm:$0xff] %v5413_v44  ;;  %v3945_v50 = vpop.eup %3944  ;;  %v933_v45 = vpop.f32.mrb[61].mxu1  ;;  %v1451_v24 = vand.u32 2147483648, %v5255_v4  ;;  %v3820_v34 = vpack.c.bf16 %v2321_v41, %v2318_v7  ;;  %v349_v42 = vld [vmem:[%s5368_s12 + $0x8] sm:$0xff] }
 0x185   : > { %v1126_v49 = vpop.f32.mrb[61].mxu0  ;;  %v1333_v11 = vmul.f32 %v933_v45, %v933_v45  ;;  %v1717_v29 = vmul.f32 %v933_v45, %v5413_v44  ;;  %v1454_v7 = vmul.f32 %v3945_v50, %v5299_v55  ;;  %vm1471_vm9 = vcmp.eq.f32.partialorder %v5377_v14, 0.0 }
 0x186   : > { %7013 = vst [vmem:[#allocation81_spill] sm:$0xff] %v5411_v25  ;;  %v1381_v57 = vmul.f32 %v1126_v49, %v1126_v49  ;;  %v1765_v27 = vmul.f32 %v1126_v49, %v5415_v60  ;;  %v1452_v25 = vsel %vm1450_vm3, %v1451_v24, %v1449_v56  ;;  %3950 = vrsqrt.f32 %v5408_v58  ;;  %3821 = vmatprep.subr.bf16.mxu0 %v3820_v34 }
 0x187   : > { %v5437_v45 = vadd.f32 %v1333_v11, %v5355_v18  ;;  %v5440_v41 = vadd.f32 %v1717_v29, %v5195_v1  ;;  %1931 = vmatprep.mubr.f32.mxu1 %v1452_v25  ;;  %v5448_v4 = vpop.f32.mrb[62].mxu1  ;;  %v5450_v50 = vpop.f32.mrb[62].mxu0  ;;  %v1456_v1 = vsel %vm1455_vm4, %v5299_v55, %v1454_v7  ;;  %vm1476_vm10 = vcmp.eq.f32.partialorder %v5408_v58, inf }
 0x188   : > { %v5443_v49 = vadd.f32 %v1381_v57, %v5054_v54  ;;  %v5446_v44 = vadd.f32 %v1765_v27, %v5057_v40  ;;  %7015 = vst [vmem:[#allocation83_spill] sm:$0xff] %v5448_v4  ;;  %v3947_v56 = vpop.eup %3946  ;;  %1932 = vmatmul.mubr.f32.gmra.mrb[82].mxu1 %v349_v42  ;;  %v939_v24 = vpop.f32.mrb[63].mxu1  ;;  %v1458_v54 = vand.u32 2147483648, %v5299_v55  ;;  %v3822_v40 = vpack.c.bf16 %v2320_v10, %v2317_v8  ;;  %v350_v57 = vld [vmem:[%s5368_s12 + $0x10] sm:$0xff]  ;;  %v2324_v27 = vld [vmem:[%s6849_s5 + $0x68] sm:$0xff]  ;;  %v2327_v42 = vld [vmem:[%s6849_s5 + $0x80] sm:$0xff] }
 0x189   : > { %v1132_v18 = vpop.f32.mrb[63].mxu0  ;;  %v1334_v34 = vmul.f32 %v939_v24, %v939_v24  ;;  %v1718_v25 = vmul.f32 %v939_v24, %v5448_v4  ;;  %v1461_v8 = vmul.f32 %v3947_v56, %v5335_v0  ;;  %vm1478_vm11 = vcmp.eq.f32.partialorder %v5408_v58, 0.0 }
 0x18a   : > { %v1382_v11 = vmul.f32 %v1132_v18, %v1132_v18  ;;  %v1766_v29 = vmul.f32 %v1132_v18, %v5450_v50  ;;  %v1459_v7 = vsel %vm1457_vm5, %v1458_v54, %v1456_v1  ;;  %3952 = vrsqrt.f32 %v5443_v49  ;;  %3823 = vmatpush1.bf16.msra.mxu0 %v3822_v40 }
 0x18b   : > { %v5472_v10 = vadd.f32 %v1334_v34, %v5361_v51  ;;  %v5475_v24 = vadd.f32 %v1718_v25, %v5213_v61  ;;  %1936 = vmatprep.mubr.f32.mxu1 %v1459_v7  ;;  %v5483_v55 = vpop.f32.mrb[64].mxu1  ;;  %v5485_v56 = vpop.f32.mrb[64].mxu0  ;;  %v1463_v61 = vsel %vm1462_vm6, %v5335_v0, %v1461_v8  ;;  %v2326_v7 = vld [vmem:[%s6849_s5 + $0x78] sm:$0xff]  ;;  %vm1483_vm12 = vcmp.eq.f32.partialorder %v5443_v49, inf }
 0x18c   : > { %v5478_v18 = vadd.f32 %v1382_v11, %v5072_v48  ;;  %v5481_v4 = vadd.f32 %v1766_v29, %v5075_v46  ;;  %7016 = vst [vmem:[#allocation84_spill] sm:$0xff] %v5483_v55  ;;  %7017 = vst [vmem:[#allocation85_spill] sm:$0xff] %v5485_v56  ;;  %v3949_v1 = vpop.eup %3948  ;;  %1937 = vmatmul.mubr.f32.gmra.mrb[84].mxu1 %v350_v57  ;;  %v945_v54 = vpop.f32.mrb[65].mxu1  ;;  %v1465_v48 = vand.u32 2147483648, %v5335_v0  ;;  %v351_v29 = vld [vmem:[%s5368_s12 + $0x18] sm:$0xff]  ;;  %v2323_v57 = vld [vmem:[%s6849_s5 + $0x60] sm:$0xff] }
 0x18d   : > { %v1138_v51 = vpop.f32.mrb[65].mxu0  ;;  %v3824_v46 = vpack.c.bf16 %v2327_v42, %v2324_v27  ;;  %v1335_v40 = vmul.f32 %v945_v54, %v945_v54  ;;  %v1719_v34 = vmul.f32 %v945_v54, %v5483_v55  ;;  %v1468_v27 = vmul.f32 %v3949_v1, %v5377_v14 }
 0x18e   : > { %v1383_v25 = vmul.f32 %v1138_v51, %v1138_v51  ;;  %v1767_v11 = vmul.f32 %v1138_v51, %v5485_v56  ;;  %v1466_v8 = vsel %vm1464_vm7, %v1465_v48, %v1463_v61  ;;  %3954 = vrsqrt.f32 %v5478_v18 }
 0x18f   : > { %3825 = vmatprep.subr.bf16.mxu0 %v3824_v46  ;;  %v5507_v42 = vadd.f32 %v1335_v40, %v5282_v15  ;;  %v5510_v54 = vadd.f32 %v1719_v34, %v4840_v9  ;;  %1941 = vmatprep.mubr.f32.mxu1 %v1466_v8  ;;  %v5518_v0 = vpop.f32.mrb[66].mxu1  ;;  %v5520_v1 = vpop.f32.mrb[66].mxu0  ;;  %v1470_v9 = vsel %vm1469_vm8, %v5377_v14, %v1468_v27  ;;  %v2333_v8 = vld [vmem:[%s6849_s5 + $0xb0] sm:$0xff]  ;;  %vm1485_vm13 = vcmp.eq.f32.partialorder %v5443_v49, 0.0 }
 0x190   : > { %v5513_v51 = vadd.f32 %v1383_v25, %v5090_v36  ;;  %v5516_v55 = vadd.f32 %v1767_v11, %v5093_v52  ;;  %7019 = vst [vmem:[#allocation87_spill] sm:$0xff] %v5518_v0  ;;  %7020 = vst [vmem:[#allocation88_spill] sm:$0xff] %v5520_v1  ;;  %v3951_v61 = vpop.eup %3950  ;;  %1942 = vmatmul.mubr.f32.gmra.mrb[86].mxu1 %v351_v29  ;;  %v951_v48 = vpop.f32.mrb[67].mxu1  ;;  %v1472_v36 = vand.u32 2147483648, %v5377_v14  ;;  %v352_v11 = vld [vmem:[%s5368_s12 + $0x20] sm:$0xff]  ;;  %v2330_v29 = vld [vmem:[%s6849_s5 + $0x98] sm:$0xff] }
 0x191   : > { %v1144_v15 = vpop.f32.mrb[67].mxu0  ;;  %v3826_v52 = vpack.c.bf16 %v2326_v7, %v2323_v57  ;;  %v1336_v46 = vmul.f32 %v951_v48, %v951_v48  ;;  %v1720_v40 = vmul.f32 %v951_v48, %v5518_v0  ;;  %v1475_v57 = vmul.f32 %v3951_v61, %v5408_v58 }
 0x192   : > { %7018 = vst [vmem:[#allocation86_spill] sm:$0xff] %v5516_v55  ;;  %v1384_v34 = vmul.f32 %v1144_v15, %v1144_v15  ;;  %v1768_v25 = vmul.f32 %v1144_v15, %v5520_v1  ;;  %v1473_v27 = vsel %vm1471_vm9, %v1472_v36, %v1470_v9  ;;  %3956 = vrsqrt.f32 %v5513_v51 }
 0x193   : > { %3827 = vmatpush1.bf16.msra.mxu0 %v3826_v52  ;;  %v5542_v7 = vadd.f32 %v1336_v46, %v5286_v35  ;;  %v5545_v48 = vadd.f32 %v1720_v40, %v4853_v16  ;;  %1946 = vmatprep.mubr.f32.mxu1 %v1473_v27  ;;  %v5553_v14 = vpop.f32.mrb[68].mxu1  ;;  %v5555_v61 = vpop.f32.mrb[68].mxu0  ;;  %v1477_v16 = vsel %vm1476_vm10, %v5408_v58, %v1475_v57  ;;  %v2332_v27 = vld [vmem:[%s6849_s5 + $0xa8] sm:$0xff]  ;;  %vm1490_vm14 = vcmp.eq.f32.partialorder %v5478_v18, inf }
 0x194   : > { %v5548_v15 = vadd.f32 %v1384_v34, %v5108_v17  ;;  %v5551_v0 = vadd.f32 %v1768_v25, %v5111_v59  ;;  %7022 = vst [vmem:[#allocation90_spill] sm:$0xff] %v5553_v14  ;;  %7023 = vst [vmem:[#allocation91_spill] sm:$0xff] %v5555_v61  ;;  %v3953_v9 = vpop.eup %3952  ;;  %1947 = vmatmul.mubr.f32.gmra.mrb[88].mxu1 %v352_v11  ;;  %v957_v36 = vpop.f32.mrb[69].mxu1  ;;  %v1479_v17 = vand.u32 2147483648, %v5408_v58  ;;  %v353_v25 = vld [vmem:[%s5368_s12 + $0x28] sm:$0xff]  ;;  %v2329_v11 = vld [vmem:[%s6849_s5 + $0x90] sm:$0xff] }
 0x195   : > { %v1150_v35 = vpop.f32.mrb[69].mxu0  ;;  %v3828_v59 = vpack.c.bf16 %v2333_v8, %v2330_v29  ;;  %v1337_v52 = vmul.f32 %v957_v36, %v957_v36  ;;  %v1721_v46 = vmul.f32 %v957_v36, %v5553_v14  ;;  %v1482_v29 = vmul.f32 %v3953_v9, %v5443_v49  ;;  %v7024_v14 = vld [vmem:[#allocation48_spill] sm:$0xff] }
 0x196   : > { %7021 = vst [vmem:[#allocation89_spill] sm:$0xff] %v5551_v0  ;;  %v1385_v40 = vmul.f32 %v1150_v35, %v1150_v35  ;;  %v1769_v34 = vmul.f32 %v1150_v35, %v5555_v61  ;;  %v1480_v57 = vsel %vm1478_vm11, %v1479_v17, %v1477_v16  ;;  %3958 = vrsqrt.f32 %v5548_v15 }
 0x197   : > { %3829 = vmatprep.subr.bf16.mxu0 %v3828_v59  ;;  %v5577_v8 = vadd.f32 %v1337_v52, %v5290_v43  ;;  %v5580_v36 = vadd.f32 %v1721_v46, %v4864_v22  ;;  %1951 = vmatprep.mubr.f32.mxu1 %v1480_v57  ;;  %v5588_v58 = vpop.f32.mrb[70].mxu1  ;;  %v5590_v9 = vpop.f32.mrb[70].mxu0  ;;  %v1484_v22 = vsel %vm1483_vm12, %v5443_v49, %v1482_v29  ;;  %v2339_v57 = vld [vmem:[%s6849_s5 + $0xe0] sm:$0xff]  ;;  %vm1492_vm15 = vcmp.eq.f32.partialorder %v5478_v18, 0.0 }
 0x198   : > { %v5583_v35 = vadd.f32 %v1385_v40, %v5126_v23  ;;  %v5586_v61 = vadd.f32 %v1769_v34, %v7024_v14  ;;  %7026 = vst [vmem:[#allocation92_spill] sm:$0xff] %v5588_v58  ;;  %7027 = vst [vmem:[#allocation93_spill] sm:$0xff] %v5590_v9  ;;  %v3955_v16 = vpop.eup %3954  ;;  %1952 = vmatmul.mubr.f32.gmra.mrb[90].mxu1 %v353_v25  ;;  %v963_v17 = vpop.f32.mrb[71].mxu1  ;;  %v1486_v23 = vand.u32 2147483648, %v5443_v49  ;;  %v354_v34 = vld [vmem:[%s5368_s12 + $0x30] sm:$0xff]  ;;  %v2336_v25 = vld [vmem:[%s6849_s5 + $0xc8] sm:$0xff] }
 0x199   : > { %v1156_v43 = vpop.f32.mrb[71].mxu0  ;;  %v3830_v14 = vpack.c.bf16 %v2332_v27, %v2329_v11  ;;  %v1338_v59 = vmul.f32 %v963_v17, %v963_v17  ;;  %v1722_v52 = vmul.f32 %v963_v17, %v5588_v58  ;;  %v1489_v11 = vmul.f32 %v3955_v16, %v5478_v18  ;;  %v7028_v17 = vld [vmem:[#allocation13_spill] sm:$0xff]  ;;  %v7029_v58 = vld [vmem:[#allocation51_spill] sm:$0xff] }
 0x19a   : > { %7025 = vst [vmem:[#allocation48_spill] sm:$0xff] %v5586_v61  ;;  %v1386_v46 = vmul.f32 %v1156_v43, %v1156_v43  ;;  %v1770_v40 = vmul.f32 %v1156_v43, %v5590_v9  ;;  %v1487_v29 = vsel %vm1485_vm13, %v1486_v23, %v1484_v22  ;;  %3960 = vrsqrt.f32 %v5583_v35  ;;  %v7030_v61 = vld [vmem:[#allocation52_spill] sm:$0xff] }
 0x19b   : > { %3831 = vmatpush1.bf16.msra.mxu0 %v3830_v14  ;;  %v5612_v27 = vadd.f32 %v1338_v59, %v5310_v20  ;;  %v5615_v43 = vadd.f32 %v1722_v52, %v7028_v17  ;;  %1956 = vmatprep.mubr.f32.mxu1 %v1487_v29  ;;  %v5623_v49 = vpop.f32.mrb[72].mxu1  ;;  %v5625_v16 = vpop.f32.mrb[72].mxu0  ;;  %v1491_v14 = vsel %vm1490_vm14, %v5478_v18, %v1489_v11  ;;  %vm1497_vm0 = vcmp.eq.f32.partialorder %v5513_v51, inf  ;;  %v355_v29 = vld [vmem:[%s5368_s12 + $0x38] sm:$0xff] }
 0x19c   : > { %v5618_v9 = vadd.f32 %v1386_v46, %v7029_v58  ;;  %v5621_v56 = vadd.f32 %v1770_v40, %v7030_v61  ;;  %7032 = vst [vmem:[#allocation51_spill] sm:$0xff] %v5623_v49  ;;  %7033 = vst [vmem:[#allocation52_spill] sm:$0xff] %v5625_v16  ;;  %v3957_v22 = vpop.eup %3956  ;;  %1957 = vmatmul.mubr.f32.gmra.mrb[92].mxu1 %v354_v34  ;;  %v969_v23 = vpop.f32.mrb[73].mxu1  ;;  %v1493_v58 = vand.u32 2147483648, %v5478_v18  ;;  %v2335_v34 = vld [vmem:[%s6849_s5 + $0xc0] sm:$0xff]  ;;  %v2338_v11 = vld [vmem:[%s6849_s5 + $0xd8] sm:$0xff] }
 0x19d   : > { %v1162_v20 = vpop.f32.mrb[73].mxu0  ;;  %v3832_v61 = vpack.c.bf16 %v2339_v57, %v2336_v25  ;;  %v1339_v59 = vmul.f32 %v969_v23, %v969_v23  ;;  %v1723_v52 = vmul.f32 %v969_v23, %v5623_v49  ;;  %v1496_v25 = vmul.f32 %v3957_v22, %v5513_v51  ;;  %v7034_v23 = vld [vmem:[#allocation16_spill] sm:$0xff]  ;;  %v7035_v49 = vld [vmem:[#allocation55_spill] sm:$0xff] }
 0x19e   : > { %7031 = vst [vmem:[#allocation13_spill] sm:$0xff] %v5621_v56  ;;  %v1387_v46 = vmul.f32 %v1162_v20, %v1162_v20  ;;  %v1771_v40 = vmul.f32 %v1162_v20, %v5625_v16  ;;  %v1494_v17 = vsel %vm1492_vm15, %v1493_v58, %v1491_v14  ;;  %vm1499_vm1 = vcmp.eq.f32.partialorder %v5513_v51, 0.0  ;;  %v7036_v56 = vld [vmem:[#allocation56_spill] sm:$0xff] }
 0x19f   : > { %3962 = vrsqrt.f32 %v5618_v9  ;;  %3833 = vmatprep.subr.bf16.mxu0 %v3832_v61  ;;  %v5647_v57 = vadd.f32 %v1339_v59, %v5318_v5  ;;  %v5650_v20 = vadd.f32 %v1723_v52, %v7034_v23  ;;  %1961 = vmatprep.mubr.f32.mxu1 %v1494_v17  ;;  %v5658_v18 = vpop.f32.mrb[74].mxu1  ;;  %v5660_v22 = vpop.f32.mrb[74].mxu0  ;;  %v1498_v61 = vsel %vm1497_vm0, %v5513_v51, %v1496_v25  ;;  %v356_v17 = vld [vmem:[%s5368_s12 + $0x40] sm:$0xff]  ;;  %v2316_v25 = vld [vmem:[%s6849_s5 + $0x28] sm:$0xff] }
 0x1a0   : > { %v5653_v16 = vadd.f32 %v1387_v46, %v7035_v49  ;;  %v5656_v0 = vadd.f32 %v1771_v40, %v7036_v56  ;;  %7038 = vst [vmem:[#allocation55_spill] sm:$0xff] %v5658_v18  ;;  %7039 = vst [vmem:[#allocation56_spill] sm:$0xff] %v5660_v22  ;;  %v3959_v14 = vpop.eup %3958  ;;  %1962 = vmatmul.mubr.f32.gmra.mrb[94].mxu1 %v355_v29  ;;  %v975_v58 = vpop.f32.mrb[75].mxu1  ;;  %v1500_v49 = vand.u32 2147483648, %v5513_v51  ;;  %vm1504_vm2 = vcmp.eq.f32.partialorder %v5548_v15, inf  ;;  %v2313_v29 = vld [vmem:[%s6849_s5 + $0x10] sm:$0xff] }
 0x1a1   : > { %v1168_v5 = vpop.f32.mrb[75].mxu0  ;;  %v3834_v56 = vpack.c.bf16 %v2338_v11, %v2335_v34  ;;  %v1340_v59 = vmul.f32 %v975_v58, %v975_v58  ;;  %v1724_v52 = vmul.f32 %v975_v58, %v5658_v18  ;;  %v1503_v34 = vmul.f32 %v3959_v14, %v5548_v15  ;;  %v7040_v58 = vld [vmem:[#allocation19_spill] sm:$0xff] }
 0x1a2   : > { %7037 = vst [vmem:[#allocation16_spill] sm:$0xff] %v5656_v0  ;;  %v1388_v46 = vmul.f32 %v1168_v5, %v1168_v5  ;;  %v1772_v40 = vmul.f32 %v1168_v5, %v5660_v22  ;;  %v1501_v23 = vsel %vm1499_vm1, %v1500_v49, %v1498_v61  ;;  %vm1506_vm3 = vcmp.eq.f32.partialorder %v5548_v15, 0.0  ;;  %v7041_v18 = vld [vmem:[#allocation59_spill] sm:$0xff]  ;;  %v7042_v0 = vld [vmem:[#allocation60_spill] sm:$0xff] }
 0x1a3   : > { %3964 = vrsqrt.f32 %v5653_v16  ;;  %3835 = vmatpush1.bf16.msra.mxu0 %v3834_v56  ;;  %v5682_v11 = vadd.f32 %v1340_v59, %v5322_v26  ;;  %v5685_v5 = vadd.f32 %v1724_v52, %v7040_v58  ;;  %1966 = vmatprep.mubr.f32.mxu1 %v1501_v23  ;;  %v5693_v51 = vpop.f32.mrb[76].mxu1  ;;  %v5695_v14 = vpop.f32.mrb[76].mxu0  ;;  %v1505_v56 = vsel %vm1504_vm2, %v5548_v15, %v1503_v34  ;;  %v357_v23 = vld [vmem:[%s5368_s12 + $0x48] sm:$0xff]  ;;  %v2345_v34 = vld [vmem:[%s6849_s5 + $0x110] sm:$0xff] }
 0x1a4   : > { %v5688_v22 = vadd.f32 %v1388_v46, %v7041_v18  ;;  %v5691_v1 = vadd.f32 %v1772_v40, %v7042_v0  ;;  %7044 = vst [vmem:[#allocation59_spill] sm:$0xff] %v5693_v51  ;;  %7045 = vst [vmem:[#allocation60_spill] sm:$0xff] %v5695_v14  ;;  %v3961_v61 = vpop.eup %3960  ;;  %1967 = vmatmul.mubr.f32.gmra.mrb[96].mxu1 %v356_v17  ;;  %v981_v49 = vpop.f32.mrb[77].mxu1  ;;  %v1507_v18 = vand.u32 2147483648, %v5548_v15  ;;  %vm1511_vm4 = vcmp.eq.f32.partialorder %v5583_v35, inf  ;;  %v2342_v17 = vld [vmem:[%s6849_s5 + $0xf8] sm:$0xff] }
 0x1a5   : > { %v1174_v26 = vpop.f32.mrb[77].mxu0  ;;  %v3848_v0 = vpack.c.bf16 %v2316_v25, %v2313_v29  ;;  %v1341_v59 = vmul.f32 %v981_v49, %v981_v49  ;;  %v1725_v52 = vmul.f32 %v981_v49, %v5693_v51  ;;  %v1510_v29 = vmul.f32 %v3961_v61, %v5583_v35  ;;  %v7046_v49 = vld [vmem:[#allocation22_spill] sm:$0xff]  ;;  %v7047_v51 = vld [vmem:[#allocation63_spill] sm:$0xff] }
 0x1a6   : > { %7043 = vst [vmem:[#allocation19_spill] sm:$0xff] %v5691_v1  ;;  %v1389_v46 = vmul.f32 %v1174_v26, %v1174_v26  ;;  %v1773_v40 = vmul.f32 %v1174_v26, %v5695_v14  ;;  %v1508_v58 = vsel %vm1506_vm3, %v1507_v18, %v1505_v56  ;;  %vm1513_vm5 = vcmp.eq.f32.partialorder %v5583_v35, 0.0  ;;  %v7048_v1 = vld [vmem:[#allocation64_spill] sm:$0xff] }
 0x1a7   : > { %3966 = vrsqrt.f32 %v5688_v22  ;;  %3849 = vmatprep.subr.bf16.mxu1 %v3848_v0  ;;  %v5717_v25 = vadd.f32 %v1341_v59, %v5326_v53  ;;  %v5720_v26 = vadd.f32 %v1725_v52, %v7046_v49  ;;  %1971 = vmatprep.mubr.f32.mxu1 %v1508_v58  ;;  %v5728_v15 = vpop.f32.mrb[78].mxu1  ;;  %v5730_v61 = vpop.f32.mrb[78].mxu0  ;;  %v1512_v59 = vsel %vm1511_vm4, %v5583_v35, %v1510_v29  ;;  %v358_v49 = vld [vmem:[%s5368_s12 + $0x50] sm:$0xff]  ;;  %v2344_v29 = vld [vmem:[%s6849_s5 + $0x108] sm:$0xff] }
 0x1a8   : > { %v5723_v14 = vadd.f32 %v1389_v46, %v7047_v51  ;;  %v5726_v55 = vadd.f32 %v1773_v40, %v7048_v1  ;;  %7050 = vst [vmem:[#allocation63_spill] sm:$0xff] %v5728_v15  ;;  %7051 = vst [vmem:[#allocation64_spill] sm:$0xff] %v5730_v61  ;;  %1972 = vmatmul.mubr.f32.gmra.mrb[98].mxu1 %v357_v23  ;;  %v987_v18 = vpop.f32.mrb[79].mxu1  ;;  %v1180_v53 = vpop.f32.mrb[79].mxu0  ;;  %v1514_v51 = vand.u32 2147483648, %v5583_v35  ;;  %vm1518_vm6 = vcmp.eq.f32.partialorder %v5618_v9, inf }
 0x1a9   : > { %v3963_v56 = vpop.eup %3962  ;;  %v3836_v1 = vpack.c.bf16 %v2345_v34, %v2342_v17  ;;  %v1342_v52 = vmul.f32 %v987_v18, %v987_v18  ;;  %v1726_v46 = vmul.f32 %v987_v18, %v5728_v15  ;;  %v1390_v40 = vmul.f32 %v1180_v53, %v1180_v53  ;;  %3851 = vmatpush3.bf16.msra.mxu1 %v3848_v0  ;;  %v2341_v23 = vld [vmem:[%s6849_s5 + $0xf0] sm:$0xff]  ;;  %v7052_v18 = vld [vmem:[#allocation25_spill] sm:$0xff] }
 0x1aa   : > { %7049 = vst [vmem:[#allocation22_spill] sm:$0xff] %v5726_v55  ;;  %v1774_v58 = vmul.f32 %v1180_v53, %v5730_v61  ;;  %v1515_v55 = vsel %vm1513_vm5, %v1514_v51, %v1512_v59  ;;  %v1517_v17 = vmul.f32 %v3963_v56, %v5618_v9  ;;  %v1521_v34 = vand.u32 2147483648, %v5618_v9 }
 0x1ab   : > { %3968 = vrsqrt.f32 %v5723_v14  ;;  %3837 = vmatprep.subr.bf16.mxu0 %v3836_v1  ;;  %v5752_v0 = vadd.f32 %v1342_v52, %v5347_v37  ;;  %v5755_v53 = vadd.f32 %v1726_v46, %v7052_v18  ;;  %v5758_v15 = vadd.f32 %v1390_v40, %v5216_v2  ;;  %1976 = vmatprep.mubr.f32.mxu1 %v1515_v55  ;;  %v5763_v56 = vpop.f32.mrb[80].mxu0  ;;  %v2319_v2 = vld [vmem:[%s6849_s5 + $0x40] sm:$0xff]  ;;  %v359_v40 = vld [vmem:[%s5368_s12 + $0x58] sm:$0xff] }
 0x1ac   : > { %v5761_v35 = vadd.f32 %v1774_v58, %v5219_v6  ;;  %7054 = vst [vmem:[#allocation94_spill] sm:$0xff] %v5763_v56  ;;  %1977 = vmatmul.mubr.f32.gmra.mrb[100].mxu1 %v358_v49  ;;  %v1186_v51 = vpop.f32.mrb[81].mxu0  ;;  %v1519_v37 = vsel %vm1518_vm6, %v5618_v9, %v1517_v17  ;;  %vm1520_vm7 = vcmp.eq.f32.partialorder %v5618_v9, 0.0  ;;  %v3838_v1 = vpack.c.bf16 %v2344_v29, %v2341_v23  ;;  %v2322_v6 = vld [vmem:[%s6849_s5 + $0x58] sm:$0xff]  ;;  %v2348_v9 = vld [vmem:[%s6849_s5 + $0x128] sm:$0xff]  ;;  %v2351_v49 = vld [vmem:[%s6849_s5 + $0x140] sm:$0xff] }
 0x1ad   : > { %v3965_v59 = vpop.eup %3964  ;;  %v1391_v55 = vmul.f32 %v1186_v51, %v1186_v51  ;;  %v1775_v52 = vmul.f32 %v1186_v51, %v5763_v56  ;;  %v1522_v46 = vsel %vm1520_vm7, %v1521_v34, %v1519_v37  ;;  %vm1525_vm8 = vcmp.eq.f32.partialorder %v5653_v16, inf }
 0x1ae   : > { %7053 = vst [vmem:[#allocation25_spill] sm:$0xff] %v5761_v35  ;;  %v1524_v58 = vmul.f32 %v3965_v59, %v5653_v16  ;;  %1981 = vmatprep.mubr.f32.mxu1 %v1522_v46  ;;  %vm1527_vm9 = vcmp.eq.f32.partialorder %v5653_v16, 0.0  ;;  %v1528_v23 = vand.u32 2147483648, %v5653_v16  ;;  %3970 = vrsqrt.f32 %v5758_v15  ;;  %3839 = vmatpush1.bf16.msra.mxu0 %v3838_v1  ;;  %v360_v1 = vld [vmem:[%s5368_s12 + $0x60] sm:$0xff] }
 0x1af   : > { %v5789_v29 = vadd.f32 %v1391_v55, %v5229_v30  ;;  %v5792_v17 = vadd.f32 %v1775_v52, %v5232_v3  ;;  %v5794_v34 = vpop.f32.mrb[82].mxu0  ;;  %v3852_v59 = vpack.c.bf16 %v2322_v6, %v2319_v2  ;;  %v3840_v56 = vpack.c.bf16 %v2351_v49, %v2348_v9 }
 0x1b0   : > { %v1526_v18 = vsel %vm1525_vm8, %v5653_v16, %v1524_v58  ;;  %1982 = vmatmul.mubr.f32.gmra.mrb[102].mxu1 %v359_v40  ;;  %v1192_v37 = vpop.f32.mrb[83].mxu0  ;;  %vm1532_vm10 = vcmp.eq.f32.partialorder %v5688_v22, inf  ;;  %v1535_v3 = vand.u32 2147483648, %v5688_v22  ;;  %vm1534_vm11 = vcmp.eq.f32.partialorder %v5688_v22, 0.0 }
 0x1b1   : > { %v3967_v51 = vpop.eup %3966  ;;  %v1529_v46 = vsel %vm1527_vm9, %v1528_v23, %v1526_v18  ;;  %v1392_v35 = vmul.f32 %v1192_v37, %v1192_v37  ;;  %v1776_v61 = vmul.f32 %v1192_v37, %v5794_v34  ;;  %3972 = vrsqrt.f32 %v5789_v29  ;;  %3853 = vmatprep.subr.bf16.mxu1 %v3852_v59  ;;  %3841 = vmatprep.subr.bf16.mxu0 %v3840_v56  ;;  %v361_v56 = vld [vmem:[%s5368_s12 + $0x68] sm:$0xff] }
 0x1b2   : > { %1986 = vmatprep.mubr.f32.mxu1 %v1529_v46  ;;  %v1531_v30 = vmul.f32 %v3967_v51, %v5688_v22  ;;  %3855 = vmatpush3.bf16.msra.mxu1 %v3852_v59  ;;  %vm1539_vm12 = vcmp.eq.f32.partialorder %v5723_v14, inf  ;;  %vm1541_vm13 = vcmp.eq.f32.partialorder %v5723_v14, 0.0  ;;  %vm1546_vm14 = vcmp.eq.f32.partialorder %v5758_v15, inf }
 0x1b3   : > { %v5804_v16 = vadd.f32 %v1392_v35, %v5249_v62  ;;  %v5807_v2 = vadd.f32 %v1776_v61, %v5252_v63  ;;  %v5809_v6 = vpop.f32.mrb[84].mxu0  ;;  %v1542_v63 = vand.u32 2147483648, %v5723_v14  ;;  %vm1548_vm15 = vcmp.eq.f32.partialorder %v5758_v15, 0.0 }
 0x1b4   : > { %v1533_v55 = vsel %vm1532_vm10, %v5688_v22, %v1531_v30  ;;  %1987 = vmatmul.mubr.f32.gmra.mrb[104].mxu1 %v360_v1  ;;  %v1198_v40 = vpop.f32.mrb[85].mxu0  ;;  %v362_v1 = vld [vmem:[%s5368_s12 + $0x70] sm:$0xff]  ;;  %vm1553_vm0 = vcmp.eq.f32.partialorder %v5789_v29, inf  ;;  %vm1555_vm1 = vcmp.eq.f32.partialorder %v5789_v29, 0.0 }
 0x1b5   : > { %v3969_v52 = vpop.eup %3968  ;;  %v1536_v58 = vsel %vm1534_vm11, %v1535_v3, %v1533_v55  ;;  %v1393_v9 = vmul.f32 %v1198_v40, %v1198_v40  ;;  %v1777_v49 = vmul.f32 %v1198_v40, %v5809_v6  ;;  %3974 = vrsqrt.f32 %v5804_v16 }
 0x1b6   : > { %1991 = vmatprep.mubr.f32.mxu1 %v1536_v58  ;;  %v1538_v62 = vmul.f32 %v3969_v52, %v5723_v14  ;;  %vm1560_vm2 = vcmp.eq.f32.partialorder %v5804_v16, inf  ;;  %vm1562_vm3 = vcmp.eq.f32.partialorder %v5804_v16, 0.0 }
 0x1b7   : > { %v5820_v22 = vadd.f32 %v1393_v9, %v5293_v47  ;;  %v5823_v61 = vadd.f32 %v1777_v49, %v5296_v31  ;;  %v5825_v35 = vpop.f32.mrb[86].mxu0  ;;  %v1549_v31 = vand.u32 2147483648, %v5758_v15 }
 0x1b8   : > { %v1540_v23 = vsel %vm1539_vm12, %v5723_v14, %v1538_v62  ;;  %v3971_v18 = vpop.eup %3970  ;;  %1992 = vmatmul.mubr.f32.gmra.mrb[106].mxu1 %v361_v56  ;;  %v1204_v59 = vpop.f32.mrb[87].mxu0  ;;  %v363_v56 = vld [vmem:[%s5368_s12 + $0x78] sm:$0xff] }
 0x1b9   : > { %v1543_v51 = vsel %vm1541_vm13, %v1542_v63, %v1540_v23  ;;  %v1394_v37 = vmul.f32 %v1204_v59, %v1204_v59  ;;  %v1778_v46 = vmul.f32 %v1204_v59, %v5825_v35  ;;  %v1545_v47 = vmul.f32 %v3971_v18, %v5758_v15 }
 0x1ba   : > { %1996 = vmatprep.mubr.f32.mxu1 %v1543_v51  ;;  %3976 = vrsqrt.f32 %v5820_v22  ;;  %vm1567_vm4 = vcmp.eq.f32.partialorder %v5820_v22, inf  ;;  %vm1569_vm5 = vcmp.eq.f32.partialorder %v5820_v22, 0.0 }
 0x1bb   : > { %v3973_v30 = vpop.eup %3972  ;;  %v5836_v14 = vadd.f32 %v1394_v37, %v5329_v32  ;;  %v5839_v3 = vadd.f32 %v1778_v46, %v5332_v21  ;;  %v5841_v55 = vpop.f32.mrb[88].mxu0  ;;  %v1547_v52 = vsel %vm1546_vm14, %v5758_v15, %v1545_v47  ;;  %v1556_v21 = vand.u32 2147483648, %v5789_v29 }
 0x1bc   : > { %1997 = vmatmul.mubr.f32.gmra.mrb[108].mxu1 %v362_v1  ;;  %v1210_v40 = vpop.f32.mrb[89].mxu0  ;;  %v1550_v58 = vsel %vm1548_vm15, %v1549_v31, %v1547_v52  ;;  %v1552_v9 = vmul.f32 %v3973_v30, %v5789_v29 }
 0x1bd   : > { %v1395_v49 = vmul.f32 %v1210_v40, %v1210_v40  ;;  %v1779_v32 = vmul.f32 %v1210_v40, %v5841_v55  ;;  %2001 = vmatprep.mubr.f32.mxu1 %v1550_v58  ;;  %3978 = vrsqrt.f32 %v5836_v14  ;;  %vm1574_vm6 = vcmp.eq.f32.partialorder %v5836_v14, inf }
 0x1be   : > { %v1554_v62 = vsel %vm1553_vm0, %v5789_v29, %v1552_v9  ;;  %v364_v29 = vld [vmem:[%s5368_s12 + $0x80] sm:$0xff]  ;;  %vm1576_vm7 = vcmp.eq.f32.partialorder %v5836_v14, 0.0 }
 0x1bf   : > { %v3975_v15 = vpop.eup %3974  ;;  %v5854_v63 = vadd.f32 %v1395_v49, %v5371_v12  ;;  %v5857_v23 = vadd.f32 %v1779_v32, %v5374_v19  ;;  %v5859_v18 = vpop.f32.mrb[90].mxu0  ;;  %v1557_v59 = vsel %vm1555_vm1, %v1556_v21, %v1554_v62  ;;  %v1563_v12 = vand.u32 2147483648, %v5804_v16 }
 0x1c0   : > { %2002 = vmatmul.mubr.f32.gmra.mrb[110].mxu1 %v363_v56  ;;  %v1216_v51 = vpop.f32.mrb[91].mxu0  ;;  %v1559_v37 = vmul.f32 %v3975_v15, %v5804_v16 }
 0x1c1   : > { %v1396_v46 = vmul.f32 %v1216_v51, %v1216_v51  ;;  %v1780_v1 = vmul.f32 %v1216_v51, %v5859_v18  ;;  %2006 = vmatprep.mubr.f32.mxu1 %v1557_v59  ;;  %3980 = vrsqrt.f32 %v5854_v63  ;;  %vm1581_vm8 = vcmp.eq.f32.partialorder %v5854_v63, inf }
 0x1c2   : > { %v1561_v19 = vsel %vm1560_vm2, %v5804_v16, %v1559_v37  ;;  %v365_v16 = vld [vmem:[%s5368_s12 + $0x88] sm:$0xff]  ;;  %vm1583_vm9 = vcmp.eq.f32.partialorder %v5854_v63, 0.0 }
 0x1c3   : > { %v5870_v31 = vadd.f32 %v1396_v46, %v5402_v38  ;;  %v5873_v30 = vadd.f32 %v1780_v1, %v5405_v39  ;;  %v5875_v52 = vpop.f32.mrb[92].mxu0  ;;  %v1564_v40 = vsel %vm1562_vm3, %v1563_v12, %v1561_v19  ;;  %v1570_v38 = vand.u32 2147483648, %v5820_v22 }
 0x1c4   : > { %v3977_v47 = vpop.eup %3976  ;;  %2007 = vmatmul.mubr.f32.gmra.mrb[112].mxu1 %v364_v29  ;;  %v1222_v58 = vpop.f32.mrb[93].mxu0 }
 0x1c5   : > { %v1566_v9 = vmul.f32 %v3977_v47, %v5820_v22  ;;  %v1397_v49 = vmul.f32 %v1222_v58, %v1222_v58  ;;  %v1781_v32 = vmul.f32 %v1222_v58, %v5875_v52  ;;  %2011 = vmatprep.mubr.f32.mxu1 %v1564_v40  ;;  %3982 = vrsqrt.f32 %v5870_v31 }
 0x1c6   : > { %vm1588_vm10 = vcmp.eq.f32.partialorder %v5870_v31, inf  ;;  %vm1590_vm11 = vcmp.eq.f32.partialorder %v5870_v31, 0.0 }
 0x1c7   : > { %v1568_v39 = vsel %vm1567_vm4, %v5820_v22, %v1566_v9  ;;  %v3979_v56 = vpop.eup %3978  ;;  %v5886_v21 = vadd.f32 %v1397_v49, %v5437_v45  ;;  %v5889_v62 = vadd.f32 %v1781_v32, %v5440_v41  ;;  %v5891_v15 = vpop.f32.mrb[94].mxu0  ;;  %v366_v22 = vld [vmem:[%s5368_s12 + $0x90] sm:$0xff]  ;;  %v1577_v45 = vand.u32 2147483648, %v5836_v14 }
 0x1c8   : > { %v1571_v59 = vsel %vm1569_vm5, %v1570_v38, %v1568_v39  ;;  %2012 = vmatmul.mubr.f32.gmra.mrb[114].mxu1 %v365_v16  ;;  %v1228_v51 = vpop.f32.mrb[95].mxu0  ;;  %v1573_v37 = vmul.f32 %v3979_v56, %v5836_v14 }
 0x1c9   : > { %v1398_v46 = vmul.f32 %v1228_v51, %v1228_v51  ;;  %v1782_v1 = vmul.f32 %v1228_v51, %v5891_v15  ;;  %2016 = vmatprep.mubr.f32.mxu1 %v1571_v59  ;;  %3984 = vrsqrt.f32 %v5886_v21  ;;  %vm1595_vm12 = vcmp.eq.f32.partialorder %v5886_v21, inf }
 0x1ca   : > { %v1575_v41 = vsel %vm1574_vm6, %v5836_v14, %v1573_v37  ;;  %v367_v14 = vld [vmem:[%s5368_s12 + $0x98] sm:$0xff]  ;;  %vm1597_vm13 = vcmp.eq.f32.partialorder %v5886_v21, 0.0 }
 0x1cb   : > { %v3981_v29 = vpop.eup %3980  ;;  %v5902_v12 = vadd.f32 %v1398_v46, %v5472_v10  ;;  %v5905_v19 = vadd.f32 %v1782_v1, %v5475_v24  ;;  %v5907_v47 = vpop.f32.mrb[96].mxu0  ;;  %v1578_v40 = vsel %vm1576_vm7, %v1577_v45, %v1575_v41  ;;  %v1584_v10 = vand.u32 2147483648, %v5854_v63 }
 0x1cc   : > { %2017 = vmatmul.mubr.f32.gmra.mrb[116].mxu1 %v366_v22  ;;  %v1234_v58 = vpop.f32.mrb[97].mxu0  ;;  %v1580_v9 = vmul.f32 %v3981_v29, %v5854_v63 }
 0x1cd   : > { %v1399_v49 = vmul.f32 %v1234_v58, %v1234_v58  ;;  %v1783_v32 = vmul.f32 %v1234_v58, %v5907_v47  ;;  %2021 = vmatprep.mubr.f32.mxu1 %v1578_v40  ;;  %3986 = vrsqrt.f32 %v5902_v12  ;;  %vm1602_vm14 = vcmp.eq.f32.partialorder %v5902_v12, inf }
 0x1ce   : > { %v1582_v24 = vsel %vm1581_vm8, %v5854_v63, %v1580_v9  ;;  %v368_v63 = vld [vmem:[%s5368_s12 + $0xa0] sm:$0xff]  ;;  %vm1604_vm15 = vcmp.eq.f32.partialorder %v5902_v12, 0.0 }
 0x1cf   : > { %v3983_v16 = vpop.eup %3982  ;;  %v5918_v38 = vadd.f32 %v1399_v49, %v5507_v42  ;;  %v5921_v39 = vadd.f32 %v1783_v32, %v5510_v54  ;;  %v5923_v56 = vpop.f32.mrb[98].mxu0  ;;  %v1585_v59 = vsel %vm1583_vm9, %v1584_v10, %v1582_v24  ;;  %v1591_v42 = vand.u32 2147483648, %v5870_v31 }
 0x1d0   : > { %2022 = vmatmul.mubr.f32.gmra.mrb[118].mxu1 %v367_v14  ;;  %v1240_v51 = vpop.f32.mrb[99].mxu0  ;;  %v1587_v37 = vmul.f32 %v3983_v16, %v5870_v31 }
 0x1d1   : > { %v1400_v46 = vmul.f32 %v1240_v51, %v1240_v51  ;;  %v1784_v1 = vmul.f32 %v1240_v51, %v5923_v56  ;;  %2026 = vmatprep.mubr.f32.mxu1 %v1585_v59  ;;  %3988 = vrsqrt.f32 %v5918_v38  ;;  %vm1609_vm0 = vcmp.eq.f32.partialorder %v5918_v38, inf }
 0x1d2   : > { %v1589_v54 = vsel %vm1588_vm10, %v5870_v31, %v1587_v37  ;;  %v369_v31 = vld [vmem:[%s5368_s12 + $0xa8] sm:$0xff]  ;;  %vm1611_vm1 = vcmp.eq.f32.partialorder %v5918_v38, 0.0 }
 0x1d3   : > { %v3985_v22 = vpop.eup %3984  ;;  %v5934_v45 = vadd.f32 %v1400_v46, %v5542_v7  ;;  %v5937_v41 = vadd.f32 %v1784_v1, %v5545_v48  ;;  %v5939_v29 = vpop.f32.mrb[100].mxu0  ;;  %v1592_v40 = vsel %vm1590_vm11, %v1591_v42, %v1589_v54  ;;  %v1598_v7 = vand.u32 2147483648, %v5886_v21 }
 0x1d4   : > { %2027 = vmatmul.mubr.f32.gmra.mrb[120].mxu1 %v368_v63  ;;  %v1246_v58 = vpop.f32.mrb[101].mxu0  ;;  %v1594_v9 = vmul.f32 %v3985_v22, %v5886_v21 }
 0x1d5   : > { %v1401_v49 = vmul.f32 %v1246_v58, %v1246_v58  ;;  %v1785_v32 = vmul.f32 %v1246_v58, %v5939_v29  ;;  %2031 = vmatprep.mubr.f32.mxu1 %v1592_v40  ;;  %3990 = vrsqrt.f32 %v5934_v45  ;;  %vm1616_vm2 = vcmp.eq.f32.partialorder %v5934_v45, inf }
 0x1d6   : > { %v1596_v48 = vsel %vm1595_vm12, %v5886_v21, %v1594_v9  ;;  %v370_v21 = vld [vmem:[%s5368_s12 + $0xb0] sm:$0xff]  ;;  %vm1618_vm3 = vcmp.eq.f32.partialorder %v5934_v45, 0.0 }
 0x1d7   : > { %v3987_v14 = vpop.eup %3986  ;;  %v5950_v10 = vadd.f32 %v1401_v49, %v5577_v8  ;;  %v5953_v24 = vadd.f32 %v1785_v32, %v5580_v36  ;;  %v5955_v16 = vpop.f32.mrb[102].mxu0  ;;  %v1599_v59 = vsel %vm1597_vm13, %v1598_v7, %v1596_v48  ;;  %v1605_v8 = vand.u32 2147483648, %v5902_v12 }
 0x1d8   : > { %2032 = vmatmul.mubr.f32.gmra.mrb[122].mxu1 %v369_v31  ;;  %v1252_v51 = vpop.f32.mrb[103].mxu0  ;;  %v1601_v37 = vmul.f32 %v3987_v14, %v5902_v12 }
 0x1d9   : > { %v1402_v46 = vmul.f32 %v1252_v51, %v1252_v51  ;;  %v1786_v1 = vmul.f32 %v1252_v51, %v5955_v16  ;;  %2036 = vmatprep.mubr.f32.mxu1 %v1599_v59  ;;  %3992 = vrsqrt.f32 %v5950_v10  ;;  %v2325_v51 = vld [vmem:[%s6849_s5 + $0x70] sm:$0xff]  ;;  %vm1623_vm4 = vcmp.eq.f32.partialorder %v5950_v10, inf }
 0x1da   : > { %v1603_v36 = vsel %vm1602_vm14, %v5902_v12, %v1601_v37  ;;  %v371_v12 = vld [vmem:[%s5368_s12 + $0xb8] sm:$0xff]  ;;  %v2328_v37 = vld [vmem:[%s6849_s5 + $0x88] sm:$0xff]  ;;  %vm1625_vm5 = vcmp.eq.f32.partialorder %v5950_v10, 0.0 }
 0x1db   : > { %v3989_v63 = vpop.eup %3988  ;;  %v5966_v42 = vadd.f32 %v1402_v46, %v5612_v27  ;;  %v5969_v54 = vadd.f32 %v1786_v1, %v5615_v43  ;;  %v5971_v22 = vpop.f32.mrb[104].mxu0  ;;  %v1606_v40 = vsel %vm1604_vm15, %v1605_v8, %v1603_v36  ;;  %v1612_v27 = vand.u32 2147483648, %v5918_v38 }
 0x1dc   : > { %2037 = vmatmul.mubr.f32.gmra.mrb[124].mxu1 %v370_v21  ;;  %v1258_v58 = vpop.f32.mrb[105].mxu0  ;;  %v1608_v9 = vmul.f32 %v3989_v63, %v5918_v38  ;;  %v372_v21 = vld [vmem:[%s5368_s12 + $0xc0] sm:$0xff]  ;;  %v1619_v8 = vand.u32 2147483648, %v5934_v45 }
 0x1dd   : > { %v1403_v49 = vmul.f32 %v1258_v58, %v1258_v58  ;;  %v1787_v32 = vmul.f32 %v1258_v58, %v5971_v22  ;;  %2041 = vmatprep.mubr.f32.mxu1 %v1606_v40  ;;  %3994 = vrsqrt.f32 %v5966_v42  ;;  %vm1630_vm6 = vcmp.eq.f32.partialorder %v5966_v42, inf }
 0x1de   : > { %v1610_v43 = vsel %vm1609_vm0, %v5918_v38, %v1608_v9  ;;  %vm1632_vm7 = vcmp.eq.f32.partialorder %v5966_v42, 0.0 }
 0x1df   : > { %v3991_v31 = vpop.eup %3990  ;;  %v5982_v7 = vadd.f32 %v1403_v49, %v5647_v57  ;;  %v5985_v48 = vadd.f32 %v1787_v32, %v5650_v20  ;;  %v5987_v14 = vpop.f32.mrb[106].mxu0  ;;  %v1613_v59 = vsel %vm1611_vm1, %v1612_v27, %v1610_v43  ;;  %v3856_v57 = vpack.c.bf16 %v2328_v37, %v2325_v51  ;;  %v2331_v32 = vld [vmem:[%s6849_s5 + $0xa0] sm:$0xff] }
 0x1e0   : > { %2042 = vmatmul.mubr.f32.gmra.mrb[126].mxu1 %v371_v12  ;;  %v1264_v38 = vpop.f32.mrb[107].mxu0  ;;  %v1615_v46 = vmul.f32 %v3991_v31, %v5934_v45  ;;  %v373_v31 = vld [vmem:[%s5368_s12 + $0xc8] sm:$0xff] }
 0x1e1   : > { %v1404_v20 = vmul.f32 %v1264_v38, %v1264_v38  ;;  %v1788_v1 = vmul.f32 %v1264_v38, %v5987_v14  ;;  %2046 = vmatprep.mubr.f32.mxu1 %v1613_v59  ;;  %3996 = vrsqrt.f32 %v5982_v7  ;;  %3857 = vmatprep.subr.bf16.mxu1 %v3856_v57  ;;  %v1626_v59 = vand.u32 2147483648, %v5950_v10 }
 0x1e2   : > { %v1617_v36 = vsel %vm1616_vm2, %v5934_v45, %v1615_v46  ;;  %3859 = vmatpush3.bf16.msra.mxu1 %v3856_v57  ;;  %v2334_v45 = vld [vmem:[%s6849_s5 + $0xb8] sm:$0xff]  ;;  %vm1637_vm8 = vcmp.eq.f32.partialorder %v5982_v7, inf  ;;  %vm1639_vm9 = vcmp.eq.f32.partialorder %v5982_v7, 0.0 }
 0x1e3   : > { %v3993_v63 = vpop.eup %3992  ;;  %v6004_v40 = vadd.f32 %v1404_v20, %v5682_v11  ;;  %v6007_v58 = vadd.f32 %v1788_v1, %v5685_v5  ;;  %v6009_v9 = vpop.f32.mrb[108].mxu0  ;;  %v1620_v49 = vsel %vm1618_vm3, %v1619_v8, %v1617_v36  ;;  %v3860_v5 = vpack.c.bf16 %v2334_v45, %v2331_v32  ;;  %v2337_v1 = vld [vmem:[%s6849_s5 + $0xd0] sm:$0xff] }
 0x1e4   : > { %7055 = vst [vmem:[#allocation95_spill] sm:$0xff] %v6009_v9  ;;  %2047 = vmatmul.mubr.f32.gmra.mrb[128].mxu1 %v372_v21  ;;  %v1270_v12 = vpop.f32.mrb[109].mxu0  ;;  %v1622_v11 = vmul.f32 %v3993_v63, %v5950_v10  ;;  %v374_v63 = vld [vmem:[%s5368_s12 + $0xd0] sm:$0xff] }
 0x1e5   : > { %v1405_v27 = vmul.f32 %v1270_v12, %v1270_v12  ;;  %v1789_v43 = vmul.f32 %v1270_v12, %v6009_v9  ;;  %2051 = vmatprep.mubr.f32.mxu1 %v1620_v49  ;;  %3998 = vrsqrt.f32 %v6004_v40  ;;  %3861 = vmatprep.subr.bf16.mxu1 %v3860_v5  ;;  %v1633_v49 = vand.u32 2147483648, %v5966_v42 }
 0x1e6   : > { %v1624_v51 = vsel %vm1623_vm4, %v5950_v10, %v1622_v11  ;;  %3863 = vmatpush3.bf16.msra.mxu1 %v3860_v5  ;;  %v2340_v10 = vld [vmem:[%s6849_s5 + $0xe8] sm:$0xff]  ;;  %vm1644_vm10 = vcmp.eq.f32.partialorder %v6004_v40, inf  ;;  %vm1646_vm11 = vcmp.eq.f32.partialorder %v6004_v40, 0.0 }
 0x1e7   : > { %v3995_v37 = vpop.eup %3994  ;;  %v6026_v38 = vadd.f32 %v1405_v27, %v5717_v25  ;;  %v6029_v46 = vadd.f32 %v1789_v43, %v5720_v26  ;;  %v6031_v57 = vpop.f32.mrb[110].mxu0  ;;  %v1627_v20 = vsel %vm1625_vm5, %v1626_v59, %v1624_v51  ;;  %v3864_v26 = vpack.c.bf16 %v2340_v10, %v2337_v1  ;;  %v2343_v27 = vld [vmem:[%s6849_s5 + $0x100] sm:$0xff]  ;;  %v2346_v43 = vld [vmem:[%s6849_s5 + $0x118] sm:$0xff] }
 0x1e8   : > { %7057 = vst [vmem:[#allocation97_spill] sm:$0xff] %v6031_v57  ;;  %2052 = vmatmul.mubr.f32.gmra.mrb[130].mxu1 %v373_v31  ;;  %v1276_v21 = vpop.f32.mrb[111].mxu0  ;;  %v1629_v25 = vmul.f32 %v3995_v37, %v5966_v42  ;;  %v3868_v31 = vpack.c.bf16 %v2346_v43, %v2343_v27  ;;  %v375_v59 = vld [vmem:[%s5368_s12 + $0xd8] sm:$0xff]  ;;  %v1640_v51 = vand.u32 2147483648, %v5982_v7 }
 0x1e9   : > { %7056 = vst [vmem:[#allocation96_spill] sm:$0xff] %v6029_v46  ;;  %v1406_v8 = vmul.f32 %v1276_v21, %v1276_v21  ;;  %v1790_v36 = vmul.f32 %v1276_v21, %v6031_v57  ;;  %2056 = vmatprep.mubr.f32.mxu1 %v1627_v20  ;;  %4000 = vrsqrt.f32 %v6026_v38  ;;  %3865 = vmatprep.subr.bf16.mxu1 %v3864_v26  ;;  %v2354_v21 = vld [vmem:[%s6849_s5 + $0x158] sm:$0xff]  ;;  %vm1651_vm12 = vcmp.eq.f32.partialorder %v6026_v38, inf }
 0x1ea   : > { %v1631_v32 = vsel %vm1630_vm6, %v5966_v42, %v1629_v25  ;;  %3867 = vmatpush3.bf16.msra.mxu1 %v3864_v26  ;;  %v2357_v25 = vld [vmem:[%s6849_s5 + $0x170] sm:$0xff]  ;;  %vm1653_vm13 = vcmp.eq.f32.partialorder %v6026_v38, 0.0 }
 0x1eb   : > { %v3997_v45 = vpop.eup %3996  ;;  %v6048_v12 = vadd.f32 %v1406_v8, %v5752_v0  ;;  %v6051_v11 = vadd.f32 %v1790_v36, %v5755_v53  ;;  %v1634_v5 = vsel %vm1632_vm7, %v1633_v49, %v1631_v32  ;;  %v2347_v0 = vld [vmem:[%s6849_s5 + $0x120] sm:$0xff]  ;;  %v2350_v53 = vld [vmem:[%s6849_s5 + $0x138] sm:$0xff]  ;;  %3869 = vmatprep.subr.bf16.mxu1 %v3868_v31  ;;  %v2349_v26 = vld [vmem:[%s6849_s5 + $0x130] sm:$0xff]  ;;  %v3844_v8 = vpack.c.bf16 %v2357_v25, %v2354_v21 }
 0x1ec   : > { %2057 = vmatmul.mubr.f32.gmra.mrb[132].mxu1 %v374_v63  ;;  %v1636_v42 = vmul.f32 %v3997_v45, %v5982_v7  ;;  %v3842_v20 = vpack.c.bf16 %v2350_v53, %v2347_v0  ;;  %v2353_v36 = vld [vmem:[%s6849_s5 + $0x150] sm:$0xff]  ;;  %v2356_v63 = vld [vmem:[%s6849_s5 + $0x168] sm:$0xff]  ;;  %v376_v32 = vld [vmem:[%s5368_s12 + $0xe0] sm:$0xff]  ;;  %v1647_v45 = vand.u32 2147483648, %v6004_v40 }
 0x1ed   : > { %7058 = vst [vmem:[#allocation98_spill] sm:$0xff] %v6051_v11  ;;  %2061 = vmatprep.mubr.f32.mxu1 %v1634_v5  ;;  %4002 = vrsqrt.f32 %v6048_v12  ;;  %v2352_v49 = vld [vmem:[%s6849_s5 + $0x148] sm:$0xff]  ;;  %v3846_v5 = vpack.c.bf16 %v2356_v63, %v2353_v36  ;;  %v2355_v53 = vld [vmem:[%s6849_s5 + $0x160] sm:$0xff]  ;;  %v378_v25 = vld [vmem:[%s5368_s12 + $0xf0] sm:$0xff]  ;;  %vm1658_vm14 = vcmp.eq.f32.partialorder %v6048_v12, inf  ;;  %vm1660_vm15 = vcmp.eq.f32.partialorder %v6048_v12, 0.0 }
 0x1ee   : > { %v1638_v37 = vsel %vm1637_vm8, %v5982_v7, %v1636_v42  ;;  %3871 = vmatpush3.bf16.msra.mxu1 %v3868_v31  ;;  %3843 = vmatpush1.bf16.msra.mxu0 %v3842_v20  ;;  %v3872_v27 = vpack.c.bf16 %v2352_v49, %v2349_v26  ;;  %v2358_v31 = vld [vmem:[%s6849_s5 + $0x178] sm:$0xff]  ;;  %v1661_v26 = vand.u32 2147483648, %v6048_v12  ;;  %v6118_v36 = vld [vmem:[%s6848_s4] ss:$0 sm:$0xff] }
 0x1ef   : > { %v3999_v1 = vpop.eup %3998  ;;  %v1641_v10 = vsel %vm1639_vm9, %v1640_v51, %v1638_v37  ;;  %3845 = vmatprep.subr.bf16.mxu0 %v3844_v8  ;;  %v3876_v51 = vpack.c.bf16 %v2358_v31, %v2355_v53  ;;  %v1654_v37 = vand.u32 2147483648, %v6026_v38 }
 0x1f0   : > { %2062 = vmatmul.mubr.f32.gmra.mrb[134].mxu1 %v375_v59  ;;  %v1643_v7 = vmul.f32 %v3999_v1, %v6004_v40  ;;  %3873 = vmatprep.subr.bf16.mxu1 %v3872_v27 }
 0x1f1   : > { %2066 = vmatprep.mubr.f32.mxu1 %v1641_v10 }
 0x1f2   : > { %v1645_v43 = vsel %vm1644_vm10, %v6004_v40, %v1643_v7  ;;  %3847 = vmatpush1.bf16.msra.mxu0 %v3846_v5  ;;  %v377_v40 = vld [vmem:[%s5368_s12 + $0xe8] sm:$0xff]  ;;  %3875 = vmatpush3.bf16.msra.mxu1 %v3872_v27 }
 0x1f3   : > { %v4001_v42 = vpop.eup %4000  ;;  %v1648_v0 = vsel %vm1646_vm11, %v1647_v45, %v1645_v43  ;;  %3877 = vmatprep.subr.bf16.mxu1 %v3876_v51 }
 0x1f4   : > { %2067 = vmatmul.mubr.f32.gmra.mrb[136].mxu1 %v376_v32  ;;  %v1650_v59 = vmul.f32 %v4001_v42, %v6026_v38 }
 0x1f5   : > { %2071 = vmatprep.mubr.f32.mxu1 %v1648_v0 }
 0x1f6   : > { %v1652_v20 = vsel %vm1651_vm12, %v6026_v38, %v1650_v59  ;;  %3879 = vmatpush3.bf16.msra.mxu1 %v3876_v51  ;;  %v379_v38 = vld [vmem:[%s5368_s12 + $0xf8] sm:$0xff] }
 0x1f7   : > { %v4003_v1 = vpop.eup %4002  ;;  %v1655_v10 = vsel %vm1653_vm13, %v1654_v37, %v1652_v20 }
 0x1f8   : > { %2072 = vmatmul.mubr.f32.gmra.mrb[138].mxu1 %v377_v40  ;;  %v1657_v21 = vmul.f32 %v4003_v1, %v6048_v12 }
 0x1f9   : > { %2076 = vmatprep.mubr.f32.mxu1 %v1655_v10 }
 0x1fa   : > { %v1659_v7 = vsel %vm1658_vm14, %v6048_v12, %v1657_v21 }
 0x1fb   : > { %v1662_v8 = vsel %vm1660_vm15, %v1661_v26, %v1659_v7 }
 0x1fc   : > { %2077 = vmatmul.mubr.f32.gmra.mrb[140].mxu1 %v378_v25 }
 0x1fd   : > { %2081 = vmatprep.mubr.f32.mxu1 %v1662_v8 }
 0x200   : > { %2082 = vmatmul.mubr.f32.gmra.mrb[142].mxu1 %v379_v38 }
 0x256   : > { %v1928_v63 = vpop.f32.mrb[80].mxu1 }
 0x257   : > { %v1929_v49 = vadd.f32 %v6118_v36, %v1928_v63  ;;  %v1930_v32 = vpop.f32.mrb[81].mxu1 }
 0x259   : > { %v3506_v45 = vmul.f32 -1.442695, %v1929_v49 }
 0x25b   : > { %v1933_v5 = vpop.f32.mrb[82].mxu1  ;;  %4004 = vpow2.f32 %v3506_v45 }
 0x25c   : > { %v1934_v27 = vadd.f32 %v6118_v36, %v1933_v5  ;;  %v1935_v12 = vpop.f32.mrb[83].mxu1 }
 0x25e   : > { %v3507_v43 = vmul.f32 -1.442695, %v1934_v27 }
 0x25f   : > { %v1938_v42 = vpop.f32.mrb[84].mxu1 }
 0x260   : > { %4006 = vpow2.f32 %v3507_v43  ;;  %v1939_v0 = vadd.f32 %v6118_v36, %v1938_v42  ;;  %v1940_v53 = vpop.f32.mrb[85].mxu1 }
 0x262   : > { %v3508_v31 = vmul.f32 -1.442695, %v1939_v0 }
 0x263   : > { %v1943_v59 = vpop.f32.mrb[86].mxu1 }
 0x264   : > { %4008 = vpow2.f32 %v3508_v31  ;;  %v6124_v51 = vadd.f32 %v6118_v36, %v1943_v59  ;;  %v1945_v40 = vpop.f32.mrb[87].mxu1 }
 0x265   : > { %v4005_v37 = vpop.eup %4004 }
 0x266   : > { %v3509_v20 = vmul.f32 -1.442695, %v6124_v51  ;;  %v2183_v1 = vadd.f32 1.0, %v4005_v37 }
 0x267   : > { %v1948_v10 = vpop.f32.mrb[88].mxu1 }
 0x268   : > { %4010 = vpow2.f32 %v3509_v20  ;;  %v6128_v21 = vadd.f32 %v6118_v36, %v1948_v10  ;;  %v1950_v25 = vpop.f32.mrb[89].mxu1 }
 0x269   : > { %4012 = vrcp.f32 %v2183_v1 }
 0x26a   : > { %v4007_v26 = vpop.eup %4006  ;;  %v3510_v7 = vmul.f32 -1.442695, %v6128_v21 }
 0x26b   : > { %v2184_v8 = vadd.f32 1.0, %v4007_v26  ;;  %v1953_v38 = vpop.f32.mrb[90].mxu1 }
 0x26c   : > { %4014 = vpow2.f32 %v3510_v7  ;;  %v6132_v63 = vadd.f32 %v6118_v36, %v1953_v38  ;;  %v1955_v32 = vpop.f32.mrb[91].mxu1 }
 0x26d   : > { %4016 = vrcp.f32 %v2184_v8 }
 0x26e   : > { %v4009_v45 = vpop.eup %4008  ;;  %v3511_v5 = vmul.f32 -1.442695, %v6132_v63 }
 0x26f   : > { %v2185_v12 = vadd.f32 1.0, %v4009_v45  ;;  %v1958_v43 = vpop.f32.mrb[92].mxu1  ;;  %v7059_v45 = vmov 0.0  }
 0x270   : > { %4018 = vpow2.f32 %v3511_v5  ;;  %v6136_v42 = vadd.f32 %v6118_v36, %v1958_v43  ;;  %v1960_v53 = vpop.f32.mrb[93].mxu1 }
 0x271   : > { %4020 = vrcp.f32 %v2185_v12 }
 0x272   : > { %v4011_v31 = vpop.eup %4010  ;;  %v3512_v59 = vmul.f32 -1.442695, %v6136_v42 }
 0x273   : > { %v4013_v40 = vpop.eup %4012  ;;  %v2186_v37 = vadd.f32 1.0, %v4011_v31  ;;  %v1963_v20 = vpop.f32.mrb[94].mxu1 }
 0x274   : > { %v2279_v1 = vmul.f32 %v4013_v40, %v1929_v49  ;;  %4022 = vpow2.f32 %v3512_v59  ;;  %v6140_v10 = vadd.f32 %v6118_v36, %v1963_v20  ;;  %v1965_v25 = vpop.f32.mrb[95].mxu1 }
 0x275   : > { %4024 = vrcp.f32 %v2186_v37 }
 0x276   : > { %v4015_v26 = vpop.eup %4014  ;;  %v3513_v7 = vmul.f32 -1.442695, %v6140_v10  ;;  %2441 = vmatmul.mubr.f32.vlgmr.msra.gmra.mrb[112].mxu0 %v2279_v1  ;;  %3624 = vmatprep.mubr.f32.mxu1 %v2279_v1 }
 0x277   : > { %v4017_v8 = vpop.eup %4016  ;;  %v2187_v38 = vadd.f32 1.0, %v4015_v26  ;;  %v1968_v32 = vpop.f32.mrb[96].mxu1  ;;  %2446 = vmatprep.mubr.f32.mxu0 %v7059_v45 }
 0x278   : > { %v2280_v5 = vmul.f32 %v4017_v8, %v1934_v27  ;;  %4026 = vpow2.f32 %v3513_v7  ;;  %v6145_v49 = vadd.f32 %v6118_v36, %v1968_v32  ;;  %v1970_v12 = vpop.f32.mrb[97].mxu1 }
 0x279   : > { %4028 = vrcp.f32 %v2187_v38 }
 0x27a   : > { %v4019_v43 = vpop.eup %4018  ;;  %v3514_v53 = vmul.f32 -1.442695, %v6145_v49  ;;  %2447 = vmatmul.mubr.f32.gmra.mrb[114].mxu0 %v2280_v5  ;;  %3625 = vmatmul.mubr.f32.vlgmr.msra.gmra.mrb[144].mxu1 %v2280_v5 }
 0x27b   : > { %v4021_v31 = vpop.eup %4020  ;;  %v2188_v59 = vadd.f32 1.0, %v4019_v43  ;;  %v1973_v40 = vpop.f32.mrb[98].mxu1  ;;  %2452 = vmatprep.mubr.f32.mxu0 %v7059_v45 }
 0x27c   : > { %v2281_v37 = vmul.f32 %v4021_v31, %v1939_v0  ;;  %4030 = vpow2.f32 %v3514_v53  ;;  %v6150_v27 = vadd.f32 %v6118_v36, %v1973_v40  ;;  %v1975_v20 = vpop.f32.mrb[99].mxu1 }
 0x27d   : > { %4032 = vrcp.f32 %v2188_v59 }
 0x27e   : > { %v4023_v1 = vpop.eup %4022  ;;  %v3515_v25 = vmul.f32 -1.442695, %v6150_v27  ;;  %2453 = vmatmul.mubr.f32.gmra.mrb[116].mxu0 %v2281_v37  ;;  %3627 = vmatprep.mubr.f32.mxu1 %v2281_v37 }
 0x27f   : > { %v4025_v26 = vpop.eup %4024  ;;  %v2189_v7 = vadd.f32 1.0, %v4023_v1  ;;  %v1978_v8 = vpop.f32.mrb[100].mxu1  ;;  %2458 = vmatprep.mubr.f32.mxu0 %v7059_v45 }
 0x280   : > { %v2282_v38 = vmul.f32 %v4025_v26, %v6124_v51  ;;  %4034 = vpow2.f32 %v3515_v25  ;;  %v6156_v0 = vadd.f32 %v6118_v36, %v1978_v8  ;;  %v1980_v32 = vpop.f32.mrb[101].mxu1 }
 0x281   : > { %4036 = vrcp.f32 %v2189_v7 }
 0x282   : > { %v4027_v5 = vpop.eup %4026  ;;  %v3516_v12 = vmul.f32 -1.442695, %v6156_v0  ;;  %2459 = vmatmul.mubr.f32.gmra.mrb[118].mxu0 %v2282_v38  ;;  %3628 = vmatmul.mubr.f32.gmra.mrb[146].mxu1 %v2282_v38 }
 0x283   : > { %v4029_v43 = vpop.eup %4028  ;;  %v2190_v53 = vadd.f32 1.0, %v4027_v5  ;;  %v1983_v31 = vpop.f32.mrb[102].mxu1  ;;  %2464 = vmatprep.mubr.f32.mxu0 %v7059_v45 }
 0x284   : > { %v2283_v59 = vmul.f32 %v4029_v43, %v6128_v21  ;;  %4038 = vpow2.f32 %v3516_v12  ;;  %v6162_v51 = vadd.f32 %v6118_v36, %v1983_v31  ;;  %v1985_v40 = vpop.f32.mrb[103].mxu1 }
 0x285   : > { %4040 = vrcp.f32 %v2190_v53 }
 0x286   : > { %v4031_v37 = vpop.eup %4030  ;;  %v3517_v20 = vmul.f32 -1.442695, %v6162_v51  ;;  %2465 = vmatmul.mubr.f32.gmra.mrb[120].mxu0 %v2283_v59  ;;  %3630 = vmatprep.mubr.f32.mxu1 %v2283_v59 }
 0x287   : > { %v4033_v1 = vpop.eup %4032  ;;  %v2191_v25 = vadd.f32 1.0, %v4031_v37  ;;  %v1988_v26 = vpop.f32.mrb[104].mxu1  ;;  %2470 = vmatprep.mubr.f32.mxu0 %v7059_v45 }
 0x288   : > { %v2284_v7 = vmul.f32 %v4033_v1, %v6132_v63  ;;  %4042 = vpow2.f32 %v3517_v20  ;;  %v6168_v21 = vadd.f32 %v6118_v36, %v1988_v26  ;;  %v1990_v8 = vpop.f32.mrb[105].mxu1 }
 0x289   : > { %4044 = vrcp.f32 %v2191_v25 }
 0x28a   : > { %v4035_v38 = vpop.eup %4034  ;;  %v3518_v32 = vmul.f32 -1.442695, %v6168_v21  ;;  %2471 = vmatmul.mubr.f32.gmra.mrb[122].mxu0 %v2284_v7  ;;  %3631 = vmatmul.mubr.f32.gmra.mrb[148].mxu1 %v2284_v7 }
 0x28b   : > { %v4037_v5 = vpop.eup %4036  ;;  %v2192_v12 = vadd.f32 1.0, %v4035_v38  ;;  %v1993_v43 = vpop.f32.mrb[106].mxu1  ;;  %2476 = vmatprep.mubr.f32.mxu0 %v7059_v45 }
 0x28c   : > { %v2285_v53 = vmul.f32 %v4037_v5, %v6136_v42  ;;  %4046 = vpow2.f32 %v3518_v32  ;;  %v6174_v63 = vadd.f32 %v6118_v36, %v1993_v43  ;;  %v1995_v31 = vpop.f32.mrb[107].mxu1 }
 0x28d   : > { %4048 = vrcp.f32 %v2192_v12 }
 0x28e   : > { %v4039_v59 = vpop.eup %4038  ;;  %v3519_v40 = vmul.f32 -1.442695, %v6174_v63  ;;  %2477 = vmatmul.mubr.f32.gmra.mrb[124].mxu0 %v2285_v53  ;;  %3633 = vmatprep.mubr.f32.mxu1 %v2285_v53 }
 0x28f   : > { %v4041_v37 = vpop.eup %4040  ;;  %v2193_v20 = vadd.f32 1.0, %v4039_v59  ;;  %v1998_v1 = vpop.f32.mrb[108].mxu1  ;;  %2482 = vmatprep.mubr.f32.mxu0 %v7059_v45 }
 0x290   : > { %v2286_v25 = vmul.f32 %v4041_v37, %v6140_v10  ;;  %4050 = vpow2.f32 %v3519_v40  ;;  %v6180_v42 = vadd.f32 %v6118_v36, %v1998_v1  ;;  %v2000_v26 = vpop.f32.mrb[109].mxu1 }
 0x291   : > { %4052 = vrcp.f32 %v2193_v20 }
 0x292   : > { %v4043_v7 = vpop.eup %4042  ;;  %v3520_v8 = vmul.f32 -1.442695, %v6180_v42  ;;  %2483 = vmatmul.mubr.f32.gmra.mrb[126].mxu0 %v2286_v25  ;;  %3634 = vmatmul.mubr.f32.gmra.mrb[150].mxu1 %v2286_v25 }
 0x293   : > { %v4045_v38 = vpop.eup %4044  ;;  %v2194_v32 = vadd.f32 1.0, %v4043_v7  ;;  %v2003_v5 = vpop.f32.mrb[110].mxu1  ;;  %2488 = vmatprep.mubr.f32.mxu0 %v7059_v45 }
 0x294   : > { %v2287_v12 = vmul.f32 %v4045_v38, %v6145_v49  ;;  %4054 = vpow2.f32 %v3520_v8  ;;  %v6186_v10 = vadd.f32 %v6118_v36, %v2003_v5  ;;  %v2005_v43 = vpop.f32.mrb[111].mxu1 }
 0x295   : > { %4056 = vrcp.f32 %v2194_v32 }
 0x296   : > { %v4047_v53 = vpop.eup %4046  ;;  %v3521_v31 = vmul.f32 -1.442695, %v6186_v10  ;;  %2489 = vmatmul.mubr.f32.gmra.mrb[128].mxu0 %v2287_v12  ;;  %3636 = vmatprep.mubr.f32.mxu1 %v2287_v12 }
 0x297   : > { %v4049_v59 = vpop.eup %4048  ;;  %v2195_v40 = vadd.f32 1.0, %v4047_v53  ;;  %v2008_v37 = vpop.f32.mrb[112].mxu1  ;;  %2494 = vmatprep.mubr.f32.mxu0 %v7059_v45 }
 0x298   : > { %v2288_v20 = vmul.f32 %v4049_v59, %v6150_v27  ;;  %4058 = vpow2.f32 %v3521_v31  ;;  %v6192_v49 = vadd.f32 %v6118_v36, %v2008_v37  ;;  %v2010_v1 = vpop.f32.mrb[113].mxu1 }
 0x299   : > { %4060 = vrcp.f32 %v2195_v40 }
 0x29a   : > { %v4051_v25 = vpop.eup %4050  ;;  %v3522_v26 = vmul.f32 -1.442695, %v6192_v49  ;;  %2495 = vmatmul.mubr.f32.gmra.mrb[130].mxu0 %v2288_v20  ;;  %3637 = vmatmul.mubr.f32.gmra.mrb[152].mxu1 %v2288_v20 }
 0x29b   : > { %v4053_v7 = vpop.eup %4052  ;;  %v2196_v8 = vadd.f32 1.0, %v4051_v25  ;;  %v2013_v38 = vpop.f32.mrb[114].mxu1  ;;  %2500 = vmatprep.mubr.f32.mxu0 %v7059_v45 }
 0x29c   : > { %v2289_v32 = vmul.f32 %v4053_v7, %v6156_v0  ;;  %4062 = vpow2.f32 %v3522_v26  ;;  %v6198_v27 = vadd.f32 %v6118_v36, %v2013_v38  ;;  %v2015_v5 = vpop.f32.mrb[115].mxu1 }
 0x29d   : > { %4064 = vrcp.f32 %v2196_v8 }
 0x29e   : > { %v4055_v12 = vpop.eup %4054  ;;  %v3523_v43 = vmul.f32 -1.442695, %v6198_v27  ;;  %2501 = vmatmul.mubr.f32.gmra.mrb[132].mxu0 %v2289_v32  ;;  %3639 = vmatprep.mubr.f32.mxu1 %v2289_v32 }
 0x29f   : > { %v4057_v53 = vpop.eup %4056  ;;  %v2197_v31 = vadd.f32 1.0, %v4055_v12  ;;  %v2018_v59 = vpop.f32.mrb[116].mxu1  ;;  %2506 = vmatprep.mubr.f32.mxu0 %v7059_v45 }
 0x2a0   : > { %v2290_v40 = vmul.f32 %v4057_v53, %v6162_v51  ;;  %4066 = vpow2.f32 %v3523_v43  ;;  %v6204_v0 = vadd.f32 %v6118_v36, %v2018_v59  ;;  %v2020_v37 = vpop.f32.mrb[117].mxu1 }
 0x2a1   : > { %4068 = vrcp.f32 %v2197_v31 }
 0x2a2   : > { %v4059_v20 = vpop.eup %4058  ;;  %v3524_v1 = vmul.f32 -1.442695, %v6204_v0  ;;  %2507 = vmatmul.mubr.f32.gmra.mrb[134].mxu0 %v2290_v40  ;;  %3640 = vmatmul.mubr.f32.gmra.mrb[154].mxu1 %v2290_v40 }
 0x2a3   : > { %v4061_v25 = vpop.eup %4060  ;;  %v2198_v26 = vadd.f32 1.0, %v4059_v20  ;;  %v2023_v7 = vpop.f32.mrb[118].mxu1  ;;  %2512 = vmatprep.mubr.f32.mxu0 %v7059_v45 }
 0x2a4   : > { %v2291_v8 = vmul.f32 %v4061_v25, %v6168_v21  ;;  %4070 = vpow2.f32 %v3524_v1  ;;  %v6210_v51 = vadd.f32 %v6118_v36, %v2023_v7  ;;  %v2025_v38 = vpop.f32.mrb[119].mxu1 }
 0x2a5   : > { %4072 = vrcp.f32 %v2198_v26 }
 0x2a6   : > { %v4063_v32 = vpop.eup %4062  ;;  %v3525_v5 = vmul.f32 -1.442695, %v6210_v51  ;;  %2513 = vmatmul.mubr.f32.gmra.mrb[136].mxu0 %v2291_v8  ;;  %3642 = vmatprep.mubr.f32.mxu1 %v2291_v8 }
 0x2a7   : > { %v4065_v12 = vpop.eup %4064  ;;  %v2199_v43 = vadd.f32 1.0, %v4063_v32  ;;  %v2028_v53 = vpop.f32.mrb[120].mxu1  ;;  %2518 = vmatprep.mubr.f32.mxu0 %v7059_v45 }
 0x2a8   : > { %v2292_v31 = vmul.f32 %v4065_v12, %v6174_v63  ;;  %4074 = vpow2.f32 %v3525_v5  ;;  %v6216_v21 = vadd.f32 %v6118_v36, %v2028_v53  ;;  %v2030_v59 = vpop.f32.mrb[121].mxu1 }
 0x2a9   : > { %4076 = vrcp.f32 %v2199_v43 }
 0x2aa   : > { %v4067_v40 = vpop.eup %4066  ;;  %v3526_v37 = vmul.f32 -1.442695, %v6216_v21  ;;  %2519 = vmatmul.mubr.f32.gmra.mrb[138].mxu0 %v2292_v31  ;;  %3643 = vmatmul.mubr.f32.gmra.mrb[156].mxu1 %v2292_v31 }
 0x2ab   : > { %v4069_v20 = vpop.eup %4068  ;;  %v2200_v1 = vadd.f32 1.0, %v4067_v40  ;;  %v2033_v25 = vpop.f32.mrb[122].mxu1  ;;  %2524 = vmatprep.mubr.f32.mxu0 %v7059_v45 }
 0x2ac   : > { %v2293_v26 = vmul.f32 %v4069_v20, %v6180_v42  ;;  %4078 = vpow2.f32 %v3526_v37  ;;  %v6222_v63 = vadd.f32 %v6118_v36, %v2033_v25  ;;  %v2035_v7 = vpop.f32.mrb[123].mxu1 }
 0x2ad   : > { %4080 = vrcp.f32 %v2200_v1 }
 0x2ae   : > { %v4071_v8 = vpop.eup %4070  ;;  %v3527_v38 = vmul.f32 -1.442695, %v6222_v63  ;;  %2525 = vmatmul.mubr.f32.gmra.mrb[140].mxu0 %v2293_v26  ;;  %3645 = vmatprep.mubr.f32.mxu1 %v2293_v26 }
 0x2af   : > { %v4073_v32 = vpop.eup %4072  ;;  %v2201_v5 = vadd.f32 1.0, %v4071_v8  ;;  %v2038_v12 = vpop.f32.mrb[124].mxu1  ;;  %2530 = vmatprep.mubr.f32.mxu0 %v7059_v45 }
 0x2b0   : > { %v2294_v43 = vmul.f32 %v4073_v32, %v6186_v10  ;;  %4082 = vpow2.f32 %v3527_v38  ;;  %v6228_v42 = vadd.f32 %v6118_v36, %v2038_v12  ;;  %v2040_v53 = vpop.f32.mrb[125].mxu1 }
 0x2b1   : > { %4084 = vrcp.f32 %v2201_v5 }
 0x2b2   : > { %v4075_v31 = vpop.eup %4074  ;;  %v3528_v59 = vmul.f32 -1.442695, %v6228_v42  ;;  %2531 = vmatmul.mubr.f32.gmra.mrb[142].mxu0 %v2294_v43  ;;  %3646 = vmatmul.mubr.f32.gmra.mrb[158].mxu1 %v2294_v43 }
 0x2b3   : > { %v4077_v40 = vpop.eup %4076  ;;  %v2202_v37 = vadd.f32 1.0, %v4075_v31  ;;  %v2043_v20 = vpop.f32.mrb[126].mxu1  ;;  %2536 = vmatprep.mubr.f32.mxu0 %v7059_v45 }
 0x2b4   : > { %v2295_v1 = vmul.f32 %v4077_v40, %v6192_v49  ;;  %4086 = vpow2.f32 %v3528_v59  ;;  %v6234_v10 = vadd.f32 %v6118_v36, %v2043_v20  ;;  %v2045_v25 = vpop.f32.mrb[127].mxu1 }
 0x2b5   : > { %4088 = vrcp.f32 %v2202_v37 }
 0x2b6   : > { %v4079_v26 = vpop.eup %4078  ;;  %v3529_v7 = vmul.f32 -1.442695, %v6234_v10  ;;  %2537 = vmatmul.mubr.f32.gmra.mrb[144].mxu0 %v2295_v1  ;;  %3648 = vmatprep.mubr.f32.mxu1 %v2295_v1 }
 0x2b7   : > { %v4081_v8 = vpop.eup %4080  ;;  %v2203_v38 = vadd.f32 1.0, %v4079_v26  ;;  %v2048_v32 = vpop.f32.mrb[128].mxu1  ;;  %2542 = vmatprep.mubr.f32.mxu0 %v7059_v45 }
 0x2b8   : > { %v2296_v5 = vmul.f32 %v4081_v8, %v6198_v27  ;;  %4090 = vpow2.f32 %v3529_v7  ;;  %v6240_v49 = vadd.f32 %v6118_v36, %v2048_v32  ;;  %v2050_v12 = vpop.f32.mrb[129].mxu1 }
 0x2b9   : > { %4092 = vrcp.f32 %v2203_v38 }
 0x2ba   : > { %v4083_v43 = vpop.eup %4082  ;;  %v3530_v53 = vmul.f32 -1.442695, %v6240_v49  ;;  %2543 = vmatmul.mubr.f32.gmra.mrb[146].mxu0 %v2296_v5  ;;  %3649 = vmatmul.mubr.f32.gmra.mrb[160].mxu1 %v2296_v5 }
 0x2bb   : > { %v4085_v31 = vpop.eup %4084  ;;  %v2204_v59 = vadd.f32 1.0, %v4083_v43  ;;  %v2053_v40 = vpop.f32.mrb[130].mxu1  ;;  %2548 = vmatprep.mubr.f32.mxu0 %v7059_v45 }
 0x2bc   : > { %v2297_v37 = vmul.f32 %v4085_v31, %v6204_v0  ;;  %4094 = vpow2.f32 %v3530_v53  ;;  %v6246_v27 = vadd.f32 %v6118_v36, %v2053_v40  ;;  %v2055_v20 = vpop.f32.mrb[131].mxu1 }
 0x2bd   : > { %4096 = vrcp.f32 %v2204_v59 }
 0x2be   : > { %v4087_v1 = vpop.eup %4086  ;;  %v3531_v25 = vmul.f32 -1.442695, %v6246_v27  ;;  %2549 = vmatmul.mubr.f32.gmra.mrb[148].mxu0 %v2297_v37  ;;  %3651 = vmatprep.mubr.f32.mxu1 %v2297_v37 }
 0x2bf   : > { %v4089_v26 = vpop.eup %4088  ;;  %v2205_v7 = vadd.f32 1.0, %v4087_v1  ;;  %v2058_v8 = vpop.f32.mrb[132].mxu1  ;;  %2554 = vmatprep.mubr.f32.mxu0 %v7059_v45 }
 0x2c0   : > { %v2298_v38 = vmul.f32 %v4089_v26, %v6210_v51  ;;  %4098 = vpow2.f32 %v3531_v25  ;;  %v6252_v0 = vadd.f32 %v6118_v36, %v2058_v8  ;;  %v2060_v32 = vpop.f32.mrb[133].mxu1 }
 0x2c1   : > { %4100 = vrcp.f32 %v2205_v7 }
 0x2c2   : > { %v4091_v5 = vpop.eup %4090  ;;  %v3532_v12 = vmul.f32 -1.442695, %v6252_v0  ;;  %2555 = vmatmul.mubr.f32.gmra.mrb[150].mxu0 %v2298_v38  ;;  %3652 = vmatmul.mubr.f32.gmra.mrb[162].mxu1 %v2298_v38 }
 0x2c3   : > { %v4093_v43 = vpop.eup %4092  ;;  %v2206_v53 = vadd.f32 1.0, %v4091_v5  ;;  %v2063_v31 = vpop.f32.mrb[134].mxu1  ;;  %2560 = vmatprep.mubr.f32.mxu0 %v7059_v45 }
 0x2c4   : > { %v2299_v59 = vmul.f32 %v4093_v43, %v6216_v21  ;;  %4102 = vpow2.f32 %v3532_v12  ;;  %v6258_v51 = vadd.f32 %v6118_v36, %v2063_v31  ;;  %v2065_v40 = vpop.f32.mrb[135].mxu1 }
 0x2c5   : > { %4104 = vrcp.f32 %v2206_v53 }
 0x2c6   : > { %v4095_v37 = vpop.eup %4094  ;;  %v3533_v20 = vmul.f32 -1.442695, %v6258_v51  ;;  %2561 = vmatmul.mubr.f32.gmra.mrb[152].mxu0 %v2299_v59  ;;  %3654 = vmatprep.mubr.f32.mxu1 %v2299_v59 }
 0x2c7   : > { %v4097_v1 = vpop.eup %4096  ;;  %v2207_v25 = vadd.f32 1.0, %v4095_v37  ;;  %v2068_v26 = vpop.f32.mrb[136].mxu1  ;;  %2566 = vmatprep.mubr.f32.mxu0 %v7059_v45 }
 0x2c8   : > { %v2300_v7 = vmul.f32 %v4097_v1, %v6222_v63  ;;  %4106 = vpow2.f32 %v3533_v20  ;;  %v6264_v21 = vadd.f32 %v6118_v36, %v2068_v26  ;;  %v2070_v8 = vpop.f32.mrb[137].mxu1 }
 0x2c9   : > { %4108 = vrcp.f32 %v2207_v25 }
 0x2ca   : > { %v4099_v38 = vpop.eup %4098  ;;  %v3534_v32 = vmul.f32 -1.442695, %v6264_v21  ;;  %2567 = vmatmul.mubr.f32.gmra.mrb[154].mxu0 %v2300_v7  ;;  %3655 = vmatmul.mubr.f32.gmra.mrb[164].mxu1 %v2300_v7 }
 0x2cb   : > { %v4101_v5 = vpop.eup %4100  ;;  %v2208_v12 = vadd.f32 1.0, %v4099_v38  ;;  %v2073_v43 = vpop.f32.mrb[138].mxu1  ;;  %2572 = vmatprep.mubr.f32.mxu0 %v7059_v45 }
 0x2cc   : > { %v2301_v53 = vmul.f32 %v4101_v5, %v6228_v42  ;;  %4110 = vpow2.f32 %v3534_v32  ;;  %v6270_v63 = vadd.f32 %v6118_v36, %v2073_v43  ;;  %v2075_v31 = vpop.f32.mrb[139].mxu1 }
 0x2cd   : > { %4112 = vrcp.f32 %v2208_v12 }
 0x2ce   : > { %v4103_v59 = vpop.eup %4102  ;;  %v3535_v40 = vmul.f32 -1.442695, %v6270_v63  ;;  %2573 = vmatmul.mubr.f32.gmra.mrb[156].mxu0 %v2301_v53  ;;  %3657 = vmatprep.mubr.f32.mxu1 %v2301_v53 }
 0x2cf   : > { %v4105_v37 = vpop.eup %4104  ;;  %v2209_v20 = vadd.f32 1.0, %v4103_v59  ;;  %v2078_v1 = vpop.f32.mrb[140].mxu1  ;;  %2578 = vmatprep.mubr.f32.mxu0 %v7059_v45 }
 0x2d0   : > { %v2302_v25 = vmul.f32 %v4105_v37, %v6234_v10  ;;  %4114 = vpow2.f32 %v3535_v40  ;;  %v2079_v42 = vadd.f32 %v6118_v36, %v2078_v1  ;;  %v2080_v26 = vpop.f32.mrb[141].mxu1 }
 0x2d1   : > { %4116 = vrcp.f32 %v2209_v20 }
 0x2d2   : > { %v4107_v7 = vpop.eup %4106  ;;  %v3536_v8 = vmul.f32 -1.442695, %v2079_v42  ;;  %2579 = vmatmul.mubr.f32.gmra.mrb[158].mxu0 %v2302_v25  ;;  %3658 = vmatmul.mubr.f32.gmra.mrb[166].mxu1 %v2302_v25 }
 0x2d3   : > { %v4109_v38 = vpop.eup %4108  ;;  %v2210_v32 = vadd.f32 1.0, %v4107_v7  ;;  %v2083_v5 = vpop.f32.mrb[142].mxu1  ;;  %2584 = vmatprep.mubr.f32.mxu0 %v7059_v45 }
 0x2d4   : > { %v2303_v12 = vmul.f32 %v4109_v38, %v6240_v49  ;;  %4118 = vpow2.f32 %v3536_v8  ;;  %v2084_v43 = vadd.f32 %v6118_v36, %v2083_v5  ;;  %v2085_v10 = vpop.f32.mrb[143].mxu1 }
 0x2d5   : > { %4120 = vrcp.f32 %v2210_v32 }
 0x2d6   : > { %v4111_v53 = vpop.eup %4110  ;;  %v3537_v31 = vmul.f32 -1.442695, %v2084_v43  ;;  %2585 = vmatmul.mubr.f32.gmra.mrb[160].mxu0 %v2303_v12  ;;  %3660 = vmatprep.mubr.f32.mxu1 %v2303_v12 }
 0x2d7   : > { %v4113_v59 = vpop.eup %4112  ;;  %v2211_v40 = vadd.f32 1.0, %v4111_v53  ;;  %2590 = vmatprep.mubr.f32.mxu0 %v7059_v45 }
 0x2d8   : > { %v2304_v37 = vmul.f32 %v4113_v59, %v6246_v27  ;;  %4122 = vpow2.f32 %v3537_v31  ;;  %v2361_v31 = vlaneseq }
 0x2d9   : > { %4124 = vrcp.f32 %v2211_v40  ;;  %v2359_v40 = vld [vmem:[%s6850_s6] sm:$0x7] }
 0x2da   : > { %v4115_v20 = vpop.eup %4114  ;;  %2591 = vmatmul.mubr.f32.gmra.mrb[162].mxu0 %v2304_v37  ;;  %3661 = vmatmul.mubr.f32.gmra.mrb[168].mxu1 %v2304_v37  ;;  %v2362_v59 = vshrl.u32 %v2361_v31, 7  ;;  %v3243_v31 = vld [vmem:[%s4495_s21 + $0x28] sm:$0xff] }
 0x2db   : > { %v4117_v49 = vpop.eup %4116  ;;  %v2212_v1 = vadd.f32 1.0, %v4115_v20  ;;  %2596 = vmatprep.mubr.f32.mxu0 %v7059_v45 }
 0x2dc   : > { %v2305_v36 = vmul.f32 %v4117_v49, %v6252_v0  ;;  %v2367_v37 = vsub.s32 1, %v2362_v59  ;;  %v2371_v20 = vsub.s32 2, %v2362_v59 }
 0x2dd   : > { %4126 = vrcp.f32 %v2212_v1 }
 0x2de   : > { %v4119_v25 = vpop.eup %4118  ;;  %2597 = vmatmul.mubr.f32.gmra.mrb[164].mxu0 %v2305_v36  ;;  %3663 = vmatprep.mubr.f32.mxu1 %v2305_v36  ;;  %v6296_v49 = vrot.slane %v2359_v40, %v2367_v37  ;;  %v6300_v36 = vrot.slane %v2359_v40, %v2371_v20  ;;  %v7061_v20 = vld [vmem:[#allocation7_spill] sm:$0xff] }
 0x2df   : > { %v4121_v26 = vpop.eup %4120  ;;  %v2213_v7 = vadd.f32 1.0, %v4119_v25  ;;  %2602 = vmatprep.mubr.f32.mxu0 %v7059_v45 }
 0x2e0   : > { %v2306_v27 = vmul.f32 %v4121_v26, %v6258_v51  ;;  %v4132_v26 = vld [vmem:[%s5368_s12] sm:$0xff] }
 0x2e1   : > { %4128 = vrcp.f32 %v2213_v7 }
 0x2e2   : > { %v4123_v8 = vpop.eup %4122  ;;  %2603 = vmatmul.mubr.f32.gmra.mrb[166].mxu0 %v2306_v27  ;;  %3664 = vmatmul.mubr.f32.gmra.mrb[170].mxu1 %v2306_v27  ;;  %v7060_v27 = vld [vmem:[#allocation69_spill] sm:$0xff] }
 0x2e3   : > { %v4125_v38 = vpop.eup %4124  ;;  %v2214_v32 = vadd.f32 1.0, %v4123_v8  ;;  %2608 = vmatprep.mubr.f32.mxu0 %v7059_v45 }
 0x2e4   : > { %v2307_v0 = vmul.f32 %v4125_v38, %v6264_v21 }
 0x2e5   : > { %4130 = vrcp.f32 %v2214_v32 }
 0x2e6   : > { %2609 = vmatmul.mubr.f32.gmra.mrb[168].mxu0 %v2307_v0  ;;  %3666 = vmatprep.mubr.f32.mxu1 %v2307_v0 }
 0x2e7   : > { %v4127_v5 = vpop.eup %4126  ;;  %2614 = vmatprep.mubr.f32.mxu0 %v7059_v45 }
 0x2e8   : > { %v2308_v12 = vmul.f32 %v4127_v5, %v6270_v63  ;;  %v2363_v63 = vsub.s32 0, %v2362_v59 }
 0x2ea   : > { %2615 = vmatmul.mubr.f32.gmra.mrb[170].mxu0 %v2308_v12  ;;  %3667 = vmatmul.mubr.f32.gmra.mrb[172].mxu1 %v2308_v12 }
 0x2eb   : > { %v4129_v51 = vpop.eup %4128  ;;  %2620 = vmatprep.mubr.f32.mxu0 %v7059_v45 }
 0x2ec   : > { %v2309_v10 = vmul.f32 %v4129_v51, %v2079_v42  ;;  %v6294_v42 = vrot.slane %v2359_v40, %v2363_v63  ;;  %v4133_v40 = vld [vmem:[%s5368_s12 + $0x8] sm:$0xff] }
 0x2ee   : > { %2621 = vmatmul.mubr.f32.gmra.mrb[172].mxu0 %v2309_v10  ;;  %3669 = vmatprep.mubr.f32.mxu1 %v2309_v10 }
 0x2ef   : > { %v4131_v53 = vpop.eup %4130  ;;  %2626 = vmatprep.mubr.f32.mxu0 %v7059_v45 }
 0x2f0   : > { %v2310_v21 = vmul.f32 %v4131_v53, %v2084_v43  ;;  %v2987_v53 = vld [vmem:[%s4495_s21 + $0x18] sm:$0xff] }
 0x2f2   : > { %2627 = vmatmul.mubr.f32.gmra.mrb[174].mxu0 %v2310_v21  ;;  %3670 = vmatmul.mubr.f32.gmra.mrb[174].mxu1 %v2310_v21  ;;  %v3115_v21 = vld [vmem:[%s4495_s21 + $0x20] sm:$0xff] }
 0x349   : > { %v2442_v45 = vpop.f32.mrb[112].mxu0 }
 0x34a   : > { %v2443_v43 = vadd.f32 %v2442_v45, %v6294_v42  ;;  %v2444_v1 = vpop.f32.mrb[113].mxu0 }
 0x34b   : > { %v2445_v25 = vadd.f32 %v2444_v1, %v6296_v49 }
 0x34c   : > { %v2858_v7 = vadd.f32 %v4132_v26, %v2443_v43  ;;  %v7062_v43 = vld [vmem:[#allocation29_spill] sm:$0xff] }
 0x34d   : > { %v2890_v8 = vmul.f32 %v2445_v25, %v7060_v27  ;;  %v2448_v38 = vpop.f32.mrb[114].mxu0  ;;  %v3626_v32 = vpop.f32.mrb[144].mxu1  ;;  %v7063_v25 = vld [vmem:[#allocation71_spill] sm:$0xff]  ;;  %v2986_v27 = vld [vmem:[%s4495_s21] sm:$0xff] }
 0x34e   : > { %v2449_v0 = vadd.f32 %v2448_v38, %v6294_v42  ;;  %v2705_v5 = vadd.f32 %v3626_v32, %v6300_v36  ;;  %v2450_v12 = vpop.f32.mrb[115].mxu0  ;;  %v2699_v51 = vpop.f32.mrb[145].mxu1  ;;  %v3114_v38 = vld [vmem:[%s4495_s21 + $0x8] sm:$0xff]  ;;  %v3242_v32 = vld [vmem:[%s4495_s21 + $0x10] sm:$0xff] }
 0x34f   : > { %v2922_v10 = vadd.f32 %v2890_v8, %v2858_v7  ;;  %v2451_v59 = vadd.f32 %v2450_v12, %v6296_v49  ;;  %v2700_v63 = vadd.f32 %v2699_v51, %v6300_v36  ;;  %v7064_v7 = vld [vmem:[#allocation72_spill] sm:$0xff]  ;;  %v7066_v12 = vld [vmem:[#allocation27_spill] sm:$0xff] }
 0x350   : > { %v2859_v37 = vadd.f32 %v4133_v40, %v2449_v0  ;;  %v3019_v45 = vmul.f32 %v2705_v5, %v7061_v20  ;;  %v3147_v1 = vmul.f32 %v2705_v5, %v7062_v43  ;;  %v3275_v26 = vmul.f32 %v2705_v5, %v7063_v25  ;;  %v7065_v0 = vld [vmem:[#allocation5_spill] sm:$0xff]  ;;  %v7067_v40 = vld [vmem:[#allocation68_spill] sm:$0xff] }
 0x351   : > { %2954 = vst [vmem:[%s6321_s23] sm:$0xff] %v2922_v10  ;;  %v2891_v8 = vmul.f32 %v2451_v59, %v7064_v7  ;;  %v3018_v5 = vmul.f32 %v2700_v63, %v7065_v0  ;;  %v3146_v51 = vmul.f32 %v2700_v63, %v7066_v12  ;;  %v3274_v20 = vmul.f32 %v2700_v63, %v7067_v40  ;;  %v2454_v43 = vpop.f32.mrb[116].mxu0  ;;  %v4134_v63 = vld [vmem:[%s5368_s12 + $0x10] sm:$0xff] }
 0x352   : > { %v3051_v10 = vadd.f32 %v3019_v45, %v2987_v53  ;;  %v3179_v25 = vadd.f32 %v3147_v1, %v3115_v21  ;;  %v3307_v9 = vadd.f32 %v3275_v26, %v3243_v31  ;;  %v2455_v11 = vadd.f32 %v2454_v43, %v6294_v42  ;;  %v2456_v57 = vpop.f32.mrb[117].mxu0 }
 0x353   : > { %v2923_v59 = vadd.f32 %v2891_v8, %v2859_v37  ;;  %v3050_v7 = vadd.f32 %v3018_v5, %v2986_v27  ;;  %v3178_v46 = vadd.f32 %v3146_v51, %v3114_v38  ;;  %v3306_v0 = vadd.f32 %v3274_v20, %v3242_v32  ;;  %v7068_v37 = vld [vmem:[#allocation75_spill] sm:$0xff]  ;;  %v2989_v27 = vld [vmem:[%s4495_s21 + $0x48] sm:$0xff]  ;;  %v4135_v8 = vld [vmem:[%s5368_s12 + $0x18] sm:$0xff] }
 0x354   : > { %3083 = vst [vmem:[%s6329_s26 + $0x18] sm:$0xff] %v3051_v10  ;;  %3211 = vst [vmem:[%s6329_s26 + $0x20] sm:$0xff] %v3179_v25  ;;  %v2860_v12 = vadd.f32 %v4134_v63, %v2455_v11  ;;  %v2457_v53 = vadd.f32 %v2456_v57, %v6296_v49  ;;  %v3117_v57 = vld [vmem:[%s4495_s21 + $0x50] sm:$0xff]  ;;  %v7070_v20 = vld [vmem:[#allocation33_spill] sm:$0xff] }
 0x355   : > { %3339 = vst [vmem:[%s6329_s26 + $0x28] sm:$0xff] %v3307_v9  ;;  %2955 = vst [vmem:[%s6321_s23 + $0x8] sm:$0xff] %v2923_v59  ;;  %v2460_v21 = vpop.f32.mrb[118].mxu0  ;;  %v3629_v31 = vpop.f32.mrb[146].mxu1  ;;  %v7069_v51 = vld [vmem:[#allocation11_spill] sm:$0xff]  ;;  %v3245_v10 = vld [vmem:[%s4495_s21 + $0x58] sm:$0xff] }
 0x356   : > { %3082 = vst [vmem:[%s6329_s26] sm:$0xff] %v3050_v7  ;;  %3210 = vst [vmem:[%s6329_s26 + $0x8] sm:$0xff] %v3178_v46  ;;  %v2892_v45 = vmul.f32 %v2457_v53, %v7068_v37  ;;  %v2461_v1 = vadd.f32 %v2460_v21, %v6294_v42  ;;  %v2715_v9 = vadd.f32 %v3629_v31, %v6300_v36  ;;  %v2462_v26 = vpop.f32.mrb[119].mxu0  ;;  %v2709_v11 = vpop.f32.mrb[147].mxu1  ;;  %v2988_v25 = vld [vmem:[%s4495_s21 + $0x30] sm:$0xff]  ;;  %v3116_v59 = vld [vmem:[%s4495_s21 + $0x38] sm:$0xff] }
 0x357   : > { %3338 = vst [vmem:[%s6329_s26 + $0x10] sm:$0xff] %v3306_v0  ;;  %v2463_v38 = vadd.f32 %v2462_v26, %v6296_v49  ;;  %v2710_v46 = vadd.f32 %v2709_v11, %v6300_v36  ;;  %v7071_v63 = vld [vmem:[#allocation9_spill] sm:$0xff]  ;;  %v7072_v21 = vld [vmem:[#allocation31_spill] sm:$0xff]  ;;  %v7073_v26 = vld [vmem:[#allocation74_spill] sm:$0xff] }
 0x358   : > { %v2924_v32 = vadd.f32 %v2892_v45, %v2860_v12  ;;  %v2861_v5 = vadd.f32 %v4135_v8, %v2461_v1  ;;  %v3021_v40 = vmul.f32 %v2715_v9, %v7069_v51  ;;  %v3149_v43 = vmul.f32 %v2715_v9, %v7070_v20  ;;  %v3244_v12 = vld [vmem:[%s4495_s21 + $0x40] sm:$0xff] }
 0x359   : > { %v3277_v7 = vmul.f32 %v2715_v9, %v5306_v13  ;;  %v2893_v0 = vmul.f32 %v2463_v38, %v5338_v33  ;;  %v3020_v53 = vmul.f32 %v2710_v46, %v7071_v63  ;;  %v3148_v31 = vmul.f32 %v2710_v46, %v7072_v21  ;;  %v2466_v37 = vpop.f32.mrb[120].mxu0 }
 0x35a   : > { %2956 = vst [vmem:[%s6321_s23 + $0x10] sm:$0xff] %v2924_v32  ;;  %v3053_v45 = vadd.f32 %v3021_v40, %v2989_v27  ;;  %v3181_v1 = vadd.f32 %v3149_v43, %v3117_v57  ;;  %v3276_v11 = vmul.f32 %v2710_v46, %v7073_v26  ;;  %v2467_v13 = vadd.f32 %v2466_v37, %v6294_v42  ;;  %v2468_v33 = vpop.f32.mrb[121].mxu0  ;;  %v4136_v32 = vld [vmem:[%s5368_s12 + $0x20] sm:$0xff]  ;;  %v3247_v26 = vld [vmem:[%s4495_s21 + $0x88] sm:$0xff] }
 0x35b   : > { %v3309_v9 = vadd.f32 %v3277_v7, %v3245_v10  ;;  %v2925_v38 = vadd.f32 %v2893_v0, %v2861_v5  ;;  %v3052_v8 = vadd.f32 %v3020_v53, %v2988_v25  ;;  %v3180_v51 = vadd.f32 %v3148_v31, %v3116_v59  ;;  %v2991_v7 = vld [vmem:[%s4495_s21 + $0x78] sm:$0xff]  ;;  %v3119_v0 = vld [vmem:[%s4495_s21 + $0x80] sm:$0xff]  ;;  %v4137_v31 = vld [vmem:[%s5368_s12 + $0x28] sm:$0xff] }
 0x35c   : > { %3085 = vst [vmem:[%s6329_s26 + $0x48] sm:$0xff] %v3053_v45  ;;  %3213 = vst [vmem:[%s6329_s26 + $0x50] sm:$0xff] %v3181_v1  ;;  %v3308_v20 = vadd.f32 %v3276_v11, %v3244_v12  ;;  %v2862_v27 = vadd.f32 %v4136_v32, %v2467_v13  ;;  %v2469_v57 = vadd.f32 %v2468_v33, %v6296_v49  ;;  %v7074_v37 = vld [vmem:[#allocation17_spill] sm:$0xff]  ;;  %v3118_v13 = vld [vmem:[%s4495_s21 + $0x68] sm:$0xff] }
 0x35d   : > { %3341 = vst [vmem:[%s6329_s26 + $0x58] sm:$0xff] %v3309_v9  ;;  %2957 = vst [vmem:[%s6321_s23 + $0x18] sm:$0xff] %v2925_v38  ;;  %v2472_v46 = vpop.f32.mrb[122].mxu0  ;;  %v3632_v40 = vpop.f32.mrb[148].mxu1  ;;  %v7075_v45 = vld [vmem:[#allocation37_spill] sm:$0xff]  ;;  %v7076_v33 = vld [vmem:[#allocation80_spill] sm:$0xff] }
 0x35e   : > { %3084 = vst [vmem:[%s6329_s26 + $0x30] sm:$0xff] %v3052_v8  ;;  %3212 = vst [vmem:[%s6329_s26 + $0x38] sm:$0xff] %v3180_v51  ;;  %v2894_v5 = vmul.f32 %v2469_v57, %v5380_v28  ;;  %v2473_v43 = vadd.f32 %v2472_v46, %v6294_v42  ;;  %v2725_v10 = vadd.f32 %v3632_v40, %v6300_v36  ;;  %v2474_v25 = vpop.f32.mrb[123].mxu0  ;;  %v2719_v59 = vpop.f32.mrb[149].mxu1  ;;  %v2990_v11 = vld [vmem:[%s4495_s21 + $0x60] sm:$0xff]  ;;  %v7078_v51 = vld [vmem:[#allocation14_spill] sm:$0xff] }
 0x35f   : > { %3340 = vst [vmem:[%s6329_s26 + $0x40] sm:$0xff] %v3308_v20  ;;  %v2475_v63 = vadd.f32 %v2474_v25, %v6296_v49  ;;  %v2720_v53 = vadd.f32 %v2719_v59, %v6300_v36  ;;  %v7077_v38 = vld [vmem:[#allocation81_spill] sm:$0xff]  ;;  %v7079_v32 = vld [vmem:[#allocation35_spill] sm:$0xff] }
 0x360   : > { %v2926_v21 = vadd.f32 %v2894_v5, %v2862_v27  ;;  %v2863_v12 = vadd.f32 %v4137_v31, %v2473_v43  ;;  %v3023_v28 = vmul.f32 %v2725_v10, %v7074_v37  ;;  %v3151_v1 = vmul.f32 %v2725_v10, %v7075_v45  ;;  %v3246_v27 = vld [vmem:[%s4495_s21 + $0x70] sm:$0xff]  ;;  %v7080_v43 = vld [vmem:[#allocation78_spill] sm:$0xff] }
 0x361   : > { %v3279_v9 = vmul.f32 %v2725_v10, %v7076_v33  ;;  %v2895_v8 = vmul.f32 %v2475_v63, %v7077_v38  ;;  %v3022_v20 = vmul.f32 %v2720_v53, %v7078_v51  ;;  %v3150_v57 = vmul.f32 %v2720_v53, %v7079_v32  ;;  %v2478_v46 = vpop.f32.mrb[124].mxu0  ;;  %v3121_v38 = vld [vmem:[%s4495_s21 + $0xb0] sm:$0xff]  ;;  %v4139_v32 = vld [vmem:[%s5368_s12 + $0x38] sm:$0xff] }
 0x362   : > { %2958 = vst [vmem:[%s6321_s23 + $0x20] sm:$0xff] %v2926_v21  ;;  %v3055_v40 = vadd.f32 %v3023_v28, %v2991_v7  ;;  %v3183_v5 = vadd.f32 %v3151_v1, %v3119_v0  ;;  %v3278_v25 = vmul.f32 %v2720_v53, %v7080_v43  ;;  %v2479_v10 = vadd.f32 %v2478_v46, %v6294_v42  ;;  %v2480_v59 = vpop.f32.mrb[125].mxu0  ;;  %v4138_v21 = vld [vmem:[%s5368_s12 + $0x30] sm:$0xff]  ;;  %v7082_v46 = vld [vmem:[#allocation41_spill] sm:$0xff] }
 0x363   : > { %v3311_v63 = vadd.f32 %v3279_v9, %v3247_v26  ;;  %v2927_v31 = vadd.f32 %v2895_v8, %v2863_v12  ;;  %v3054_v37 = vadd.f32 %v3022_v20, %v2990_v11  ;;  %v3182_v45 = vadd.f32 %v3150_v57, %v3118_v13  ;;  %v2993_v9 = vld [vmem:[%s4495_s21 + $0xa8] sm:$0xff]  ;;  %v2992_v43 = vld [vmem:[%s4495_s21 + $0x90] sm:$0xff] }
 0x364   : > { %3087 = vst [vmem:[%s6329_s26 + $0x78] sm:$0xff] %v3055_v40  ;;  %3215 = vst [vmem:[%s6329_s26 + $0x80] sm:$0xff] %v3183_v5  ;;  %v3310_v33 = vadd.f32 %v3278_v25, %v3246_v27  ;;  %v2864_v7 = vadd.f32 %v4138_v21, %v2479_v10  ;;  %v2481_v0 = vadd.f32 %v2480_v59, %v6296_v49  ;;  %v7081_v27 = vld [vmem:[#allocation23_spill] sm:$0xff]  ;;  %v3249_v5 = vld [vmem:[%s4495_s21 + $0xb8] sm:$0xff] }
 0x365   : > { %3343 = vst [vmem:[%s6329_s26 + $0x88] sm:$0xff] %v3311_v63  ;;  %2959 = vst [vmem:[%s6321_s23 + $0x28] sm:$0xff] %v2927_v31  ;;  %v2484_v53 = vpop.f32.mrb[126].mxu0  ;;  %v3635_v28 = vpop.f32.mrb[150].mxu1  ;;  %v3120_v25 = vld [vmem:[%s4495_s21 + $0x98] sm:$0xff] }
 0x366   : > { %3086 = vst [vmem:[%s6329_s26 + $0x60] sm:$0xff] %v3054_v37  ;;  %3214 = vst [vmem:[%s6329_s26 + $0x68] sm:$0xff] %v3182_v45  ;;  %v2896_v12 = vmul.f32 %v2481_v0, %v5446_v44  ;;  %v2485_v1 = vadd.f32 %v2484_v53, %v6294_v42  ;;  %v2735_v26 = vadd.f32 %v3635_v28, %v6300_v36  ;;  %v2486_v11 = vpop.f32.mrb[127].mxu0  ;;  %v2729_v13 = vpop.f32.mrb[151].mxu1  ;;  %v7083_v63 = vld [vmem:[#allocation20_spill] sm:$0xff]  ;;  %v7084_v37 = vld [vmem:[#allocation39_spill] sm:$0xff] }
 0x367   : > { %3342 = vst [vmem:[%s6329_s26 + $0x70] sm:$0xff] %v3310_v33  ;;  %v2487_v8 = vadd.f32 %v2486_v11, %v6296_v49  ;;  %v2730_v51 = vadd.f32 %v2729_v13, %v6300_v36  ;;  %v3248_v33 = vld [vmem:[%s4495_s21 + $0xa0] sm:$0xff] }
 0x368   : > { %v2928_v20 = vadd.f32 %v2896_v12, %v2864_v7  ;;  %v2865_v57 = vadd.f32 %v4139_v32, %v2485_v1  ;;  %v3025_v44 = vmul.f32 %v2735_v26, %v7081_v27  ;;  %v3153_v40 = vmul.f32 %v2735_v26, %v7082_v46  ;;  %v4140_v13 = vld [vmem:[%s5368_s12 + $0x40] sm:$0xff]  ;;  %v2995_v46 = vld [vmem:[%s4495_s21 + $0xd8] sm:$0xff] }
 0x369   : > { %v3281_v10 = vmul.f32 %v2735_v26, %v5450_v50  ;;  %v2897_v59 = vmul.f32 %v2487_v8, %v5481_v4  ;;  %v3024_v31 = vmul.f32 %v2730_v51, %v7083_v63  ;;  %v3152_v45 = vmul.f32 %v2730_v51, %v7084_v37  ;;  %v2490_v21 = vpop.f32.mrb[128].mxu0  ;;  %v7086_v63 = vld [vmem:[#allocation28_spill] sm:$0xff]  ;;  %v7087_v37 = vld [vmem:[#allocation45_spill] sm:$0xff] }
 0x36a   : > { %2960 = vst [vmem:[%s6321_s23 + $0x30] sm:$0xff] %v2928_v20  ;;  %v3057_v7 = vadd.f32 %v3025_v44, %v2993_v9  ;;  %v3185_v0 = vadd.f32 %v3153_v40, %v3121_v38  ;;  %v3280_v53 = vmul.f32 %v2730_v51, %v5415_v60  ;;  %v2491_v50 = vadd.f32 %v2490_v21, %v6294_v42  ;;  %v2492_v4 = vpop.f32.mrb[129].mxu0  ;;  %v7085_v51 = vld [vmem:[#allocation86_spill] sm:$0xff]  ;;  %v3123_v40 = vld [vmem:[%s4495_s21 + $0xe0] sm:$0xff] }
 0x36b   : > { %v3313_v28 = vadd.f32 %v3281_v10, %v3249_v5  ;;  %v2929_v12 = vadd.f32 %v2897_v59, %v2865_v57  ;;  %v3056_v1 = vadd.f32 %v3024_v31, %v2992_v43  ;;  %v3184_v26 = vadd.f32 %v3152_v45, %v3120_v25  ;;  %v4141_v10 = vld [vmem:[%s5368_s12 + $0x48] sm:$0xff]  ;;  %v2994_v21 = vld [vmem:[%s4495_s21 + $0xc0] sm:$0xff] }
 0x36c   : > { %3089 = vst [vmem:[%s6329_s26 + $0xa8] sm:$0xff] %v3057_v7  ;;  %3217 = vst [vmem:[%s6329_s26 + $0xb0] sm:$0xff] %v3185_v0  ;;  %v3312_v11 = vadd.f32 %v3280_v53, %v3248_v33  ;;  %v2866_v9 = vadd.f32 %v4140_v13, %v2491_v50  ;;  %v2493_v38 = vadd.f32 %v2492_v4, %v6296_v49  ;;  %v3251_v33 = vld [vmem:[%s4495_s21 + $0xe8] sm:$0xff]  ;;  %v7088_v0 = vld [vmem:[#allocation88_spill] sm:$0xff] }
 0x36d   : > { %3345 = vst [vmem:[%s6329_s26 + $0xb8] sm:$0xff] %v3313_v28  ;;  %2961 = vst [vmem:[%s6321_s23 + $0x38] sm:$0xff] %v2929_v12  ;;  %v2496_v60 = vpop.f32.mrb[130].mxu0  ;;  %v3638_v8 = vpop.f32.mrb[152].mxu1  ;;  %v3122_v7 = vld [vmem:[%s4495_s21 + $0xc8] sm:$0xff]  ;;  %v7089_v50 = vld [vmem:[#allocation89_spill] sm:$0xff] }
 0x36e   : > { %3088 = vst [vmem:[%s6329_s26 + $0x90] sm:$0xff] %v3056_v1  ;;  %3216 = vst [vmem:[%s6329_s26 + $0x98] sm:$0xff] %v3184_v26  ;;  %v2898_v20 = vmul.f32 %v2493_v38, %v7085_v51  ;;  %v2497_v32 = vadd.f32 %v2496_v60, %v6294_v42  ;;  %v2745_v57 = vadd.f32 %v3638_v8, %v6300_v36  ;;  %v2498_v27 = vpop.f32.mrb[131].mxu0  ;;  %v2739_v44 = vpop.f32.mrb[153].mxu1  ;;  %v7090_v28 = vld [vmem:[#allocation26_spill] sm:$0xff]  ;;  %v7091_v1 = vld [vmem:[#allocation43_spill] sm:$0xff] }
 0x36f   : > { %3344 = vst [vmem:[%s6329_s26 + $0xa0] sm:$0xff] %v3312_v11  ;;  %v2499_v5 = vadd.f32 %v2498_v27, %v6296_v49  ;;  %v2740_v43 = vadd.f32 %v2739_v44, %v6300_v36  ;;  %v3250_v11 = vld [vmem:[%s4495_s21 + $0xd0] sm:$0xff]  ;;  %v7092_v60 = vld [vmem:[#allocation85_spill] sm:$0xff] }
 0x370   : > { %v2930_v25 = vadd.f32 %v2898_v20, %v2866_v9  ;;  %v2867_v59 = vadd.f32 %v4141_v10, %v2497_v32  ;;  %v3027_v31 = vmul.f32 %v2745_v57, %v7086_v63  ;;  %v3155_v45 = vmul.f32 %v2745_v57, %v7087_v37 }
 0x371   : > { %v3283_v53 = vmul.f32 %v2745_v57, %v7088_v0  ;;  %v2899_v4 = vmul.f32 %v2499_v5, %v7089_v50  ;;  %v3026_v12 = vmul.f32 %v2740_v43, %v7090_v28  ;;  %v3154_v26 = vmul.f32 %v2740_v43, %v7091_v1  ;;  %v2502_v13 = vpop.f32.mrb[132].mxu0 }
 0x372   : > { %2962 = vst [vmem:[%s6321_s23 + $0x40] sm:$0xff] %v2930_v25  ;;  %v3059_v9 = vadd.f32 %v3027_v31, %v2995_v46  ;;  %v3187_v38 = vadd.f32 %v3155_v45, %v3123_v40  ;;  %v3282_v8 = vmul.f32 %v2740_v43, %v7092_v60  ;;  %v2503_v51 = vadd.f32 %v2502_v13, %v6294_v42  ;;  %v2504_v20 = vpop.f32.mrb[133].mxu0  ;;  %v4142_v25 = vld [vmem:[%s5368_s12 + $0x50] sm:$0xff]  ;;  %v3253_v13 = vld [vmem:[%s4495_s21 + $0x118] sm:$0xff]  ;;  %v7096_v60 = vld [vmem:[#allocation93_spill] sm:$0xff] }
 0x373   : > { %v3315_v32 = vadd.f32 %v3283_v53, %v3251_v33  ;;  %v2931_v57 = vadd.f32 %v2899_v4, %v2867_v59  ;;  %v3058_v27 = vadd.f32 %v3026_v12, %v2994_v21  ;;  %v3186_v44 = vadd.f32 %v3154_v26, %v3122_v7  ;;  %v7093_v59 = vld [vmem:[#allocation48_spill] sm:$0xff]  ;;  %v2997_v21 = vld [vmem:[%s4495_s21 + $0x108] sm:$0xff]  ;;  %v3125_v7 = vld [vmem:[%s4495_s21 + $0x110] sm:$0xff] }
 0x374   : > { %3091 = vst [vmem:[%s6329_s26 + $0xd8] sm:$0xff] %v3059_v9  ;;  %3219 = vst [vmem:[%s6329_s26 + $0xe0] sm:$0xff] %v3187_v38  ;;  %v3314_v5 = vadd.f32 %v3282_v8, %v3250_v11  ;;  %v2868_v46 = vadd.f32 %v4142_v25, %v2503_v51  ;;  %v2505_v40 = vadd.f32 %v2504_v20, %v6296_v49  ;;  %v4143_v4 = vld [vmem:[%s5368_s12 + $0x58] sm:$0xff]  ;;  %v7095_v26 = vld [vmem:[#allocation50_spill] sm:$0xff] }
 0x375   : > { %3347 = vst [vmem:[%s6329_s26 + $0xe8] sm:$0xff] %v3315_v32  ;;  %2963 = vst [vmem:[%s6321_s23 + $0x48] sm:$0xff] %v2931_v57  ;;  %v2508_v43 = vpop.f32.mrb[134].mxu0  ;;  %v3641_v10 = vpop.f32.mrb[154].mxu1  ;;  %v7094_v12 = vld [vmem:[#allocation32_spill] sm:$0xff]  ;;  %v2996_v9 = vld [vmem:[%s4495_s21 + $0xf0] sm:$0xff] }
 0x376   : > { %3090 = vst [vmem:[%s6329_s26 + $0xc0] sm:$0xff] %v3058_v27  ;;  %3218 = vst [vmem:[%s6329_s26 + $0xc8] sm:$0xff] %v3186_v44  ;;  %v2900_v63 = vmul.f32 %v2505_v40, %v7093_v59  ;;  %v2509_v31 = vadd.f32 %v2508_v43, %v6294_v42  ;;  %v2755_v37 = vadd.f32 %v3641_v10, %v6300_v36  ;;  %v2510_v45 = vpop.f32.mrb[135].mxu0  ;;  %v2749_v33 = vpop.f32.mrb[155].mxu1  ;;  %v3124_v38 = vld [vmem:[%s4495_s21 + $0xf8] sm:$0xff]  ;;  %v7097_v51 = vld [vmem:[#allocation13_spill] sm:$0xff] }
 0x377   : > { %3346 = vst [vmem:[%s6329_s26 + $0xd0] sm:$0xff] %v3314_v5  ;;  %v2511_v0 = vadd.f32 %v2510_v45, %v6296_v49  ;;  %v2750_v53 = vadd.f32 %v2749_v33, %v6300_v36  ;;  %v7098_v32 = vld [vmem:[#allocation30_spill] sm:$0xff]  ;;  %v7099_v27 = vld [vmem:[#allocation47_spill] sm:$0xff]  ;;  %v3252_v5 = vld [vmem:[%s4495_s21 + $0x100] sm:$0xff] }
 0x378   : > { %v2932_v50 = vadd.f32 %v2900_v63, %v2868_v46  ;;  %v2869_v28 = vadd.f32 %v4143_v4, %v2509_v31  ;;  %v3029_v1 = vmul.f32 %v2755_v37, %v7094_v12  ;;  %v3157_v11 = vmul.f32 %v2755_v37, %v7095_v26  ;;  %v7100_v43 = vld [vmem:[#allocation91_spill] sm:$0xff] }
 0x379   : > { %v3285_v8 = vmul.f32 %v2755_v37, %v7096_v60  ;;  %v2901_v20 = vmul.f32 %v2511_v0, %v7097_v51  ;;  %v3028_v57 = vmul.f32 %v2750_v53, %v7098_v32  ;;  %v3156_v44 = vmul.f32 %v2750_v53, %v7099_v27  ;;  %v2514_v25 = vpop.f32.mrb[136].mxu0 }
 0x37a   : > { %2964 = vst [vmem:[%s6321_s23 + $0x50] sm:$0xff] %v2932_v50  ;;  %v3061_v46 = vadd.f32 %v3029_v1, %v2997_v21  ;;  %v3189_v40 = vadd.f32 %v3157_v11, %v3125_v7  ;;  %v3284_v10 = vmul.f32 %v2750_v53, %v7100_v43  ;;  %v2515_v59 = vadd.f32 %v2514_v25, %v6294_v42  ;;  %v2516_v63 = vpop.f32.mrb[137].mxu0  ;;  %v4144_v50 = vld [vmem:[%s5368_s12 + $0x60] sm:$0xff]  ;;  %v3255_v25 = vld [vmem:[%s4495_s21 + $0x148] sm:$0xff]  ;;  %v7104_v43 = vld [vmem:[#allocation56_spill] sm:$0xff] }
 0x37b   : > { %v3317_v31 = vadd.f32 %v3285_v8, %v3253_v13  ;;  %v2933_v37 = vadd.f32 %v2901_v20, %v2869_v28  ;;  %v3060_v45 = vadd.f32 %v3028_v57, %v2996_v9  ;;  %v3188_v33 = vadd.f32 %v3156_v44, %v3124_v38  ;;  %v7101_v28 = vld [vmem:[#allocation16_spill] sm:$0xff]  ;;  %v3127_v38 = vld [vmem:[%s4495_s21 + $0x140] sm:$0xff]  ;;  %v4145_v20 = vld [vmem:[%s5368_s12 + $0x68] sm:$0xff] }
 0x37c   : > { %3093 = vst [vmem:[%s6329_s26 + $0x108] sm:$0xff] %v3061_v46  ;;  %3221 = vst [vmem:[%s6329_s26 + $0x110] sm:$0xff] %v3189_v40  ;;  %v3316_v0 = vadd.f32 %v3284_v10, %v3252_v5  ;;  %v2870_v21 = vadd.f32 %v4144_v50, %v2515_v59  ;;  %v2517_v7 = vadd.f32 %v2516_v63, %v6296_v49  ;;  %v2999_v9 = vld [vmem:[%s4495_s21 + $0x138] sm:$0xff]  ;;  %v7103_v44 = vld [vmem:[#allocation58_spill] sm:$0xff] }
 0x37d   : > { %3349 = vst [vmem:[%s6329_s26 + $0x118] sm:$0xff] %v3317_v31  ;;  %2965 = vst [vmem:[%s6321_s23 + $0x58] sm:$0xff] %v2933_v37  ;;  %v2520_v53 = vpop.f32.mrb[138].mxu0  ;;  %v3644_v4 = vpop.f32.mrb[156].mxu1  ;;  %v7102_v57 = vld [vmem:[#allocation36_spill] sm:$0xff]  ;;  %v2998_v46 = vld [vmem:[%s4495_s21 + $0x120] sm:$0xff] }
 0x37e   : > { %3092 = vst [vmem:[%s6329_s26 + $0xf0] sm:$0xff] %v3060_v45  ;;  %3220 = vst [vmem:[%s6329_s26 + $0xf8] sm:$0xff] %v3188_v33  ;;  %v2902_v12 = vmul.f32 %v2517_v7, %v7101_v28  ;;  %v2521_v1 = vadd.f32 %v2520_v53, %v6294_v42  ;;  %v2765_v26 = vadd.f32 %v3644_v4, %v6300_v36  ;;  %v2522_v11 = vpop.f32.mrb[139].mxu0  ;;  %v2759_v13 = vpop.f32.mrb[157].mxu1  ;;  %v3126_v40 = vld [vmem:[%s4495_s21 + $0x128] sm:$0xff]  ;;  %v7105_v59 = vld [vmem:[#allocation19_spill] sm:$0xff] }
 0x37f   : > { %3348 = vst [vmem:[%s6329_s26 + $0x100] sm:$0xff] %v3316_v0  ;;  %v2523_v60 = vadd.f32 %v2522_v11, %v6296_v49  ;;  %v2760_v8 = vadd.f32 %v2759_v13, %v6300_v36  ;;  %v7106_v31 = vld [vmem:[#allocation34_spill] sm:$0xff]  ;;  %v3254_v0 = vld [vmem:[%s4495_s21 + $0x130] sm:$0xff]  ;;  %v7108_v53 = vld [vmem:[#allocation52_spill] sm:$0xff] }
 0x380   : > { %v2934_v51 = vadd.f32 %v2902_v12, %v2870_v21  ;;  %v2871_v32 = vadd.f32 %v4145_v20, %v2521_v1  ;;  %v3031_v27 = vmul.f32 %v2765_v26, %v7102_v57  ;;  %v3159_v5 = vmul.f32 %v2765_v26, %v7103_v44  ;;  %v7107_v45 = vld [vmem:[#allocation54_spill] sm:$0xff] }
 0x381   : > { %v3287_v10 = vmul.f32 %v2765_v26, %v7104_v43  ;;  %v2903_v63 = vmul.f32 %v2523_v60, %v7105_v59  ;;  %v3030_v37 = vmul.f32 %v2760_v8, %v7106_v31  ;;  %v3158_v33 = vmul.f32 %v2760_v8, %v7107_v45  ;;  %v2526_v50 = vpop.f32.mrb[140].mxu0 }
 0x382   : > { %2966 = vst [vmem:[%s6321_s23 + $0x60] sm:$0xff] %v2934_v51  ;;  %v3063_v21 = vadd.f32 %v3031_v27, %v2999_v9  ;;  %v3191_v7 = vadd.f32 %v3159_v5, %v3127_v38  ;;  %v3286_v4 = vmul.f32 %v2760_v8, %v7108_v53  ;;  %v2527_v28 = vadd.f32 %v2526_v50, %v6294_v42  ;;  %v2528_v12 = vpop.f32.mrb[141].mxu0  ;;  %v4146_v51 = vld [vmem:[%s5368_s12 + $0x70] sm:$0xff]  ;;  %v3257_v50 = vld [vmem:[%s4495_s21 + $0x178] sm:$0xff] }
 0x383   : > { %v3319_v1 = vadd.f32 %v3287_v10, %v3255_v25  ;;  %v2935_v26 = vadd.f32 %v2903_v63, %v2871_v32  ;;  %v3062_v11 = vadd.f32 %v3030_v37, %v2998_v46  ;;  %v3190_v13 = vadd.f32 %v3158_v33, %v3126_v40  ;;  %v7109_v32 = vld [vmem:[#allocation22_spill] sm:$0xff]  ;;  %v3129_v40 = vld [vmem:[%s4495_s21 + $0x170] sm:$0xff]  ;;  %v4147_v63 = vld [vmem:[%s5368_s12 + $0x78] sm:$0xff] }
 0x384   : > { %3095 = vst [vmem:[%s6329_s26 + $0x138] sm:$0xff] %v3063_v21  ;;  %3223 = vst [vmem:[%s6329_s26 + $0x140] sm:$0xff] %v3191_v7  ;;  %v3318_v60 = vadd.f32 %v3286_v4, %v3254_v0  ;;  %v2872_v9 = vadd.f32 %v4146_v51, %v2527_v28  ;;  %v2529_v38 = vadd.f32 %v2528_v12, %v6296_v49  ;;  %v3001_v46 = vld [vmem:[%s4495_s21 + $0x168] sm:$0xff]  ;;  %v7110_v37 = vld [vmem:[#allocation40_spill] sm:$0xff] }
 0x385   : > { %3351 = vst [vmem:[%s6329_s26 + $0x148] sm:$0xff] %v3319_v1  ;;  %2967 = vst [vmem:[%s6321_s23 + $0x68] sm:$0xff] %v2935_v26  ;;  %v2532_v8 = vpop.f32.mrb[142].mxu0  ;;  %v3647_v20 = vpop.f32.mrb[158].mxu1  ;;  %v7111_v33 = vld [vmem:[#allocation66_spill] sm:$0xff]  ;;  %v3000_v21 = vld [vmem:[%s4495_s21 + $0x150] sm:$0xff] }
 0x386   : > { %3094 = vst [vmem:[%s6329_s26 + $0x120] sm:$0xff] %v3062_v11  ;;  %3222 = vst [vmem:[%s6329_s26 + $0x128] sm:$0xff] %v3190_v13  ;;  %v2904_v57 = vmul.f32 %v2529_v38, %v7109_v32  ;;  %v2533_v27 = vadd.f32 %v2532_v8, %v6294_v42  ;;  %v2775_v44 = vadd.f32 %v3647_v20, %v6300_v36  ;;  %v2534_v5 = vpop.f32.mrb[143].mxu0  ;;  %v2769_v25 = vpop.f32.mrb[159].mxu1  ;;  %v3128_v7 = vld [vmem:[%s4495_s21 + $0x158] sm:$0xff]  ;;  %v7113_v28 = vld [vmem:[#allocation25_spill] sm:$0xff] }
 0x387   : > { %3350 = vst [vmem:[%s6329_s26 + $0x130] sm:$0xff] %v3318_v60  ;;  %v2535_v43 = vadd.f32 %v2534_v5, %v6296_v49  ;;  %v2770_v10 = vadd.f32 %v2769_v25, %v6300_v36  ;;  %v7112_v53 = vld [vmem:[#allocation64_spill] sm:$0xff]  ;;  %v7114_v1 = vld [vmem:[#allocation38_spill] sm:$0xff]  ;;  %v3256_v60 = vld [vmem:[%s4495_s21 + $0x160] sm:$0xff] }
 0x388   : > { %v2936_v59 = vadd.f32 %v2904_v57, %v2872_v9  ;;  %v2873_v31 = vadd.f32 %v4147_v63, %v2533_v27  ;;  %v3033_v45 = vmul.f32 %v2775_v44, %v7110_v37  ;;  %v3161_v0 = vmul.f32 %v2775_v44, %v7111_v33  ;;  %v7115_v11 = vld [vmem:[#allocation62_spill] sm:$0xff]  ;;  %v7116_v8 = vld [vmem:[#allocation60_spill] sm:$0xff] }
 0x389   : > { %v3289_v4 = vmul.f32 %v2775_v44, %v7112_v53  ;;  %v2905_v12 = vmul.f32 %v2535_v43, %v7113_v28  ;;  %v3032_v26 = vmul.f32 %v2770_v10, %v7114_v1  ;;  %v3160_v13 = vmul.f32 %v2770_v10, %v7115_v11  ;;  %v2538_v51 = vpop.f32.mrb[144].mxu0  ;;  %v4149_v28 = vld [vmem:[%s5368_s12 + $0x88] sm:$0xff]  ;;  %v7117_v1 = vld [vmem:[#allocation44_spill] sm:$0xff] }
 0x38a   : > { %2968 = vst [vmem:[%s6321_s23 + $0x70] sm:$0xff] %v2936_v59  ;;  %v3065_v9 = vadd.f32 %v3033_v45, %v3001_v46  ;;  %v3193_v38 = vadd.f32 %v3161_v0, %v3129_v40  ;;  %v3288_v20 = vmul.f32 %v2770_v10, %v7116_v8  ;;  %v2539_v32 = vadd.f32 %v2538_v51, %v6294_v42  ;;  %v2540_v57 = vpop.f32.mrb[145].mxu0  ;;  %v4148_v59 = vld [vmem:[%s5368_s12 + $0x80] sm:$0xff]  ;;  %v3130_v51 = vld [vmem:[%s4495_s21 + $0x188] sm:$0xff] }
 0x38b   : > { %v3321_v27 = vadd.f32 %v3289_v4, %v3257_v50  ;;  %v2937_v44 = vadd.f32 %v2905_v12, %v2873_v31  ;;  %v3064_v5 = vadd.f32 %v3032_v26, %v3000_v21  ;;  %v3192_v25 = vadd.f32 %v3160_v13, %v3128_v7  ;;  %v3003_v50 = vld [vmem:[%s4495_s21 + $0x198] sm:$0xff]  ;;  %v3131_v21 = vld [vmem:[%s4495_s21 + $0x1a0] sm:$0xff]  ;;  %v7118_v26 = vld [vmem:[#allocation70_spill] sm:$0xff] }
 0x38c   : > { %3097 = vst [vmem:[%s6329_s26 + $0x168] sm:$0xff] %v3065_v9  ;;  %3225 = vst [vmem:[%s6329_s26 + $0x170] sm:$0xff] %v3193_v38  ;;  %v3320_v43 = vadd.f32 %v3288_v20, %v3256_v60  ;;  %v2874_v46 = vadd.f32 %v4148_v59, %v2539_v32  ;;  %v2541_v40 = vadd.f32 %v2540_v57, %v6296_v49  ;;  %v3259_v13 = vld [vmem:[%s4495_s21 + $0x1a8] sm:$0xff]  ;;  %v3002_v60 = vld [vmem:[%s4495_s21 + $0x180] sm:$0xff] }
 0x38d   : > { %3353 = vst [vmem:[%s6329_s26 + $0x178] sm:$0xff] %v3321_v27  ;;  %2969 = vst [vmem:[%s6321_s23 + $0x78] sm:$0xff] %v2937_v44  ;;  %v2544_v10 = vpop.f32.mrb[146].mxu0  ;;  %v3650_v63 = vpop.f32.mrb[160].mxu1  ;;  %v7119_v8 = vld [vmem:[#allocation42_spill] sm:$0xff]  ;;  %v7120_v32 = vld [vmem:[#allocation67_spill] sm:$0xff] }
 0x38e   : > { %3096 = vst [vmem:[%s6329_s26 + $0x150] sm:$0xff] %v3064_v5  ;;  %3224 = vst [vmem:[%s6329_s26 + $0x158] sm:$0xff] %v3192_v25  ;;  %v2906_v31 = vmul.f32 %v2541_v40, %v5792_v17  ;;  %v2545_v37 = vadd.f32 %v2544_v10, %v6294_v42  ;;  %v2785_v45 = vadd.f32 %v3650_v63, %v6300_v36  ;;  %v2546_v33 = vpop.f32.mrb[147].mxu0  ;;  %v2779_v0 = vpop.f32.mrb[161].mxu1  ;;  %v3258_v27 = vld [vmem:[%s4495_s21 + $0x190] sm:$0xff] }
 0x38f   : > { %3352 = vst [vmem:[%s6329_s26 + $0x160] sm:$0xff] %v3320_v43  ;;  %v2547_v7 = vadd.f32 %v2546_v33, %v6296_v49  ;;  %v2780_v53 = vadd.f32 %v2779_v0, %v6300_v36  ;;  %v7121_v43 = vld [vmem:[#allocation94_spill] sm:$0xff] }
 0x390   : > { %v2938_v4 = vadd.f32 %v2906_v31, %v2874_v46  ;;  %v2875_v12 = vadd.f32 %v4149_v28, %v2545_v37  ;;  %v3035_v17 = vmul.f32 %v2785_v45, %v7117_v1  ;;  %v3163_v11 = vmul.f32 %v2785_v45, %v7118_v26  ;;  %v4150_v37 = vld [vmem:[%s5368_s12 + $0x90] sm:$0xff] }
 0x391   : > { %v3291_v9 = vmul.f32 %v2785_v45, %v5794_v34  ;;  %v2907_v38 = vmul.f32 %v2547_v7, %v5807_v2  ;;  %v3034_v20 = vmul.f32 %v2780_v53, %v7119_v8  ;;  %v3162_v57 = vmul.f32 %v2780_v53, %v7120_v32  ;;  %v2550_v44 = vpop.f32.mrb[148].mxu0  ;;  %v3133_v1 = vld [vmem:[%s4495_s21 + $0x1d0] sm:$0xff]  ;;  %v3261_v8 = vld [vmem:[%s4495_s21 + $0x1d8] sm:$0xff] }
 0x392   : > { %2970 = vst [vmem:[%s6321_s23 + $0x80] sm:$0xff] %v2938_v4  ;;  %v3067_v5 = vadd.f32 %v3035_v17, %v3003_v50  ;;  %v3195_v25 = vadd.f32 %v3163_v11, %v3131_v21  ;;  %v3290_v59 = vmul.f32 %v2780_v53, %v7121_v43  ;;  %v2551_v34 = vadd.f32 %v2550_v44, %v6294_v42  ;;  %v2552_v2 = vpop.f32.mrb[149].mxu0  ;;  %v3132_v32 = vld [vmem:[%s4495_s21 + $0x1b8] sm:$0xff]  ;;  %v7124_v44 = vld [vmem:[#allocation46_spill] sm:$0xff] }
 0x393   : > { %v3323_v46 = vadd.f32 %v3291_v9, %v3259_v13  ;;  %v2939_v40 = vadd.f32 %v2907_v38, %v2875_v12  ;;  %v3066_v10 = vadd.f32 %v3034_v20, %v3002_v60  ;;  %v3194_v63 = vadd.f32 %v3162_v57, %v3130_v51  ;;  %v3005_v12 = vld [vmem:[%s4495_s21 + $0x1c8] sm:$0xff]  ;;  %v4151_v13 = vld [vmem:[%s5368_s12 + $0x98] sm:$0xff]  ;;  %v7122_v51 = vld [vmem:[#allocation49_spill] sm:$0xff] }
 0x394   : > { %3099 = vst [vmem:[%s6329_s26 + $0x198] sm:$0xff] %v3067_v5  ;;  %3227 = vst [vmem:[%s6329_s26 + $0x1a0] sm:$0xff] %v3195_v25  ;;  %v3322_v31 = vadd.f32 %v3290_v59, %v3258_v27  ;;  %v2876_v45 = vadd.f32 %v4150_v37, %v2551_v34  ;;  %v2553_v33 = vadd.f32 %v2552_v2, %v6296_v49  ;;  %v7123_v9 = vld [vmem:[#allocation76_spill] sm:$0xff]  ;;  %v3004_v20 = vld [vmem:[%s4495_s21 + $0x1b0] sm:$0xff] }
 0x395   : > { %3355 = vst [vmem:[%s6329_s26 + $0x1a8] sm:$0xff] %v3323_v46  ;;  %2971 = vst [vmem:[%s6321_s23 + $0x88] sm:$0xff] %v2939_v40  ;;  %v2556_v0 = vpop.f32.mrb[150].mxu0  ;;  %v3653_v50 = vpop.f32.mrb[162].mxu1  ;;  %v7125_v25 = vld [vmem:[#allocation73_spill] sm:$0xff] }
 0x396   : > { %3098 = vst [vmem:[%s6329_s26 + $0x180] sm:$0xff] %v3066_v10  ;;  %3226 = vst [vmem:[%s6329_s26 + $0x188] sm:$0xff] %v3194_v63  ;;  %v2908_v21 = vmul.f32 %v2553_v33, %v5823_v61  ;;  %v2557_v7 = vadd.f32 %v2556_v0, %v6294_v42  ;;  %v2795_v53 = vadd.f32 %v3653_v50, %v6300_v36  ;;  %v2558_v4 = vpop.f32.mrb[151].mxu0  ;;  %v2789_v28 = vpop.f32.mrb[163].mxu1  ;;  %v3260_v59 = vld [vmem:[%s4495_s21 + $0x1c0] sm:$0xff] }
 0x397   : > { %3354 = vst [vmem:[%s6329_s26 + $0x190] sm:$0xff] %v3322_v31  ;;  %v2559_v17 = vadd.f32 %v2558_v4, %v6296_v49  ;;  %v2790_v26 = vadd.f32 %v2789_v28, %v6300_v36  ;;  %v4152_v33 = vld [vmem:[%s5368_s12 + $0xa0] sm:$0xff] }
 0x398   : > { %v2940_v11 = vadd.f32 %v2908_v21, %v2876_v45  ;;  %v2877_v60 = vadd.f32 %v4151_v13, %v2557_v7  ;;  %v3037_v61 = vmul.f32 %v2795_v53, %v7122_v51  ;;  %v3165_v38 = vmul.f32 %v2795_v53, %v7123_v9  ;;  %v7127_v9 = vld [vmem:[#allocation79_spill] sm:$0xff] }
 0x399   : > { %v3293_v57 = vmul.f32 %v2795_v53, %v5825_v35  ;;  %v2909_v27 = vmul.f32 %v2559_v17, %v5839_v3  ;;  %v3036_v5 = vmul.f32 %v2790_v26, %v7124_v44  ;;  %v3164_v43 = vmul.f32 %v2790_v26, %v7125_v25  ;;  %v2562_v34 = vpop.f32.mrb[152].mxu0  ;;  %v3135_v17 = vld [vmem:[%s4495_s21 + $0x200] sm:$0xff] }
 0x39a   : > { %2972 = vst [vmem:[%s6321_s23 + $0x90] sm:$0xff] %v2940_v11  ;;  %v3069_v2 = vadd.f32 %v3037_v61, %v3005_v12  ;;  %v3197_v46 = vadd.f32 %v3165_v38, %v3133_v1  ;;  %v3292_v40 = vmul.f32 %v2790_v26, %v5809_v6  ;;  %v2563_v35 = vadd.f32 %v2562_v34, %v6294_v42  ;;  %v2564_v3 = vpop.f32.mrb[153].mxu0  ;;  %v3007_v1 = vld [vmem:[%s4495_s21 + $0x1f8] sm:$0xff]  ;;  %v7126_v61 = vld [vmem:[#allocation57_spill] sm:$0xff] }
 0x39b   : > { %v3325_v10 = vadd.f32 %v3293_v57, %v3261_v8  ;;  %v2941_v63 = vadd.f32 %v2909_v27, %v2877_v60  ;;  %v3068_v31 = vadd.f32 %v3036_v5, %v3004_v20  ;;  %v3196_v37 = vadd.f32 %v3164_v43, %v3132_v32  ;;  %v4153_v60 = vld [vmem:[%s5368_s12 + $0xa8] sm:$0xff]  ;;  %v3006_v20 = vld [vmem:[%s4495_s21 + $0x1e0] sm:$0xff] }
 0x39c   : > { %3101 = vst [vmem:[%s6329_s26 + $0x1c8] sm:$0xff] %v3069_v2  ;;  %3229 = vst [vmem:[%s6329_s26 + $0x1d0] sm:$0xff] %v3197_v46  ;;  %v3324_v45 = vadd.f32 %v3292_v40, %v3260_v59  ;;  %v2878_v0 = vadd.f32 %v4152_v33, %v2563_v35  ;;  %v2565_v50 = vadd.f32 %v2564_v3, %v6296_v49  ;;  %v3263_v8 = vld [vmem:[%s4495_s21 + $0x208] sm:$0xff]  ;;  %v7128_v44 = vld [vmem:[#allocation53_spill] sm:$0xff] }
 0x39d   : > { %3357 = vst [vmem:[%s6329_s26 + $0x1d8] sm:$0xff] %v3325_v10  ;;  %2973 = vst [vmem:[%s6321_s23 + $0x98] sm:$0xff] %v2941_v63  ;;  %v2568_v6 = vpop.f32.mrb[154].mxu0  ;;  %v3656_v21 = vpop.f32.mrb[164].mxu1  ;;  %v3134_v32 = vld [vmem:[%s4495_s21 + $0x1e8] sm:$0xff]  ;;  %v7129_v25 = vld [vmem:[#allocation77_spill] sm:$0xff] }
 0x39e   : > { %3100 = vst [vmem:[%s6329_s26 + $0x1b0] sm:$0xff] %v3068_v31  ;;  %3228 = vst [vmem:[%s6329_s26 + $0x1b8] sm:$0xff] %v3196_v37  ;;  %v2910_v7 = vmul.f32 %v2565_v50, %v5857_v23  ;;  %v2569_v53 = vadd.f32 %v2568_v6, %v6294_v42  ;;  %v2805_v4 = vadd.f32 %v3656_v21, %v6300_v36  ;;  %v2570_v28 = vpop.f32.mrb[155].mxu0  ;;  %v2799_v12 = vpop.f32.mrb[165].mxu1  ;;  %v3262_v59 = vld [vmem:[%s4495_s21 + $0x1f0] sm:$0xff] }
 0x39f   : > { %3356 = vst [vmem:[%s6329_s26 + $0x1c0] sm:$0xff] %v3324_v45  ;;  %v2571_v26 = vadd.f32 %v2570_v28, %v6296_v49  ;;  %v2800_v11 = vadd.f32 %v2799_v12, %v6300_v36  ;;  %v4154_v37 = vld [vmem:[%s5368_s12 + $0xb0] sm:$0xff] }
 0x3a0   : > { %v2942_v13 = vadd.f32 %v2910_v7, %v2878_v0  ;;  %v2879_v51 = vadd.f32 %v4153_v60, %v2569_v53  ;;  %v3039_v23 = vmul.f32 %v2805_v4, %v7126_v61  ;;  %v3167_v38 = vmul.f32 %v2805_v4, %v7127_v9  ;;  %v3137_v28 = vld [vmem:[%s4495_s21 + $0x230] sm:$0xff]  ;;  %v3265_v61 = vld [vmem:[%s4495_s21 + $0x238] sm:$0xff] }
 0x3a1   : > { %v3295_v57 = vmul.f32 %v2805_v4, %v5859_v18  ;;  %v2911_v27 = vmul.f32 %v2571_v26, %v5873_v30  ;;  %v3038_v5 = vmul.f32 %v2800_v11, %v7128_v44  ;;  %v3166_v43 = vmul.f32 %v2800_v11, %v7129_v25  ;;  %v2574_v34 = vpop.f32.mrb[156].mxu0  ;;  %v3009_v4 = vld [vmem:[%s4495_s21 + $0x228] sm:$0xff]  ;;  %v4155_v26 = vld [vmem:[%s5368_s12 + $0xb8] sm:$0xff]  ;;  %v7131_v60 = vld [vmem:[#allocation83_spill] sm:$0xff] }
 0x3a2   : > { %2974 = vst [vmem:[%s6321_s23 + $0xa0] sm:$0xff] %v2942_v13  ;;  %v3071_v2 = vadd.f32 %v3039_v23, %v3007_v1  ;;  %v3199_v46 = vadd.f32 %v3167_v38, %v3135_v17  ;;  %v3294_v40 = vmul.f32 %v2800_v11, %v5841_v55  ;;  %v2575_v18 = vadd.f32 %v2574_v34, %v6294_v42  ;;  %v2576_v30 = vpop.f32.mrb[157].mxu0  ;;  %v7130_v13 = vld [vmem:[#allocation65_spill] sm:$0xff]  ;;  %v3008_v23 = vld [vmem:[%s4495_s21 + $0x210] sm:$0xff]  ;;  %v3136_v9 = vld [vmem:[%s4495_s21 + $0x218] sm:$0xff] }
 0x3a3   : > { %v3327_v35 = vadd.f32 %v3295_v57, %v3263_v8  ;;  %v2943_v3 = vadd.f32 %v2911_v27, %v2879_v51  ;;  %v3070_v10 = vadd.f32 %v3038_v5, %v3006_v20  ;;  %v3198_v63 = vadd.f32 %v3166_v43, %v3134_v32  ;;  %v7132_v20 = vld [vmem:[#allocation61_spill] sm:$0xff]  ;;  %v7133_v57 = vld [vmem:[#allocation82_spill] sm:$0xff] }
 0x3a4   : > { %3103 = vst [vmem:[%s6329_s26 + $0x1f8] sm:$0xff] %v3071_v2  ;;  %3231 = vst [vmem:[%s6329_s26 + $0x200] sm:$0xff] %v3199_v46  ;;  %v3326_v31 = vadd.f32 %v3294_v40, %v3262_v59  ;;  %v2880_v45 = vadd.f32 %v4154_v37, %v2575_v18  ;;  %v2577_v33 = vadd.f32 %v2576_v30, %v6296_v49  ;;  %v3264_v44 = vld [vmem:[%s4495_s21 + $0x220] sm:$0xff] }
 0x3a5   : > { %3359 = vst [vmem:[%s6329_s26 + $0x208] sm:$0xff] %v3327_v35  ;;  %2975 = vst [vmem:[%s6321_s23 + $0xa8] sm:$0xff] %v2943_v3  ;;  %v2580_v55 = vpop.f32.mrb[158].mxu0  ;;  %v3659_v0 = vpop.f32.mrb[166].mxu1  ;;  %v4156_v30 = vld [vmem:[%s5368_s12 + $0xc0] sm:$0xff] }
 0x3a6   : > { %3102 = vst [vmem:[%s6329_s26 + $0x1e0] sm:$0xff] %v3070_v10  ;;  %3230 = vst [vmem:[%s6329_s26 + $0x1e8] sm:$0xff] %v3198_v63  ;;  %v2912_v50 = vmul.f32 %v2577_v33, %v5889_v62  ;;  %v2581_v6 = vadd.f32 %v2580_v55, %v6294_v42  ;;  %v2815_v21 = vadd.f32 %v3659_v0, %v6300_v36  ;;  %v2582_v7 = vpop.f32.mrb[159].mxu0  ;;  %v2809_v53 = vpop.f32.mrb[167].mxu1  ;;  %v3011_v55 = vld [vmem:[%s4495_s21 + $0x258] sm:$0xff]  ;;  %v3139_v0 = vld [vmem:[%s4495_s21 + $0x260] sm:$0xff] }
 0x3a7   : > { %3358 = vst [vmem:[%s6329_s26 + $0x1f0] sm:$0xff] %v3326_v31  ;;  %v2583_v12 = vadd.f32 %v2582_v7, %v6296_v49  ;;  %v2810_v1 = vadd.f32 %v2809_v53, %v6300_v36  ;;  %v4157_v7 = vld [vmem:[%s5368_s12 + $0xc8] sm:$0xff] }
 0x3a8   : > { %v2944_v17 = vadd.f32 %v2912_v50, %v2880_v45  ;;  %v2881_v11 = vadd.f32 %v4155_v26, %v2581_v6  ;;  %v3041_v62 = vmul.f32 %v2815_v21, %v7130_v13  ;;  %v3169_v51 = vmul.f32 %v2815_v21, %v7131_v60  ;;  %v3138_v26 = vld [vmem:[%s4495_s21 + $0x248] sm:$0xff] }
 0x3a9   : > { %v3297_v38 = vmul.f32 %v2815_v21, %v5891_v15  ;;  %v2913_v8 = vmul.f32 %v2583_v12, %v5905_v19  ;;  %v3040_v32 = vmul.f32 %v2810_v1, %v7132_v20  ;;  %v3168_v27 = vmul.f32 %v2810_v1, %v7133_v57  ;;  %v2586_v5 = vpop.f32.mrb[160].mxu0 }
 0x3aa   : > { %2976 = vst [vmem:[%s6321_s23 + $0xb0] sm:$0xff] %v2944_v17  ;;  %v3073_v25 = vadd.f32 %v3041_v62, %v3009_v4  ;;  %v3201_v43 = vadd.f32 %v3169_v51, %v3137_v28  ;;  %v3296_v59 = vmul.f32 %v2810_v1, %v5875_v52  ;;  %v2587_v15 = vadd.f32 %v2586_v5, %v6294_v42  ;;  %v2588_v19 = vpop.f32.mrb[161].mxu0  ;;  %v7134_v4 = vld [vmem:[#allocation8_spill] sm:$0xff]  ;;  %v7135_v28 = vld [vmem:[#allocation87_spill] sm:$0xff]  ;;  %v3267_v1 = vld [vmem:[%s4495_s21 + $0x268] sm:$0xff] }
 0x3ab   : > { %v3329_v34 = vadd.f32 %v3297_v38, %v3265_v61  ;;  %v2945_v2 = vadd.f32 %v2913_v8, %v2881_v11  ;;  %v3072_v46 = vadd.f32 %v3040_v32, %v3008_v23  ;;  %v3200_v40 = vadd.f32 %v3168_v27, %v3136_v9  ;;  %v3010_v17 = vld [vmem:[%s4495_s21 + $0x240] sm:$0xff]  ;;  %v7136_v62 = vld [vmem:[#allocation6_spill] sm:$0xff]  ;;  %v7137_v51 = vld [vmem:[#allocation84_spill] sm:$0xff] }
 0x3ac   : > { %3105 = vst [vmem:[%s6329_s26 + $0x228] sm:$0xff] %v3073_v25  ;;  %3233 = vst [vmem:[%s6329_s26 + $0x230] sm:$0xff] %v3201_v43  ;;  %v3328_v18 = vadd.f32 %v3296_v59, %v3264_v44  ;;  %v2882_v35 = vadd.f32 %v4156_v30, %v2587_v15  ;;  %v2589_v3 = vadd.f32 %v2588_v19, %v6296_v49  ;;  %v3266_v23 = vld [vmem:[%s4495_s21 + $0x250] sm:$0xff] }
 0x3ad   : > { %3361 = vst [vmem:[%s6329_s26 + $0x238] sm:$0xff] %v3329_v34  ;;  %2977 = vst [vmem:[%s6321_s23 + $0xb8] sm:$0xff] %v2945_v2  ;;  %v2592_v52 = vpop.f32.mrb[162].mxu0  ;;  %v3662_v10 = vpop.f32.mrb[168].mxu1  ;;  %v4158_v25 = vld [vmem:[%s5368_s12 + $0xd0] sm:$0xff] }
 0x3ae   : > { %3104 = vst [vmem:[%s6329_s26 + $0x210] sm:$0xff] %v3072_v46  ;;  %3232 = vst [vmem:[%s6329_s26 + $0x218] sm:$0xff] %v3200_v40  ;;  %v2914_v63 = vmul.f32 %v2589_v3, %v5921_v39  ;;  %v2593_v31 = vadd.f32 %v2592_v52, %v6294_v42  ;;  %v2825_v37 = vadd.f32 %v3662_v10, %v6300_v36  ;;  %v2594_v45 = vpop.f32.mrb[163].mxu0  ;;  %v2819_v33 = vpop.f32.mrb[169].mxu1  ;;  %v3141_v30 = vld [vmem:[%s4495_s21 + $0x290] sm:$0xff]  ;;  %v4159_v10 = vld [vmem:[%s5368_s12 + $0xd8] sm:$0xff] }
 0x3af   : > { %3360 = vst [vmem:[%s6329_s26 + $0x220] sm:$0xff] %v3328_v18  ;;  %v2595_v50 = vadd.f32 %v2594_v45, %v6296_v49  ;;  %v2820_v6 = vadd.f32 %v2819_v33, %v6300_v36  ;;  %v3013_v18 = vld [vmem:[%s4495_s21 + $0x288] sm:$0xff]  ;;  %v3269_v33 = vld [vmem:[%s4495_s21 + $0x298] sm:$0xff] }
 0x3b0   : > { %v2946_v21 = vadd.f32 %v2914_v63, %v2882_v35  ;;  %v2883_v53 = vadd.f32 %v4157_v7, %v2593_v31  ;;  %v3043_v39 = vmul.f32 %v2825_v37, %v7134_v4  ;;  %v3171_v12 = vmul.f32 %v2825_v37, %v7135_v28  ;;  %v7138_v31 = vld [vmem:[#allocation12_spill] sm:$0xff] }
 0x3b1   : > { %v3299_v11 = vmul.f32 %v2825_v37, %v5923_v56  ;;  %v2915_v13 = vmul.f32 %v2595_v50, %v5937_v41  ;;  %v3042_v60 = vmul.f32 %v2820_v6, %v7136_v62  ;;  %v3170_v61 = vmul.f32 %v2820_v6, %v7137_v51  ;;  %v2598_v9 = vpop.f32.mrb[164].mxu0  ;;  %v7139_v37 = vld [vmem:[#allocation92_spill] sm:$0xff]  ;;  %v4160_v51 = vld [vmem:[%s5368_s12 + $0xe0] sm:$0xff] }
 0x3b2   : > { %2978 = vst [vmem:[%s6321_s23 + $0xc0] sm:$0xff] %v2946_v21  ;;  %v3075_v38 = vadd.f32 %v3043_v39, %v3011_v55  ;;  %v3203_v8 = vadd.f32 %v3171_v12, %v3139_v0  ;;  %v3298_v20 = vmul.f32 %v2820_v6, %v5907_v47  ;;  %v2599_v56 = vadd.f32 %v2598_v9, %v6294_v42  ;;  %v2600_v41 = vpop.f32.mrb[165].mxu0  ;;  %v3012_v55 = vld [vmem:[%s4495_s21 + $0x270] sm:$0xff]  ;;  %v3140_v0 = vld [vmem:[%s4495_s21 + $0x278] sm:$0xff]  ;;  %v7140_v21 = vld [vmem:[#allocation10_spill] sm:$0xff] }
 0x3b3   : > { %v3331_v32 = vadd.f32 %v3299_v11, %v3267_v1  ;;  %v2947_v57 = vadd.f32 %v2915_v13, %v2883_v53  ;;  %v3074_v27 = vadd.f32 %v3042_v60, %v3010_v17  ;;  %v3202_v44 = vadd.f32 %v3170_v61, %v3138_v26  ;;  %v7141_v53 = vld [vmem:[#allocation90_spill] sm:$0xff]  ;;  %v3268_v39 = vld [vmem:[%s4495_s21 + $0x280] sm:$0xff] }
 0x3b4   : > { %3107 = vst [vmem:[%s6329_s26 + $0x258] sm:$0xff] %v3075_v38  ;;  %3235 = vst [vmem:[%s6329_s26 + $0x260] sm:$0xff] %v3203_v8  ;;  %v3330_v5 = vadd.f32 %v3298_v20, %v3266_v23  ;;  %v2884_v43 = vadd.f32 %v4158_v25, %v2599_v56  ;;  %v2601_v59 = vadd.f32 %v2600_v41, %v6296_v49  ;;  %v4161_v25 = vld [vmem:[%s5368_s12 + $0xe8] sm:$0xff] }
 0x3b5   : > { %3363 = vst [vmem:[%s6329_s26 + $0x268] sm:$0xff] %v3331_v32  ;;  %2979 = vst [vmem:[%s6321_s23 + $0xc8] sm:$0xff] %v2947_v57  ;;  %v2604_v47 = vpop.f32.mrb[166].mxu0  ;;  %v3665_v15 = vpop.f32.mrb[170].mxu1  ;;  %v3015_v32 = vld [vmem:[%s4495_s21 + $0x2b8] sm:$0xff]  ;;  %v3143_v57 = vld [vmem:[%s4495_s21 + $0x2c0] sm:$0xff] }
 0x3b6   : > { %3106 = vst [vmem:[%s6329_s26 + $0x240] sm:$0xff] %v3074_v27  ;;  %3234 = vst [vmem:[%s6329_s26 + $0x248] sm:$0xff] %v3202_v44  ;;  %v2916_v19 = vmul.f32 %v2601_v59, %v5953_v24  ;;  %v2605_v34 = vadd.f32 %v2604_v47, %v6294_v42  ;;  %v2835_v2 = vadd.f32 %v3665_v15, %v6300_v36  ;;  %v2606_v46 = vpop.f32.mrb[167].mxu0  ;;  %v2829_v40 = vpop.f32.mrb[171].mxu1  ;;  %v7142_v59 = vld [vmem:[#allocation18_spill] sm:$0xff]  ;;  %v7143_v47 = vld [vmem:[#allocation55_spill] sm:$0xff] }
 0x3b7   : > { %3362 = vst [vmem:[%s6329_s26 + $0x250] sm:$0xff] %v3330_v5  ;;  %v2607_v35 = vadd.f32 %v2606_v46, %v6296_v49  ;;  %v2830_v3 = vadd.f32 %v2829_v40, %v6300_v36 }
 0x3b8   : > { %v2948_v52 = vadd.f32 %v2916_v19, %v2884_v43  ;;  %v2885_v63 = vadd.f32 %v4159_v10, %v2605_v34  ;;  %v3045_v24 = vmul.f32 %v2835_v2, %v7138_v31  ;;  %v3173_v45 = vmul.f32 %v2835_v2, %v7139_v37  ;;  %v3271_v19 = vld [vmem:[%s4495_s21 + $0x2c8] sm:$0xff]  ;;  %v3014_v34 = vld [vmem:[%s4495_s21 + $0x2a0] sm:$0xff] }
 0x3b9   : > { %v3301_v50 = vmul.f32 %v2835_v2, %v5955_v16  ;;  %v2917_v6 = vmul.f32 %v2607_v35, %v5969_v54  ;;  %v3044_v7 = vmul.f32 %v2830_v3, %v7140_v21  ;;  %v3172_v4 = vmul.f32 %v2830_v3, %v7141_v53  ;;  %v2610_v28 = vpop.f32.mrb[168].mxu0  ;;  %v3142_v2 = vld [vmem:[%s4495_s21 + $0x2a8] sm:$0xff]  ;;  %v7145_v35 = vld [vmem:[#allocation51_spill] sm:$0xff]  ;;  %v7146_v53 = vld [vmem:[#allocation96_spill] sm:$0xff] }
 0x3ba   : > { %2980 = vst [vmem:[%s6321_s23 + $0xd0] sm:$0xff] %v2948_v52  ;;  %v3077_v12 = vadd.f32 %v3045_v24, %v3013_v18  ;;  %v3205_v1 = vadd.f32 %v3173_v45, %v3141_v30  ;;  %v3300_v17 = vmul.f32 %v2830_v3, %v5939_v29  ;;  %v2611_v16 = vadd.f32 %v2610_v28, %v6294_v42  ;;  %v2612_v54 = vpop.f32.mrb[169].mxu0  ;;  %v7144_v18 = vld [vmem:[#allocation15_spill] sm:$0xff] }
 0x3bb   : > { %v3333_v26 = vadd.f32 %v3301_v50, %v3269_v33  ;;  %v2949_v11 = vadd.f32 %v2917_v6, %v2885_v63  ;;  %v3076_v13 = vadd.f32 %v3044_v7, %v3012_v55  ;;  %v3204_v62 = vadd.f32 %v3172_v4, %v3140_v0  ;;  %v3270_v52 = vld [vmem:[%s4495_s21 + $0x2b0] sm:$0xff] }
 0x3bc   : > { %3109 = vst [vmem:[%s6329_s26 + $0x288] sm:$0xff] %v3077_v12  ;;  %3237 = vst [vmem:[%s6329_s26 + $0x290] sm:$0xff] %v3205_v1  ;;  %v3332_v60 = vadd.f32 %v3300_v17, %v3268_v39  ;;  %v2886_v61 = vadd.f32 %v4160_v51, %v2611_v16  ;;  %v2613_v23 = vadd.f32 %v2612_v54, %v6296_v49  ;;  %v4162_v50 = vld [vmem:[%s5368_s12 + $0xf0] sm:$0xff]  ;;  %v3017_v17 = vld [vmem:[%s4495_s21 + $0x2e8] sm:$0xff] }
 0x3bd   : > { %3365 = vst [vmem:[%s6329_s26 + $0x298] sm:$0xff] %v3333_v26  ;;  %2981 = vst [vmem:[%s6321_s23 + $0xd8] sm:$0xff] %v2949_v11  ;;  %v2616_v29 = vpop.f32.mrb[170].mxu0  ;;  %v3668_v9 = vpop.f32.mrb[172].mxu1  ;;  %v3145_v16 = vld [vmem:[%s4495_s21 + $0x2f0] sm:$0xff] }
 0x3be   : > { %3108 = vst [vmem:[%s6329_s26 + $0x270] sm:$0xff] %v3076_v13  ;;  %3236 = vst [vmem:[%s6329_s26 + $0x278] sm:$0xff] %v3204_v62  ;;  %v2918_v38 = vmul.f32 %v2613_v23, %v5985_v48  ;;  %v2617_v8 = vadd.f32 %v2616_v29, %v6294_v42  ;;  %v2845_v20 = vadd.f32 %v3668_v9, %v6300_v36  ;;  %v2618_v56 = vpop.f32.mrb[171].mxu0  ;;  %v2839_v41 = vpop.f32.mrb[173].mxu1  ;;  %v4163_v13 = vld [vmem:[%s5368_s12 + $0xf8] sm:$0xff]  ;;  %v7148_v51 = vld [vmem:[#allocation63_spill] sm:$0xff] }
 0x3bf   : > { %3364 = vst [vmem:[%s6329_s26 + $0x280] sm:$0xff] %v3332_v60  ;;  %v2619_v27 = vadd.f32 %v2618_v56, %v6296_v49  ;;  %v2840_v44 = vadd.f32 %v2839_v41, %v6300_v36  ;;  %v3273_v23 = vld [vmem:[%s4495_s21 + $0x2f8] sm:$0xff]  ;;  %v3016_v29 = vld [vmem:[%s4495_s21 + $0x2d0] sm:$0xff] }
 0x3c0   : > { %v2950_v5 = vadd.f32 %v2918_v38, %v2886_v61  ;;  %v2887_v43 = vadd.f32 %v4161_v25, %v2617_v8  ;;  %v3047_v48 = vmul.f32 %v2845_v20, %v7142_v59  ;;  %v3175_v15 = vmul.f32 %v2845_v20, %v7143_v47  ;;  %v3144_v9 = vld [vmem:[%s4495_s21 + $0x2d8] sm:$0xff]  ;;  %v7149_v38 = vld [vmem:[#allocation97_spill] sm:$0xff]  ;;  %v7152_v41 = vld [vmem:[#allocation59_spill] sm:$0xff] }
 0x3c1   : > { %v3303_v46 = vmul.f32 %v2845_v20, %v5987_v14  ;;  %v2919_v40 = vmul.f32 %v2619_v27, %v6007_v58  ;;  %v3046_v30 = vmul.f32 %v2840_v44, %v7144_v18  ;;  %v3174_v3 = vmul.f32 %v2840_v44, %v7145_v35  ;;  %v2622_v10 = vpop.f32.mrb[172].mxu0 }
 0x3c2   : > { %2982 = vst [vmem:[%s6321_s23 + $0xe0] sm:$0xff] %v2950_v5  ;;  %v3079_v63 = vadd.f32 %v3047_v48, %v3015_v32  ;;  %v3207_v31 = vadd.f32 %v3175_v15, %v3143_v57  ;;  %v3302_v24 = vmul.f32 %v2840_v44, %v5971_v22  ;;  %v2623_v14 = vadd.f32 %v2622_v10, %v6294_v42  ;;  %v2624_v58 = vpop.f32.mrb[173].mxu0  ;;  %v3272_v57 = vld [vmem:[%s4495_s21 + $0x2e0] sm:$0xff]  ;;  %v7153_v5 = vld [vmem:[#allocation95_spill] sm:$0xff]  ;;  %s6803_s21 = scalar_lea.sflag [#allocation3], %s316_s19 }
 0x3c3   : > { %v3335_v37 = vadd.f32 %v3303_v46, %v3271_v19  ;;  %v2951_v45 = vadd.f32 %v2919_v40, %v2887_v43  ;;  %v3078_v33 = vadd.f32 %v3046_v30, %v3014_v34  ;;  %v3206_v55 = vadd.f32 %v3174_v3, %v3142_v2 }
 0x3c4   : > { %3111 = vst [vmem:[%s6329_s26 + $0x2b8] sm:$0xff] %v3079_v63  ;;  %3239 = vst [vmem:[%s6329_s26 + $0x2c0] sm:$0xff] %v3207_v31  ;;  %v3334_v0 = vadd.f32 %v3302_v24, %v3270_v52  ;;  %v2888_v6 = vadd.f32 %v4162_v50, %v2623_v14  ;;  %v2625_v21 = vadd.f32 %v2624_v58, %v6296_v49 }
 0x3c5   : > { %3367 = vst [vmem:[%s6329_s26 + $0x2c8] sm:$0xff] %v3335_v37  ;;  %2983 = vst [vmem:[%s6321_s23 + $0xe8] sm:$0xff] %v2951_v45  ;;  %v2628_v22 = vpop.f32.mrb[174].mxu0  ;;  %v3671_v7 = vpop.f32.mrb[174].mxu1 }
 0x3c6   : > { %3110 = vst [vmem:[%s6329_s26 + $0x2a0] sm:$0xff] %v3078_v33  ;;  %3238 = vst [vmem:[%s6329_s26 + $0x2a8] sm:$0xff] %v3206_v55  ;;  %v2920_v4 = vmul.f32 %v2625_v21, %v7146_v53  ;;  %v2629_v39 = vadd.f32 %v2628_v22, %v6294_v42  ;;  %v2855_v28 = vadd.f32 %v3671_v7, %v6300_v36  ;;  %v2630_v12 = vpop.f32.mrb[175].mxu0  ;;  %v2849_v1 = vpop.f32.mrb[175].mxu1  ;;  %v7147_v42 = vld [vmem:[#allocation24_spill] sm:$0xff] }
 0x3c7   : > { %3366 = vst [vmem:[%s6329_s26 + $0x2b0] sm:$0xff] %v3334_v0  ;;  %v2631_v54 = vadd.f32 %v2630_v12, %v6296_v49  ;;  %v2850_v26 = vadd.f32 %v2849_v1, %v6300_v36  ;;  %v7150_v49 = vld [vmem:[#allocation98_spill] sm:$0xff]  ;;  %v7151_v36 = vld [vmem:[#allocation21_spill] sm:$0xff] }
 0x3c8   : > { %v2952_v11 = vadd.f32 %v2920_v4, %v2888_v6  ;;  %v2889_v62 = vadd.f32 %v4163_v13, %v2629_v39  ;;  %v3049_v60 = vmul.f32 %v2855_v28, %v7147_v42  ;;  %v3177_v61 = vmul.f32 %v2855_v28, %v7148_v51 }
 0x3c9   : > { %v3305_v8 = vmul.f32 %v2855_v28, %v7149_v38  ;;  %v2921_v20 = vmul.f32 %v2631_v54, %v7150_v49  ;;  %v3048_v56 = vmul.f32 %v2850_v26, %v7151_v36  ;;  %v3176_v32 = vmul.f32 %v2850_v26, %v7152_v41 }
 0x3ca   : > { %2984 = vst [vmem:[%s6321_s23 + $0xf0] sm:$0xff] %v2952_v11  ;;  %v3081_v27 = vadd.f32 %v3049_v60, %v3017_v17  ;;  %v3209_v44 = vadd.f32 %v3177_v61, %v3145_v16  ;;  %v3304_v25 = vmul.f32 %v2850_v26, %v7153_v5 }
 0x3cb   : > { %v3337_v43 = vadd.f32 %v3305_v8, %v3273_v23  ;;  %v2953_v59 = vadd.f32 %v2921_v20, %v2889_v62  ;;  %v3080_v48 = vadd.f32 %v3048_v56, %v3016_v29  ;;  %v3208_v47 = vadd.f32 %v3176_v32, %v3144_v9 }
 0x3cc   : > { %3113 = vst [vmem:[%s6329_s26 + $0x2e8] sm:$0xff] %v3081_v27  ;;  %3241 = vst [vmem:[%s6329_s26 + $0x2f0] sm:$0xff] %v3209_v44  ;;  %v3336_v15 = vadd.f32 %v3304_v25, %v3272_v57 }
 0x3cd   : > { %3369 = vst [vmem:[%s6329_s26 + $0x2f8] sm:$0xff] %v3337_v43  ;;  %2985 = vst [vmem:[%s6321_s23 + $0xf8] sm:$0xff] %v2953_v59 }
 0x3ce   : > { %3112 = vst [vmem:[%s6329_s26 + $0x2d0] sm:$0xff] %v3080_v48  ;;  %3240 = vst [vmem:[%s6329_s26 + $0x2d8] sm:$0xff] %v3208_v47 }
 0x3cf   : > { %3368 = vst [vmem:[%s6329_s26 + $0x2e0] sm:$0xff] %v3336_v15 }
 0x3d0   : > { %4177 = shalt.err (!%p4174_p3)
}
 0x3d1   : > { %s4178_s19 = scalar_lea.hbm %s6790_s10, 4096  ;;  %s4182_s26 = scalar_lea.hbm %s6851_s7, 8192 }
 0x3d2   : > { %p4179_p4 = scmp.ne.s32.totalorder %s6790_s10, %s4178_s19  ;;  %p4183_p9 = scmp.lt.u32.totalorder %s6790_s10, %s6851_s7 }
 0x3d3   : > { %p4184_p10 = scmp.lt.u32.totalorder %s4182_s26, %s4178_s19  ;;  %p4186_p12 = scmp.lt.u32.totalorder %s4178_s19, %s6790_s10 }
 0x3d4   : > { %p4180_p7 = pnand %p4179_p4, %p4316_p5 }
 0x3d5   : > { %p4185_p11 = por %p4184_p10, %p4183_p9 }
 0x3d6   : > { %p4181_p8 = pneg %p4180_p7 }
 0x3d7   : > { %p4187_p13 = por %p4186_p12, %p4185_p11 }
 0x3d9   : > { %p4188_p0 = pnand %p4187_p13, %p4181_p8 }
 0x3db   : > { %4191 = shalt.err (!%p4188_p0)
}
 0x3dc   : > { %s4231_s12 = smov 128   ;;  %s4232_s13 = smov 8  }
 0x3dd   : > { %3897 = dma.vmem_to_hbm [thread:$0]  (%p4316_p5), %s6792_s18, 4096, %s6790_s10, %s6803_s21, %s4231_s12, %s4231_s12, %s4232_s13  }
 0x3de PF: > { %p3903_p1 = scmp.ge.s32.totalorder %s4226_s30, 2  ;;  %s3409_s17 = sand.u32 1, %s4214_s27  }
 0x3df   : > { %s3410_s20 = scalar_lea.sflag [#allocation3], %s3409_s17 }
 0x3e0   : > { %p3900_p2 = pnand %p3903_p1, %p4320_p6 }
 0x3e2   : > { %4209 = dma.done.wait (!%p3900_p2), %s3410_s20, 4096  }
 0x3e3   : > { %4211 = vsyncadd (!%p3900_p2), %s3410_s20, 4294963200  ;;  %p19_p3 = scmp.ge.s32.totalorder %s4303_s11, 4   ;;  %s7154_s27 = smov %s4218_s28 }
 0x3e4   : > { %s7155_s28 = smov %s4222_s29  ;;  %s7156_s29 = smov %s4314_s14 }
 0x3e5   : > { %s7157_s30 = smov %s4303_s11  ;;  %21 = sbr.rel (!%p19_p3) target bundleno = 3 (0x3), region = 98 }
 0x3ec   :  { %3424 = vsyncpa [#allocation3], 1 }
 0x3ed   :  { %3426 = vsyncpa [#allocation3 + $0x1], 1 }

</bundles_post_ra>
